<compile_context>
chip_gen: v7x
topology: tpu7x:2x2x1
jax: 0.10.0
libtpu: 0.0.40
codegen_flags: <defaults>
</compile_context>

<pallas_src>
import functools

import jax
import jax.numpy as jnp
import numpy as np
from jax.experimental import pallas as pl
from jax.experimental.pallas import tpu as pltpu


CFG = dict(
    image_size=32, patch_size=8, channels=3,
    sender_hidden=32, rank_hidden=16,
    vocab_size=8, max_len=1, temperature=1.0,
    receiver_hidden=64, receiver_dim=32, num_heads=2, num_layers=2,
    vision_dim_mlp=64,
)
CFG["n_patches"] = (CFG["image_size"] // CFG["patch_size"]) ** 2  # 16
assert CFG["max_len"] == 1  # kernel assumes a single message token per patch

_LAYER_KEYS = ("wqkv", "bqkv", "wo", "bo", "ln1_g", "ln1_b",
               "w1", "b1", "w2", "b2", "ln2_g", "ln2_b")


# ----------------------------------------------------------------------------
# The single fused PatchGame kernel
# ----------------------------------------------------------------------------
def _patch_game_kernel(
    xs_ref, xr_ref, u_ref,
    sym_w_ref, sym_add_ref,
    rank_w_ref, rkr_w_ref, rank_bias_ref,
    glog_w_ref, glog_b_ref,
    emb_w_ref, pos_add_ref, cls_pos_ref,
    wqkv_ref, bqkv_ref, wo_ref, bo_ref,
    ln1_g_ref, ln1_b_ref, w1_ref, b1_ref, w2_ref, b2_ref,
    ln2_g_ref, ln2_b_ref,
    tfc_w_ref, tfc_b_ref, vis_w_ref, vis_b_ref, vfc_w_ref, vfc_b_ref,
    o_ref,
    *, B, P, V, H, num_heads, num_layers, rank_t, temp, scale, eps):

  # ----- Gumbel noise: one combined EUP pass over all uniforms -------------
  u = u_ref[...]                                             # (B*P, V+2)
  g = -jnp.log(-jnp.log(u + 1e-20) + 1e-20)
  g_msg = g[:, :V]                                           # (B*P, V)
  g_sel = g[:, V:V + 1] - g[:, V + 1:V + 2]                  # (B*P, 1)  g0 - g1

  xs = xs_ref[...]                                           # (B*P, C*ps*ps)

  # ----- Speaker: patch_symbol Conv2d(k=s=ps) == matmul, + (pe + bias) -----
  sym = jnp.dot(xs, sym_w_ref[...], preferred_element_type=jnp.float32)
  sym = sym + sym_add_ref[...]                               # (B*P, Hs)

  # TODO(synk): ResNetNoPool rank backbone replaced by patchify+linear proxy.
  remb = jnp.dot(xs, rank_w_ref[...], preferred_element_type=jnp.float32)
  # ranker Linear(Rh, 1) folded into a VPU multiply + reduce (no N=1 matmul);
  # rank_b / ranker_b pre-folded into one scalar bias in the wrapper.
  ranks = jnp.sum(remb * rkr_w_ref[...], axis=1, keepdims=True) + rank_bias_ref[...]

  # sender_norm == 'l2': F.normalize over the patch dim, per batch element.
  chunks = []
  for b in range(B):
    r = ranks[b * P:(b + 1) * P, :]                          # (P, 1)
    nrm = jnp.sqrt(jnp.sum(r * r))
    chunks.append(r / jnp.maximum(nrm, 1e-12))
  ranks = jnp.concatenate(chunks, axis=0)                    # (B*P, 1)

  # topk is None: gumbel_softmax(stack([r, 1-r]))[..., 0] in closed form:
  #   p0 = sigmoid((2r - 1 + g0 - g1) / T)
  z = (2.0 * ranks - 1.0 + g_sel) / rank_t
  sel = 1.0 / (1.0 + jnp.exp(-z))                            # (B*P, 1)

  # GumbelWrapper (max_len == 1): message logits -> gumbel-softmax over vocab.
  logits = jnp.dot(sym, glog_w_ref[...], preferred_element_type=jnp.float32)
  logits = logits + glog_b_ref[...]                          # (B*P, V)
  y = (logits + g_msg) / temp
  y = y - jnp.max(y, axis=-1, keepdims=True)
  e = jnp.exp(y)
  m = e / jnp.sum(e, axis=-1, keepdims=True)
  m_sel = m * sel                                            # (B*P, V)

  # RelaxedEmbedding on soft one-hots == matmul; positional rows 1..P added.
  msg_emb = jnp.dot(m_sel, emb_w_ref[...],
                    preferred_element_type=jnp.float32) + pos_add_ref[...]   # (B*P, H)

  # ----- Listener: TransformerEncoder (post-norm, ReLU FFN, dropout=0) -----
  dh = H // num_heads
  sc_attn = 1.0 / float(np.sqrt(dh))
  cls_row = cls_pos_ref[...]                                 # (1, H)  cls + pos[0]

  def _ln(t, gam, bet):
    mu = jnp.mean(t, axis=-1, keepdims=True)
    var = jnp.mean((t - mu) * (t - mu), axis=-1, keepdims=True)
    return (t - mu) * jax.lax.rsqrt(var + eps) * gam + bet

  cls_feats = []
  for b in range(B):
    x = jnp.concatenate([cls_row, msg_emb[b * P:(b + 1) * P, :]], axis=0)  # (S, H)
    for l in range(num_layers):
      qkv = jnp.dot(x, wqkv_ref[l], preferred_element_type=jnp.float32)
      qkv = qkv + bqkv_ref[l]                                # (S, 3H)
      wo = wo_ref[l]
      attn = jnp.zeros_like(x)
      for h in range(num_heads):
        q = qkv[:, h * dh:(h + 1) * dh]
        k = qkv[:, H + h * dh:H + (h + 1) * dh]
        v = qkv[:, 2 * H + h * dh:2 * H + (h + 1) * dh]
        s = jax.lax.dot_general(q, k, (((1,), (1,)), ((), ())),
                                preferred_element_type=jnp.float32) * sc_attn
        s = s - jnp.max(s, axis=-1, keepdims=True)
        p = jnp.exp(s)
        p = p / jnp.sum(p, axis=-1, keepdims=True)
        oh = jnp.dot(p, v, preferred_element_type=jnp.float32)            # (S, dh)
        # output projection folded per-head into row-blocks of W_o (no concat)
        attn = attn + jnp.dot(oh, wo[h * dh:(h + 1) * dh, :],
                              preferred_element_type=jnp.float32)
      attn = attn + bo_ref[l]
      x = _ln(x + attn, ln1_g_ref[l], ln1_b_ref[l])
      f = jnp.dot(x, w1_ref[l], preferred_element_type=jnp.float32) + b1_ref[l]
      f = jnp.maximum(f, 0.0)
      f = jnp.dot(f, w2_ref[l], preferred_element_type=jnp.float32) + b2_ref[l]
      x = _ln(x + f, ln2_g_ref[l], ln2_b_ref[l])
    cls_feats.append(x[0:1, :])
  cls_feat = jnp.concatenate(cls_feats, axis=0)              # (B, H)

  # ----- Listener tail: text head, vision proxy, CLIP logits ---------------
  # TODO(synk): DINO Head replaced by a single Linear projection.
  m_emb = jnp.dot(cls_feat, tfc_w_ref[...],
                  preferred_element_type=jnp.float32) + tfc_b_ref[...]      # (B, D)

  # TODO(synk): resnet18 vision backbone replaced by patchify+linear+mean-pool.
  xr = xr_ref[...]                                           # (B*P, C*ps*ps)
  feat = jnp.dot(xr, vis_w_ref[...],
                 preferred_element_type=jnp.float32) + vis_b_ref[...]       # (B*P, Dm)
  pooled_rows = []
  for b in range(B):
    pooled_rows.append(jnp.mean(feat[b * P:(b + 1) * P, :], axis=0, keepdims=True))
  pooled = jnp.concatenate(pooled_rows, axis=0)              # (B, Dm)
  x_emb = jnp.dot(pooled, vfc_w_ref[...],
                  preferred_element_type=jnp.float32) + vfc_b_ref[...]      # (B, D)

  m_n = m_emb / jnp.maximum(
      jnp.sqrt(jnp.sum(m_emb * m_emb, axis=-1, keepdims=True)), 1e-12)
  x_n = x_emb / jnp.maximum(
      jnp.sqrt(jnp.sum(x_emb * x_emb, axis=-1, keepdims=True)), 1e-12)

  # CLIP logits (multigpu_loss=False path); contract last dims, no .T needed.
  lpi = scale * jax.lax.dot_general(x_n, m_n, (((1,), (1,)), ((), ())),
                                    preferred_element_type=jnp.float32)     # (B, B)
  lpt = scale * jax.lax.dot_general(m_n, x_n, (((1,), (1,)), ((), ())),
                                    preferred_element_type=jnp.float32)     # (B, B)
  o_ref[...] = jnp.concatenate([lpi, lpt], axis=0)           # (2B, B)


# ----------------------------------------------------------------------------
# wrapper
# ----------------------------------------------------------------------------
def patchify(x, ps):
  # x: (B, C, H, W) NCHW -> (B, n_patches, C*ps*ps), feature order (C, ph, pw)
  B, C, H, W = x.shape
  x = x.reshape(B, C, H // ps, ps, W // ps, ps)
  x = x.transpose(0, 2, 4, 1, 3, 5)
  return x.reshape(B, (H // ps) * (W // ps), C * ps * ps)


def patch_game_forward(params, im_sender, im_receiver, key_ranks, key_msg,
                       temperature=None):
  T = float(temperature if temperature is not None else CFG["temperature"])
  rank_t = 1.0
  B = im_sender.shape[0]
  P, V, Hr = CFG["n_patches"], CFG["vocab_size"], CFG["receiver_hidden"]
  L = CFG["num_layers"]

  patches_s = patchify(im_sender, CFG["patch_size"]).reshape(B * P, -1)
  patches_r = patchify(im_receiver, CFG["patch_size"]).reshape(B * P, -1)

  # Uniforms for every Gumbel draw (message noise + the 2-class selection noise),
  # one combined block; per-batch streams are distinct by construction.
  u_msg = jax.random.uniform(key_msg, (B * P, V), jnp.float32)
  u_sel = jax.random.uniform(key_ranks, (B * P, 2), jnp.float32)
  u = jnp.concatenate([u_msg, u_sel], axis=1)                # (B*P, V+2)

  # Pre-folded broadcast constants (fewer tiny (1,N) kernel inputs).
  sym_add = jnp.tile(params["pe_symbol"] + params["symbol_b"], (B, 1))   # (B*P, Hs)
  pos_add = jnp.tile(params["pos"][1:], (B, 1))                          # (B*P, Hr)
  cls_pos = params["cls"] + params["pos"][0:1]                           # (1, Hr)
  rank_bias = (jnp.sum(params["rank_b"] * params["ranker_w"],
                       axis=1, keepdims=True) + params["ranker_b"])      # (1, 1)

  # Stack the two encoder layers along a leading layer dim (fused in-kernel).
  stk = {k: jnp.stack([lp[k] for lp in params["layers"]], axis=0)
         for k in _LAYER_KEYS}

  logit_scale = float(np.exp(np.log(1.0 / 0.07)))

  args = (patches_s, patches_r, u,
          params["symbol_w"], sym_add,
          params["rank_w"], params["ranker_w"], rank_bias,
          params["glog_w"], params["glog_b"],
          params["emb_w"], pos_add, cls_pos,
          stk["wqkv"], stk["bqkv"], stk["wo"], stk["bo"],
          stk["ln1_g"], stk["ln1_b"], stk["w1"], stk["b1"],
          stk["w2"], stk["b2"], stk["ln2_g"], stk["ln2_b"],
          params["text_fc_w"], params["text_fc_b"],
          params["vision_w"], params["vision_b"],
          params["vision_fc_w"], params["vision_fc_b"])

  kernel = functools.partial(
      _patch_game_kernel, B=B, P=P, V=V, H=Hr,
      num_heads=CFG["num_heads"], num_layers=L,
      rank_t=rank_t, temp=T, scale=logit_scale, eps=1e-5)

  # Single fused pallas_call, no grid: all weights (<1 MiB) and all activations
  # stay in VMEM/vregs; the only HBM writeback is the (2B, B) logits.
  logits = pl.pallas_call(
      kernel,
      out_shape=jax.ShapeDtypeStruct((2 * B, B), jnp.float32),
      in_specs=[pl.BlockSpec(memory_space=pltpu.MemorySpace.VMEM)] * len(args),
      out_specs=pl.BlockSpec(memory_space=pltpu.MemorySpace.VMEM),
      compiler_params=pltpu.CompilerParams(vmem_limit_bytes=32 * 1024 * 1024),
  )(*args)

  labels = jnp.tile(jnp.arange(B, dtype=jnp.int32), 2)
  return logits, labels


# ----------------------------------------------------------------------------
# deterministic parameter init (kernel-ready layouts; QKV pre-concatenated)
# ----------------------------------------------------------------------------
def init_params(key):
  keys = iter(jax.random.split(key, 128))

  def nrm(shape, std=0.02):
    return std * jax.random.normal(next(keys), shape, jnp.float32)

  C, ps = CFG["channels"], CFG["patch_size"]
  P, Hs = CFG["n_patches"], CFG["sender_hidden"]
  Rh, V, Lm = CFG["rank_hidden"], CFG["vocab_size"], CFG["max_len"]
  Hr, D, Dm = CFG["receiver_hidden"], CFG["receiver_dim"], CFG["vision_dim_mlp"]
  pd = C * ps * ps
  S = P * Lm + 1

  params = dict(
      # Speaker
      symbol_w=nrm((pd, Hs)), symbol_b=jnp.zeros((1, Hs), jnp.float32),
      pe_symbol=jnp.zeros((P, Hs), jnp.float32),
      rank_w=nrm((pd, Rh)), rank_b=jnp.zeros((1, Rh), jnp.float32),
      ranker_w=nrm((1, Rh)), ranker_b=jnp.zeros((1, 1), jnp.float32),
      # GumbelWrapper
      glog_w=nrm((Hs, V * Lm)), glog_b=jnp.zeros((1, V * Lm), jnp.float32),
      # Listener
      emb_w=nrm((V, Hr), std=0.02),
      pos=nrm((S, Hr), std=0.01),
      cls=nrm((1, Hr), std=0.02),
      text_fc_w=nrm((Hr, D)), text_fc_b=jnp.zeros((1, D), jnp.float32),
      vision_w=nrm((pd, Dm)), vision_b=jnp.zeros((1, Dm), jnp.float32),
      vision_fc_w=nrm((Dm, D)), vision_fc_b=jnp.zeros((1, D), jnp.float32),
  )
  layers = []
  for _ in range(CFG["num_layers"]):
    layers.append(dict(
        wqkv=nrm((Hr, 3 * Hr)), bqkv=jnp.zeros((1, 3 * Hr), jnp.float32),
        wo=nrm((Hr, Hr)), bo=jnp.zeros((1, Hr), jnp.float32),
        ln1_g=jnp.ones((1, Hr), jnp.float32),
        ln1_b=jnp.zeros((1, Hr), jnp.float32),
        w1=nrm((Hr, 4 * Hr)), b1=jnp.zeros((1, 4 * Hr), jnp.float32),
        w2=nrm((4 * Hr, Hr)), b2=jnp.zeros((1, Hr), jnp.float32),
        ln2_g=jnp.ones((1, Hr), jnp.float32),
        ln2_b=jnp.zeros((1, Hr), jnp.float32),
    ))
  params["layers"] = layers
  return params


if __name__ == "__main__":
  key = jax.random.PRNGKey(0)
  k_params, k_im1, k_im2, k_ranks, k_msg = jax.random.split(key, 5)
  params = init_params(k_params)

  B = 2
  shp = (B, CFG["channels"], CFG["image_size"], CFG["image_size"])
  im_sender = jax.random.normal(k_im1, shp, jnp.float32)
  im_receiver = jax.random.normal(k_im2, shp, jnp.float32)

  fwd = jax.jit(patch_game_forward)
  logits, labels = fwd(params, im_sender, im_receiver, k_ranks, k_msg)
  jax.block_until_ready(logits)
  jax.block_until_ready(labels)
  assert logits.shape == (2 * B, B)
  assert labels.shape == (2 * B,)
  assert bool(jnp.all(jnp.isfinite(logits)))
  print("KERNEL_OK")
</pallas_src>

<mosaic_0001>
module attributes {stable_mosaic.version = 11 : i64} {
  func.func @_patch_game_kernel(%arg0: memref<32x192xf32, #tpu.memory_space<vmem>>, %arg1: memref<32x192xf32, #tpu.memory_space<vmem>>, %arg2: memref<32x10xf32, #tpu.memory_space<vmem>>, %arg3: memref<192x32xf32, #tpu.memory_space<vmem>>, %arg4: memref<32x32xf32, #tpu.memory_space<vmem>>, %arg5: memref<192x16xf32, #tpu.memory_space<vmem>>, %arg6: memref<1x16xf32, #tpu.memory_space<vmem>>, %arg7: memref<1x1xf32, #tpu.memory_space<vmem>>, %arg8: memref<32x8xf32, #tpu.memory_space<vmem>>, %arg9: memref<1x8xf32, #tpu.memory_space<vmem>>, %arg10: memref<8x64xf32, #tpu.memory_space<vmem>>, %arg11: memref<32x64xf32, #tpu.memory_space<vmem>>, %arg12: memref<1x64xf32, #tpu.memory_space<vmem>>, %arg13: memref<2x64x192xf32, #tpu.memory_space<vmem>>, %arg14: memref<2x1x192xf32, #tpu.memory_space<vmem>>, %arg15: memref<2x64x64xf32, #tpu.memory_space<vmem>>, %arg16: memref<2x1x64xf32, #tpu.memory_space<vmem>>, %arg17: memref<2x1x64xf32, #tpu.memory_space<vmem>>, %arg18: memref<2x1x64xf32, #tpu.memory_space<vmem>>, %arg19: memref<2x64x256xf32, #tpu.memory_space<vmem>>, %arg20: memref<2x1x256xf32, #tpu.memory_space<vmem>>, %arg21: memref<2x256x64xf32, #tpu.memory_space<vmem>>, %arg22: memref<2x1x64xf32, #tpu.memory_space<vmem>>, %arg23: memref<2x1x64xf32, #tpu.memory_space<vmem>>, %arg24: memref<2x1x64xf32, #tpu.memory_space<vmem>>, %arg25: memref<64x32xf32, #tpu.memory_space<vmem>>, %arg26: memref<1x32xf32, #tpu.memory_space<vmem>>, %arg27: memref<192x64xf32, #tpu.memory_space<vmem>>, %arg28: memref<1x64xf32, #tpu.memory_space<vmem>>, %arg29: memref<64x32xf32, #tpu.memory_space<vmem>>, %arg30: memref<1x32xf32, #tpu.memory_space<vmem>>, %arg31: memref<4x2xf32, #tpu.memory_space<vmem>>) attributes {dimension_semantics = [], scalar_prefetch = 0 : i64, scratch_operands = 0 : i64, tpu.core_type = #tpu.core_type<tc>} {
    %c0 = arith.constant 0 : index
    %c0_0 = arith.constant 0 : index
    %0 = vector.load %arg2[%c0, %c0_0] : memref<32x10xf32, #tpu.memory_space<vmem>>, vector<32x10xf32>
    %cst = arith.constant 9.99999968E-21 : f32
    %1 = vector.broadcast %cst : f32 to vector<32x10xf32>
    %2 = arith.addf %0, %1 : vector<32x10xf32>
    %3 = math.log %2 : vector<32x10xf32>
    %cst_1 = arith.constant 0.000000e+00 : f32
    %4 = vector.broadcast %cst_1 : f32 to vector<32x10xf32>
    %5 = arith.subf %4, %3 : vector<32x10xf32>
    %cst_2 = arith.constant 9.99999968E-21 : f32
    %6 = vector.broadcast %cst_2 : f32 to vector<32x10xf32>
    %7 = arith.addf %5, %6 : vector<32x10xf32>
    %8 = math.log %7 : vector<32x10xf32>
    %cst_3 = arith.constant 0.000000e+00 : f32
    %9 = vector.broadcast %cst_3 : f32 to vector<32x10xf32>
    %10 = arith.subf %9, %8 : vector<32x10xf32>
    %11 = vector.extract_strided_slice %10 {offsets = [0, 0], sizes = [32, 8], strides = [1, 1]} : vector<32x10xf32> to vector<32x8xf32>
    %12 = vector.extract_strided_slice %10 {offsets = [0, 8], sizes = [32, 1], strides = [1, 1]} : vector<32x10xf32> to vector<32x1xf32>
    %13 = vector.extract_strided_slice %10 {offsets = [0, 9], sizes = [32, 1], strides = [1, 1]} : vector<32x10xf32> to vector<32x1xf32>
    %14 = arith.subf %12, %13 : vector<32x1xf32>
    %c0_4 = arith.constant 0 : index
    %c0_5 = arith.constant 0 : index
    %15 = vector.load %arg0[%c0_4, %c0_5] : memref<32x192xf32, #tpu.memory_space<vmem>>, vector<32x192xf32>
    %c0_6 = arith.constant 0 : index
    %c0_7 = arith.constant 0 : index
    %16 = vector.load %arg3[%c0_6, %c0_7] : memref<192x32xf32, #tpu.memory_space<vmem>>, vector<192x32xf32>
    %cst_8 = arith.constant dense<0.000000e+00> : vector<32x32xf32>
    %17 = tpu.matmul %15, %16, %cst_8 {dimension_numbers = #tpu.dot_dimension_numbers<[1], [0], [0], [1], [0, 0, 1, 1], [], []>} : vector<32x192xf32>, vector<192x32xf32>, vector<32x32xf32> -> vector<32x32xf32>
    %c0_9 = arith.constant 0 : index
    %c0_10 = arith.constant 0 : index
    %18 = vector.load %arg4[%c0_9, %c0_10] : memref<32x32xf32, #tpu.memory_space<vmem>>, vector<32x32xf32>
    %19 = arith.addf %17, %18 : vector<32x32xf32>
    %c0_11 = arith.constant 0 : index
    %c0_12 = arith.constant 0 : index
    %20 = vector.load %arg5[%c0_11, %c0_12] : memref<192x16xf32, #tpu.memory_space<vmem>>, vector<192x16xf32>
    %cst_13 = arith.constant dense<0.000000e+00> : vector<32x16xf32>
    %21 = tpu.matmul %15, %20, %cst_13 {dimension_numbers = #tpu.dot_dimension_numbers<[1], [0], [0], [1], [0, 0, 1, 1], [], []>} : vector<32x192xf32>, vector<192x16xf32>, vector<32x16xf32> -> vector<32x16xf32>
    %c0_14 = arith.constant 0 : index
    %c0_15 = arith.constant 0 : index
    %22 = vector.load %arg6[%c0_14, %c0_15] : memref<1x16xf32, #tpu.memory_space<vmem>>, vector<1x16xf32>
    %23 = vector.broadcast %22 : vector<1x16xf32> to vector<32x16xf32>
    %24 = arith.mulf %21, %23 : vector<32x16xf32>
    %cst_16 = arith.constant dense<0.000000e+00> : vector<32xf32>
    %25 = vector.multi_reduction <add>, %24, %cst_16 [1] : vector<32x16xf32> to vector<32xf32>
    %26 = vector.shape_cast %25 : vector<32xf32> to vector<32x1xf32>
    %c0_17 = arith.constant 0 : index
    %c0_18 = arith.constant 0 : index
    %27 = vector.load %arg7[%c0_17, %c0_18] : memref<1x1xf32, #tpu.memory_space<vmem>>, vector<1x1xf32>
    %28 = vector.broadcast %27 : vector<1x1xf32> to vector<32x1xf32>
    %29 = arith.addf %26, %28 : vector<32x1xf32>
    %30 = vector.extract_strided_slice %29 {offsets = [0, 0], sizes = [16, 1], strides = [1, 1]} : vector<32x1xf32> to vector<16x1xf32>
    %31 = arith.mulf %30, %30 : vector<16x1xf32>
    %32 = vector.shape_cast %31 : vector<16x1xf32> to vector<1x16x1xf32>
    %cst_19 = arith.constant dense<0.000000e+00> : vector<1xf32>
    %33 = vector.multi_reduction <add>, %32, %cst_19 [1, 2] : vector<1x16x1xf32> to vector<1xf32>
    %34 = vector.shape_cast %33 : vector<1xf32> to vector<1x1x1xf32>
    %35 = vector.extract %34[0, 0, 0] : f32 from vector<1x1x1xf32>
    %36 = math.sqrt %35 : f32
    %cst_20 = arith.constant 9.99999996E-13 : f32
    %37 = arith.maximumf %36, %cst_20 : f32
    %38 = vector.broadcast %37 : f32 to vector<16x1xf32>
    %39 = arith.divf %30, %38 : vector<16x1xf32>
    %40 = vector.extract_strided_slice %29 {offsets = [16, 0], sizes = [16, 1], strides = [1, 1]} : vector<32x1xf32> to vector<16x1xf32>
    %41 = arith.mulf %40, %40 : vector<16x1xf32>
    %42 = vector.shape_cast %41 : vector<16x1xf32> to vector<1x16x1xf32>
    %cst_21 = arith.constant dense<0.000000e+00> : vector<1xf32>
    %43 = vector.multi_reduction <add>, %42, %cst_21 [1, 2] : vector<1x16x1xf32> to vector<1xf32>
    %44 = vector.shape_cast %43 : vector<1xf32> to vector<1x1x1xf32>
    %45 = vector.extract %44[0, 0, 0] : f32 from vector<1x1x1xf32>
    %46 = math.sqrt %45 : f32
    %cst_22 = arith.constant 9.99999996E-13 : f32
    %47 = arith.maximumf %46, %cst_22 : f32
    %48 = vector.broadcast %47 : f32 to vector<16x1xf32>
    %49 = arith.divf %40, %48 : vector<16x1xf32>
    %50 = tpu.concatenate %39, %49 in 0 : vector<16x1xf32>, vector<16x1xf32> -> vector<32x1xf32>
    %cst_23 = arith.constant 2.000000e+00 : f32
    %51 = vector.broadcast %cst_23 : f32 to vector<32x1xf32>
    %52 = arith.mulf %51, %50 : vector<32x1xf32>
    %cst_24 = arith.constant 1.000000e+00 : f32
    %53 = vector.broadcast %cst_24 : f32 to vector<32x1xf32>
    %54 = arith.subf %52, %53 : vector<32x1xf32>
    %55 = arith.addf %54, %14 : vector<32x1xf32>
    %cst_25 = arith.constant 1.000000e+00 : f32
    %56 = vector.broadcast %cst_25 : f32 to vector<32x1xf32>
    %57 = arith.divf %55, %56 : vector<32x1xf32>
    %cst_26 = arith.constant 0.000000e+00 : f32
    %58 = vector.broadcast %cst_26 : f32 to vector<32x1xf32>
    %59 = arith.subf %58, %57 : vector<32x1xf32>
    %60 = math.exp %59 : vector<32x1xf32>
    %cst_27 = arith.constant 1.000000e+00 : f32
    %61 = vector.broadcast %cst_27 : f32 to vector<32x1xf32>
    %62 = arith.addf %61, %60 : vector<32x1xf32>
    %cst_28 = arith.constant 1.000000e+00 : f32
    %63 = vector.broadcast %cst_28 : f32 to vector<32x1xf32>
    %64 = arith.divf %63, %62 : vector<32x1xf32>
    %c0_29 = arith.constant 0 : index
    %c0_30 = arith.constant 0 : index
    %65 = vector.load %arg8[%c0_29, %c0_30] : memref<32x8xf32, #tpu.memory_space<vmem>>, vector<32x8xf32>
    %cst_31 = arith.constant dense<0.000000e+00> : vector<32x8xf32>
    %66 = tpu.matmul %19, %65, %cst_31 {dimension_numbers = #tpu.dot_dimension_numbers<[1], [0], [0], [1], [0, 0, 1, 1], [], []>} : vector<32x32xf32>, vector<32x8xf32>, vector<32x8xf32> -> vector<32x8xf32>
    %c0_32 = arith.constant 0 : index
    %c0_33 = arith.constant 0 : index
    %67 = vector.load %arg9[%c0_32, %c0_33] : memref<1x8xf32, #tpu.memory_space<vmem>>, vector<1x8xf32>
    %68 = vector.broadcast %67 : vector<1x8xf32> to vector<32x8xf32>
    %69 = arith.addf %66, %68 : vector<32x8xf32>
    %70 = arith.addf %69, %11 : vector<32x8xf32>
    %cst_34 = arith.constant 1.000000e+00 : f32
    %71 = vector.broadcast %cst_34 : f32 to vector<32x8xf32>
    %72 = arith.divf %70, %71 : vector<32x8xf32>
    %cst_35 = arith.constant dense<0xFF800000> : vector<32xf32>
    %73 = vector.multi_reduction <maximumf>, %72, %cst_35 [1] : vector<32x8xf32> to vector<32xf32>
    %74 = vector.shape_cast %73 : vector<32xf32> to vector<32x1xf32>
    %75 = vector.broadcast %74 : vector<32x1xf32> to vector<32x8xf32>
    %76 = arith.subf %72, %75 : vector<32x8xf32>
    %77 = math.exp %76 : vector<32x8xf32>
    %cst_36 = arith.constant dense<0.000000e+00> : vector<32xf32>
    %78 = vector.multi_reduction <add>, %77, %cst_36 [1] : vector<32x8xf32> to vector<32xf32>
    %79 = vector.shape_cast %78 : vector<32xf32> to vector<32x1xf32>
    %80 = vector.broadcast %79 : vector<32x1xf32> to vector<32x8xf32>
    %81 = arith.divf %77, %80 : vector<32x8xf32>
    %82 = vector.broadcast %64 : vector<32x1xf32> to vector<32x8xf32>
    %83 = arith.mulf %81, %82 : vector<32x8xf32>
    %c0_37 = arith.constant 0 : index
    %c0_38 = arith.constant 0 : index
    %84 = vector.load %arg10[%c0_37, %c0_38] : memref<8x64xf32, #tpu.memory_space<vmem>>, vector<8x64xf32>
    %cst_39 = arith.constant dense<0.000000e+00> : vector<32x64xf32>
    %85 = tpu.matmul %83, %84, %cst_39 {dimension_numbers = #tpu.dot_dimension_numbers<[1], [0], [0], [1], [0, 0, 1, 1], [], []>} : vector<32x8xf32>, vector<8x64xf32>, vector<32x64xf32> -> vector<32x64xf32>
    %c0_40 = arith.constant 0 : index
    %c0_41 = arith.constant 0 : index
    %86 = vector.load %arg11[%c0_40, %c0_41] : memref<32x64xf32, #tpu.memory_space<vmem>>, vector<32x64xf32>
    %87 = arith.addf %85, %86 : vector<32x64xf32>
    %c0_42 = arith.constant 0 : index
    %c0_43 = arith.constant 0 : index
    %88 = vector.load %arg12[%c0_42, %c0_43] : memref<1x64xf32, #tpu.memory_space<vmem>>, vector<1x64xf32>
    %89 = vector.extract_strided_slice %87 {offsets = [0, 0], sizes = [16, 64], strides = [1, 1]} : vector<32x64xf32> to vector<16x64xf32>
    %90 = tpu.concatenate %88, %89 in 0 : vector<1x64xf32>, vector<16x64xf32> -> vector<17x64xf32>
    %c0_44 = arith.constant 0 : index
    %c0_45 = arith.constant 0 : index
    %c0_46 = arith.constant 0 : index
    %91 = vector.load %arg13[%c0_44, %c0_45, %c0_46] : memref<2x64x192xf32, #tpu.memory_space<vmem>>, vector<1x64x192xf32>
    %92 = vector.shape_cast %91 : vector<1x64x192xf32> to vector<64x192xf32>
    %cst_47 = arith.constant dense<0.000000e+00> : vector<17x192xf32>
    %93 = tpu.matmul %90, %92, %cst_47 {dimension_numbers = #tpu.dot_dimension_numbers<[1], [0], [0], [1], [0, 0, 1, 1], [], []>} : vector<17x64xf32>, vector<64x192xf32>, vector<17x192xf32> -> vector<17x192xf32>
    %c0_48 = arith.constant 0 : index
    %c0_49 = arith.constant 0 : index
    %c0_50 = arith.constant 0 : index
    %94 = vector.load %arg14[%c0_48, %c0_49, %c0_50] : memref<2x1x192xf32, #tpu.memory_space<vmem>>, vector<1x1x192xf32>
    %95 = vector.shape_cast %94 : vector<1x1x192xf32> to vector<1x192xf32>
    %96 = vector.broadcast %95 : vector<1x192xf32> to vector<17x192xf32>
    %97 = arith.addf %93, %96 : vector<17x192xf32>
    %c0_51 = arith.constant 0 : index
    %c0_52 = arith.constant 0 : index
    %c0_53 = arith.constant 0 : index
    %98 = vector.load %arg15[%c0_51, %c0_52, %c0_53] : memref<2x64x64xf32, #tpu.memory_space<vmem>>, vector<1x64x64xf32>
    %99 = vector.shape_cast %98 : vector<1x64x64xf32> to vector<64x64xf32>
    %cst_54 = arith.constant 0.000000e+00 : f32
    %100 = vector.broadcast %cst_54 : f32 to vector<17x64xf32>
    %101 = vector.extract_strided_slice %97 {offsets = [0, 0], sizes = [17, 32], strides = [1, 1]} : vector<17x192xf32> to vector<17x32xf32>
    %102 = vector.extract_strided_slice %97 {offsets = [0, 64], sizes = [17, 32], strides = [1, 1]} : vector<17x192xf32> to vector<17x32xf32>
    %103 = vector.extract_strided_slice %97 {offsets = [0, 128], sizes = [17, 32], strides = [1, 1]} : vector<17x192xf32> to vector<17x32xf32>
    %cst_55 = arith.constant dense<0.000000e+00> : vector<17x17xf32>
    %104 = tpu.matmul %101, %102, %cst_55 {dimension_numbers = #tpu.dot_dimension_numbers<[1], [1], [0], [0], [0, 0, 1, 0], [], []>} : vector<17x32xf32>, vector<17x32xf32>, vector<17x17xf32> -> vector<17x17xf32>
    %cst_56 = arith.constant 0.176776692 : f32
    %105 = vector.broadcast %cst_56 : f32 to vector<17x17xf32>
    %106 = arith.mulf %104, %105 : vector<17x17xf32>
    %cst_57 = arith.constant dense<0xFF800000> : vector<17xf32>
    %107 = vector.multi_reduction <maximumf>, %106, %cst_57 [1] : vector<17x17xf32> to vector<17xf32>
    %108 = vector.shape_cast %107 : vector<17xf32> to vector<17x1xf32>
    %109 = vector.broadcast %108 : vector<17x1xf32> to vector<17x17xf32>
    %110 = arith.subf %106, %109 : vector<17x17xf32>
    %111 = math.exp %110 : vector<17x17xf32>
    %cst_58 = arith.constant dense<0.000000e+00> : vector<17xf32>
    %112 = vector.multi_reduction <add>, %111, %cst_58 [1] : vector<17x17xf32> to vector<17xf32>
    %113 = vector.shape_cast %112 : vector<17xf32> to vector<17x1xf32>
    %114 = vector.broadcast %113 : vector<17x1xf32> to vector<17x17xf32>
    %115 = arith.divf %111, %114 : vector<17x17xf32>
    %cst_59 = arith.constant dense<0.000000e+00> : vector<17x32xf32>
    %116 = tpu.matmul %115, %103, %cst_59 {dimension_numbers = #tpu.dot_dimension_numbers<[1], [0], [0], [1], [0, 0, 1, 1], [], []>} : vector<17x17xf32>, vector<17x32xf32>, vector<17x32xf32> -> vector<17x32xf32>
    %117 = vector.extract_strided_slice %99 {offsets = [0, 0], sizes = [32, 64], strides = [1, 1]} : vector<64x64xf32> to vector<32x64xf32>
    %cst_60 = arith.constant dense<0.000000e+00> : vector<17x64xf32>
    %118 = tpu.matmul %116, %117, %cst_60 {dimension_numbers = #tpu.dot_dimension_numbers<[1], [0], [0], [1], [0, 0, 1, 1], [], []>} : vector<17x32xf32>, vector<32x64xf32>, vector<17x64xf32> -> vector<17x64xf32>
    %119 = arith.addf %100, %118 : vector<17x64xf32>
    %120 = vector.extract_strided_slice %97 {offsets = [0, 32], sizes = [17, 32], strides = [1, 1]} : vector<17x192xf32> to vector<17x32xf32>
    %121 = vector.extract_strided_slice %97 {offsets = [0, 96], sizes = [17, 32], strides = [1, 1]} : vector<17x192xf32> to vector<17x32xf32>
    %122 = vector.extract_strided_slice %97 {offsets = [0, 160], sizes = [17, 32], strides = [1, 1]} : vector<17x192xf32> to vector<17x32xf32>
    %cst_61 = arith.constant dense<0.000000e+00> : vector<17x17xf32>
    %123 = tpu.matmul %120, %121, %cst_61 {dimension_numbers = #tpu.dot_dimension_numbers<[1], [1], [0], [0], [0, 0, 1, 0], [], []>} : vector<17x32xf32>, vector<17x32xf32>, vector<17x17xf32> -> vector<17x17xf32>
    %cst_62 = arith.constant 0.176776692 : f32
    %124 = vector.broadcast %cst_62 : f32 to vector<17x17xf32>
    %125 = arith.mulf %123, %124 : vector<17x17xf32>
    %cst_63 = arith.constant dense<0xFF800000> : vector<17xf32>
    %126 = vector.multi_reduction <maximumf>, %125, %cst_63 [1] : vector<17x17xf32> to vector<17xf32>
    %127 = vector.shape_cast %126 : vector<17xf32> to vector<17x1xf32>
    %128 = vector.broadcast %127 : vector<17x1xf32> to vector<17x17xf32>
    %129 = arith.subf %125, %128 : vector<17x17xf32>
    %130 = math.exp %129 : vector<17x17xf32>
    %cst_64 = arith.constant dense<0.000000e+00> : vector<17xf32>
    %131 = vector.multi_reduction <add>, %130, %cst_64 [1] : vector<17x17xf32> to vector<17xf32>
    %132 = vector.shape_cast %131 : vector<17xf32> to vector<17x1xf32>
    %133 = vector.broadcast %132 : vector<17x1xf32> to vector<17x17xf32>
    %134 = arith.divf %130, %133 : vector<17x17xf32>
    %cst_65 = arith.constant dense<0.000000e+00> : vector<17x32xf32>
    %135 = tpu.matmul %134, %122, %cst_65 {dimension_numbers = #tpu.dot_dimension_numbers<[1], [0], [0], [1], [0, 0, 1, 1], [], []>} : vector<17x17xf32>, vector<17x32xf32>, vector<17x32xf32> -> vector<17x32xf32>
    %136 = vector.extract_strided_slice %99 {offsets = [32, 0], sizes = [32, 64], strides = [1, 1]} : vector<64x64xf32> to vector<32x64xf32>
    %cst_66 = arith.constant dense<0.000000e+00> : vector<17x64xf32>
    %137 = tpu.matmul %135, %136, %cst_66 {dimension_numbers = #tpu.dot_dimension_numbers<[1], [0], [0], [1], [0, 0, 1, 1], [], []>} : vector<17x32xf32>, vector<32x64xf32>, vector<17x64xf32> -> vector<17x64xf32>
    %138 = arith.addf %119, %137 : vector<17x64xf32>
    %c0_67 = arith.constant 0 : index
    %c0_68 = arith.constant 0 : index
    %c0_69 = arith.constant 0 : index
    %139 = vector.load %arg16[%c0_67, %c0_68, %c0_69] : memref<2x1x64xf32, #tpu.memory_space<vmem>>, vector<1x1x64xf32>
    %140 = vector.shape_cast %139 : vector<1x1x64xf32> to vector<1x64xf32>
    %141 = vector.broadcast %140 : vector<1x64xf32> to vector<17x64xf32>
    %142 = arith.addf %138, %141 : vector<17x64xf32>
    %143 = arith.addf %90, %142 : vector<17x64xf32>
    %c0_70 = arith.constant 0 : index
    %c0_71 = arith.constant 0 : index
    %c0_72 = arith.constant 0 : index
    %144 = vector.load %arg17[%c0_70, %c0_71, %c0_72] : memref<2x1x64xf32, #tpu.memory_space<vmem>>, vector<1x1x64xf32>
    %145 = vector.shape_cast %144 : vector<1x1x64xf32> to vector<1x64xf32>
    %c0_73 = arith.constant 0 : index
    %c0_74 = arith.constant 0 : index
    %c0_75 = arith.constant 0 : index
    %146 = vector.load %arg18[%c0_73, %c0_74, %c0_75] : memref<2x1x64xf32, #tpu.memory_space<vmem>>, vector<1x1x64xf32>
    %147 = vector.shape_cast %146 : vector<1x1x64xf32> to vector<1x64xf32>
    %cst_76 = arith.constant dense<0.000000e+00> : vector<17xf32>
    %148 = vector.multi_reduction <add>, %143, %cst_76 [1] : vector<17x64xf32> to vector<17xf32>
    %149 = vector.shape_cast %148 : vector<17xf32> to vector<17x1xf32>
    %cst_77 = arith.constant 6.400000e+01 : f32
    %150 = vector.broadcast %cst_77 : f32 to vector<17x1xf32>
    %151 = arith.divf %149, %150 : vector<17x1xf32>
    %152 = vector.broadcast %151 : vector<17x1xf32> to vector<17x64xf32>
    %153 = arith.subf %143, %152 : vector<17x64xf32>
    %154 = vector.broadcast %151 : vector<17x1xf32> to vector<17x64xf32>
    %155 = arith.subf %143, %154 : vector<17x64xf32>
    %156 = arith.mulf %153, %155 : vector<17x64xf32>
    %cst_78 = arith.constant dense<0.000000e+00> : vector<17xf32>
    %157 = vector.multi_reduction <add>, %156, %cst_78 [1] : vector<17x64xf32> to vector<17xf32>
    %158 = vector.shape_cast %157 : vector<17xf32> to vector<17x1xf32>
    %cst_79 = arith.constant 6.400000e+01 : f32
    %159 = vector.broadcast %cst_79 : f32 to vector<17x1xf32>
    %160 = arith.divf %158, %159 : vector<17x1xf32>
    %161 = vector.broadcast %151 : vector<17x1xf32> to vector<17x64xf32>
    %162 = arith.subf %143, %161 : vector<17x64xf32>
    %cst_80 = arith.constant 9.99999974E-6 : f32
    %163 = vector.broadcast %cst_80 : f32 to vector<17x1xf32>
    %164 = arith.addf %160, %163 : vector<17x1xf32>
    %165 = math.rsqrt %164 : vector<17x1xf32>
    %166 = vector.broadcast %165 : vector<17x1xf32> to vector<17x64xf32>
    %167 = arith.mulf %162, %166 : vector<17x64xf32>
    %168 = vector.broadcast %145 : vector<1x64xf32> to vector<17x64xf32>
    %169 = arith.mulf %167, %168 : vector<17x64xf32>
    %170 = vector.broadcast %147 : vector<1x64xf32> to vector<17x64xf32>
    %171 = arith.addf %169, %170 : vector<17x64xf32>
    %c0_81 = arith.constant 0 : index
    %c0_82 = arith.constant 0 : index
    %c0_83 = arith.constant 0 : index
    %172 = vector.load %arg19[%c0_81, %c0_82, %c0_83] : memref<2x64x256xf32, #tpu.memory_space<vmem>>, vector<1x64x256xf32>
    %173 = vector.shape_cast %172 : vector<1x64x256xf32> to vector<64x256xf32>
    %cst_84 = arith.constant dense<0.000000e+00> : vector<17x256xf32>
    %174 = tpu.matmul %171, %173, %cst_84 {dimension_numbers = #tpu.dot_dimension_numbers<[1], [0], [0], [1], [0, 0, 1, 1], [], []>} : vector<17x64xf32>, vector<64x256xf32>, vector<17x256xf32> -> vector<17x256xf32>
    %c0_85 = arith.constant 0 : index
    %c0_86 = arith.constant 0 : index
    %c0_87 = arith.constant 0 : index
    %175 = vector.load %arg20[%c0_85, %c0_86, %c0_87] : memref<2x1x256xf32, #tpu.memory_space<vmem>>, vector<1x1x256xf32>
    %176 = vector.shape_cast %175 : vector<1x1x256xf32> to vector<1x256xf32>
    %177 = vector.broadcast %176 : vector<1x256xf32> to vector<17x256xf32>
    %178 = arith.addf %174, %177 : vector<17x256xf32>
    %cst_88 = arith.constant 0.000000e+00 : f32
    %179 = vector.broadcast %cst_88 : f32 to vector<17x256xf32>
    %180 = arith.maximumf %178, %179 : vector<17x256xf32>
    %c0_89 = arith.constant 0 : index
    %c0_90 = arith.constant 0 : index
    %c0_91 = arith.constant 0 : index
    %181 = vector.load %arg21[%c0_89, %c0_90, %c0_91] : memref<2x256x64xf32, #tpu.memory_space<vmem>>, vector<1x256x64xf32>
    %182 = vector.shape_cast %181 : vector<1x256x64xf32> to vector<256x64xf32>
    %cst_92 = arith.constant dense<0.000000e+00> : vector<17x64xf32>
    %183 = tpu.matmul %180, %182, %cst_92 {dimension_numbers = #tpu.dot_dimension_numbers<[1], [0], [0], [1], [0, 0, 1, 1], [], []>} : vector<17x256xf32>, vector<256x64xf32>, vector<17x64xf32> -> vector<17x64xf32>
    %c0_93 = arith.constant 0 : index
    %c0_94 = arith.constant 0 : index
    %c0_95 = arith.constant 0 : index
    %184 = vector.load %arg22[%c0_93, %c0_94, %c0_95] : memref<2x1x64xf32, #tpu.memory_space<vmem>>, vector<1x1x64xf32>
    %185 = vector.shape_cast %184 : vector<1x1x64xf32> to vector<1x64xf32>
    %186 = vector.broadcast %185 : vector<1x64xf32> to vector<17x64xf32>
    %187 = arith.addf %183, %186 : vector<17x64xf32>
    %188 = arith.addf %171, %187 : vector<17x64xf32>
    %c0_96 = arith.constant 0 : index
    %c0_97 = arith.constant 0 : index
    %c0_98 = arith.constant 0 : index
    %189 = vector.load %arg23[%c0_96, %c0_97, %c0_98] : memref<2x1x64xf32, #tpu.memory_space<vmem>>, vector<1x1x64xf32>
    %190 = vector.shape_cast %189 : vector<1x1x64xf32> to vector<1x64xf32>
    %c0_99 = arith.constant 0 : index
    %c0_100 = arith.constant 0 : index
    %c0_101 = arith.constant 0 : index
    %191 = vector.load %arg24[%c0_99, %c0_100, %c0_101] : memref<2x1x64xf32, #tpu.memory_space<vmem>>, vector<1x1x64xf32>
    %192 = vector.shape_cast %191 : vector<1x1x64xf32> to vector<1x64xf32>
    %cst_102 = arith.constant dense<0.000000e+00> : vector<17xf32>
    %193 = vector.multi_reduction <add>, %188, %cst_102 [1] : vector<17x64xf32> to vector<17xf32>
    %194 = vector.shape_cast %193 : vector<17xf32> to vector<17x1xf32>
    %cst_103 = arith.constant 6.400000e+01 : f32
    %195 = vector.broadcast %cst_103 : f32 to vector<17x1xf32>
    %196 = arith.divf %194, %195 : vector<17x1xf32>
    %197 = vector.broadcast %196 : vector<17x1xf32> to vector<17x64xf32>
    %198 = arith.subf %188, %197 : vector<17x64xf32>
    %199 = vector.broadcast %196 : vector<17x1xf32> to vector<17x64xf32>
    %200 = arith.subf %188, %199 : vector<17x64xf32>
    %201 = arith.mulf %198, %200 : vector<17x64xf32>
    %cst_104 = arith.constant dense<0.000000e+00> : vector<17xf32>
    %202 = vector.multi_reduction <add>, %201, %cst_104 [1] : vector<17x64xf32> to vector<17xf32>
    %203 = vector.shape_cast %202 : vector<17xf32> to vector<17x1xf32>
    %cst_105 = arith.constant 6.400000e+01 : f32
    %204 = vector.broadcast %cst_105 : f32 to vector<17x1xf32>
    %205 = arith.divf %203, %204 : vector<17x1xf32>
    %206 = vector.broadcast %196 : vector<17x1xf32> to vector<17x64xf32>
    %207 = arith.subf %188, %206 : vector<17x64xf32>
    %cst_106 = arith.constant 9.99999974E-6 : f32
    %208 = vector.broadcast %cst_106 : f32 to vector<17x1xf32>
    %209 = arith.addf %205, %208 : vector<17x1xf32>
    %210 = math.rsqrt %209 : vector<17x1xf32>
    %211 = vector.broadcast %210 : vector<17x1xf32> to vector<17x64xf32>
    %212 = arith.mulf %207, %211 : vector<17x64xf32>
    %213 = vector.broadcast %190 : vector<1x64xf32> to vector<17x64xf32>
    %214 = arith.mulf %212, %213 : vector<17x64xf32>
    %215 = vector.broadcast %192 : vector<1x64xf32> to vector<17x64xf32>
    %216 = arith.addf %214, %215 : vector<17x64xf32>
    %c1 = arith.constant 1 : index
    %c0_107 = arith.constant 0 : index
    %c0_108 = arith.constant 0 : index
    %217 = vector.load %arg13[%c1, %c0_107, %c0_108] : memref<2x64x192xf32, #tpu.memory_space<vmem>>, vector<1x64x192xf32>
    %218 = vector.shape_cast %217 : vector<1x64x192xf32> to vector<64x192xf32>
    %cst_109 = arith.constant dense<0.000000e+00> : vector<17x192xf32>
    %219 = tpu.matmul %216, %218, %cst_109 {dimension_numbers = #tpu.dot_dimension_numbers<[1], [0], [0], [1], [0, 0, 1, 1], [], []>} : vector<17x64xf32>, vector<64x192xf32>, vector<17x192xf32> -> vector<17x192xf32>
    %c1_110 = arith.constant 1 : index
    %c0_111 = arith.constant 0 : index
    %c0_112 = arith.constant 0 : index
    %220 = vector.load %arg14[%c1_110, %c0_111, %c0_112] : memref<2x1x192xf32, #tpu.memory_space<vmem>>, vector<1x1x192xf32>
    %221 = vector.shape_cast %220 : vector<1x1x192xf32> to vector<1x192xf32>
    %222 = vector.broadcast %221 : vector<1x192xf32> to vector<17x192xf32>
    %223 = arith.addf %219, %222 : vector<17x192xf32>
    %c1_113 = arith.constant 1 : index
    %c0_114 = arith.constant 0 : index
    %c0_115 = arith.constant 0 : index
    %224 = vector.load %arg15[%c1_113, %c0_114, %c0_115] : memref<2x64x64xf32, #tpu.memory_space<vmem>>, vector<1x64x64xf32>
    %225 = vector.shape_cast %224 : vector<1x64x64xf32> to vector<64x64xf32>
    %cst_116 = arith.constant 0.000000e+00 : f32
    %226 = vector.broadcast %cst_116 : f32 to vector<17x64xf32>
    %227 = vector.extract_strided_slice %223 {offsets = [0, 0], sizes = [17, 32], strides = [1, 1]} : vector<17x192xf32> to vector<17x32xf32>
    %228 = vector.extract_strided_slice %223 {offsets = [0, 64], sizes = [17, 32], strides = [1, 1]} : vector<17x192xf32> to vector<17x32xf32>
    %229 = vector.extract_strided_slice %223 {offsets = [0, 128], sizes = [17, 32], strides = [1, 1]} : vector<17x192xf32> to vector<17x32xf32>
    %cst_117 = arith.constant dense<0.000000e+00> : vector<17x17xf32>
    %230 = tpu.matmul %227, %228, %cst_117 {dimension_numbers = #tpu.dot_dimension_numbers<[1], [1], [0], [0], [0, 0, 1, 0], [], []>} : vector<17x32xf32>, vector<17x32xf32>, vector<17x17xf32> -> vector<17x17xf32>
    %cst_118 = arith.constant 0.176776692 : f32
    %231 = vector.broadcast %cst_118 : f32 to vector<17x17xf32>
    %232 = arith.mulf %230, %231 : vector<17x17xf32>
    %cst_119 = arith.constant dense<0xFF800000> : vector<17xf32>
    %233 = vector.multi_reduction <maximumf>, %232, %cst_119 [1] : vector<17x17xf32> to vector<17xf32>
    %234 = vector.shape_cast %233 : vector<17xf32> to vector<17x1xf32>
    %235 = vector.broadcast %234 : vector<17x1xf32> to vector<17x17xf32>
    %236 = arith.subf %232, %235 : vector<17x17xf32>
    %237 = math.exp %236 : vector<17x17xf32>
    %cst_120 = arith.constant dense<0.000000e+00> : vector<17xf32>
    %238 = vector.multi_reduction <add>, %237, %cst_120 [1] : vector<17x17xf32> to vector<17xf32>
    %239 = vector.shape_cast %238 : vector<17xf32> to vector<17x1xf32>
    %240 = vector.broadcast %239 : vector<17x1xf32> to vector<17x17xf32>
    %241 = arith.divf %237, %240 : vector<17x17xf32>
    %cst_121 = arith.constant dense<0.000000e+00> : vector<17x32xf32>
    %242 = tpu.matmul %241, %229, %cst_121 {dimension_numbers = #tpu.dot_dimension_numbers<[1], [0], [0], [1], [0, 0, 1, 1], [], []>} : vector<17x17xf32>, vector<17x32xf32>, vector<17x32xf32> -> vector<17x32xf32>
    %243 = vector.extract_strided_slice %225 {offsets = [0, 0], sizes = [32, 64], strides = [1, 1]} : vector<64x64xf32> to vector<32x64xf32>
    %cst_122 = arith.constant dense<0.000000e+00> : vector<17x64xf32>
    %244 = tpu.matmul %242, %243, %cst_122 {dimension_numbers = #tpu.dot_dimension_numbers<[1], [0], [0], [1], [0, 0, 1, 1], [], []>} : vector<17x32xf32>, vector<32x64xf32>, vector<17x64xf32> -> vector<17x64xf32>
    %245 = arith.addf %226, %244 : vector<17x64xf32>
    %246 = vector.extract_strided_slice %223 {offsets = [0, 32], sizes = [17, 32], strides = [1, 1]} : vector<17x192xf32> to vector<17x32xf32>
    %247 = vector.extract_strided_slice %223 {offsets = [0, 96], sizes = [17, 32], strides = [1, 1]} : vector<17x192xf32> to vector<17x32xf32>
    %248 = vector.extract_strided_slice %223 {offsets = [0, 160], sizes = [17, 32], strides = [1, 1]} : vector<17x192xf32> to vector<17x32xf32>
    %cst_123 = arith.constant dense<0.000000e+00> : vector<17x17xf32>
    %249 = tpu.matmul %246, %247, %cst_123 {dimension_numbers = #tpu.dot_dimension_numbers<[1], [1], [0], [0], [0, 0, 1, 0], [], []>} : vector<17x32xf32>, vector<17x32xf32>, vector<17x17xf32> -> vector<17x17xf32>
    %cst_124 = arith.constant 0.176776692 : f32
    %250 = vector.broadcast %cst_124 : f32 to vector<17x17xf32>
    %251 = arith.mulf %249, %250 : vector<17x17xf32>
    %cst_125 = arith.constant dense<0xFF800000> : vector<17xf32>
    %252 = vector.multi_reduction <maximumf>, %251, %cst_125 [1] : vector<17x17xf32> to vector<17xf32>
    %253 = vector.shape_cast %252 : vector<17xf32> to vector<17x1xf32>
    %254 = vector.broadcast %253 : vector<17x1xf32> to vector<17x17xf32>
    %255 = arith.subf %251, %254 : vector<17x17xf32>
    %256 = math.exp %255 : vector<17x17xf32>
    %cst_126 = arith.constant dense<0.000000e+00> : vector<17xf32>
    %257 = vector.multi_reduction <add>, %256, %cst_126 [1] : vector<17x17xf32> to vector<17xf32>
    %258 = vector.shape_cast %257 : vector<17xf32> to vector<17x1xf32>
    %259 = vector.broadcast %258 : vector<17x1xf32> to vector<17x17xf32>
    %260 = arith.divf %256, %259 : vector<17x17xf32>
    %cst_127 = arith.constant dense<0.000000e+00> : vector<17x32xf32>
    %261 = tpu.matmul %260, %248, %cst_127 {dimension_numbers = #tpu.dot_dimension_numbers<[1], [0], [0], [1], [0, 0, 1, 1], [], []>} : vector<17x17xf32>, vector<17x32xf32>, vector<17x32xf32> -> vector<17x32xf32>
    %262 = vector.extract_strided_slice %225 {offsets = [32, 0], sizes = [32, 64], strides = [1, 1]} : vector<64x64xf32> to vector<32x64xf32>
    %cst_128 = arith.constant dense<0.000000e+00> : vector<17x64xf32>
    %263 = tpu.matmul %261, %262, %cst_128 {dimension_numbers = #tpu.dot_dimension_numbers<[1], [0], [0], [1], [0, 0, 1, 1], [], []>} : vector<17x32xf32>, vector<32x64xf32>, vector<17x64xf32> -> vector<17x64xf32>
    %264 = arith.addf %245, %263 : vector<17x64xf32>
    %c1_129 = arith.constant 1 : index
    %c0_130 = arith.constant 0 : index
    %c0_131 = arith.constant 0 : index
    %265 = vector.load %arg16[%c1_129, %c0_130, %c0_131] : memref<2x1x64xf32, #tpu.memory_space<vmem>>, vector<1x1x64xf32>
    %266 = vector.shape_cast %265 : vector<1x1x64xf32> to vector<1x64xf32>
    %267 = vector.broadcast %266 : vector<1x64xf32> to vector<17x64xf32>
    %268 = arith.addf %264, %267 : vector<17x64xf32>
    %269 = arith.addf %216, %268 : vector<17x64xf32>
    %c1_132 = arith.constant 1 : index
    %c0_133 = arith.constant 0 : index
    %c0_134 = arith.constant 0 : index
    %270 = vector.load %arg17[%c1_132, %c0_133, %c0_134] : memref<2x1x64xf32, #tpu.memory_space<vmem>>, vector<1x1x64xf32>
    %271 = vector.shape_cast %270 : vector<1x1x64xf32> to vector<1x64xf32>
    %c1_135 = arith.constant 1 : index
    %c0_136 = arith.constant 0 : index
    %c0_137 = arith.constant 0 : index
    %272 = vector.load %arg18[%c1_135, %c0_136, %c0_137] : memref<2x1x64xf32, #tpu.memory_space<vmem>>, vector<1x1x64xf32>
    %273 = vector.shape_cast %272 : vector<1x1x64xf32> to vector<1x64xf32>
    %cst_138 = arith.constant dense<0.000000e+00> : vector<17xf32>
    %274 = vector.multi_reduction <add>, %269, %cst_138 [1] : vector<17x64xf32> to vector<17xf32>
    %275 = vector.shape_cast %274 : vector<17xf32> to vector<17x1xf32>
    %cst_139 = arith.constant 6.400000e+01 : f32
    %276 = vector.broadcast %cst_139 : f32 to vector<17x1xf32>
    %277 = arith.divf %275, %276 : vector<17x1xf32>
    %278 = vector.broadcast %277 : vector<17x1xf32> to vector<17x64xf32>
    %279 = arith.subf %269, %278 : vector<17x64xf32>
    %280 = vector.broadcast %277 : vector<17x1xf32> to vector<17x64xf32>
    %281 = arith.subf %269, %280 : vector<17x64xf32>
    %282 = arith.mulf %279, %281 : vector<17x64xf32>
    %cst_140 = arith.constant dense<0.000000e+00> : vector<17xf32>
    %283 = vector.multi_reduction <add>, %282, %cst_140 [1] : vector<17x64xf32> to vector<17xf32>
    %284 = vector.shape_cast %283 : vector<17xf32> to vector<17x1xf32>
    %cst_141 = arith.constant 6.400000e+01 : f32
    %285 = vector.broadcast %cst_141 : f32 to vector<17x1xf32>
    %286 = arith.divf %284, %285 : vector<17x1xf32>
    %287 = vector.broadcast %277 : vector<17x1xf32> to vector<17x64xf32>
    %288 = arith.subf %269, %287 : vector<17x64xf32>
    %cst_142 = arith.constant 9.99999974E-6 : f32
    %289 = vector.broadcast %cst_142 : f32 to vector<17x1xf32>
    %290 = arith.addf %286, %289 : vector<17x1xf32>
    %291 = math.rsqrt %290 : vector<17x1xf32>
    %292 = vector.broadcast %291 : vector<17x1xf32> to vector<17x64xf32>
    %293 = arith.mulf %288, %292 : vector<17x64xf32>
    %294 = vector.broadcast %271 : vector<1x64xf32> to vector<17x64xf32>
    %295 = arith.mulf %293, %294 : vector<17x64xf32>
    %296 = vector.broadcast %273 : vector<1x64xf32> to vector<17x64xf32>
    %297 = arith.addf %295, %296 : vector<17x64xf32>
    %c1_143 = arith.constant 1 : index
    %c0_144 = arith.constant 0 : index
    %c0_145 = arith.constant 0 : index
    %298 = vector.load %arg19[%c1_143, %c0_144, %c0_145] : memref<2x64x256xf32, #tpu.memory_space<vmem>>, vector<1x64x256xf32>
    %299 = vector.shape_cast %298 : vector<1x64x256xf32> to vector<64x256xf32>
    %cst_146 = arith.constant dense<0.000000e+00> : vector<17x256xf32>
    %300 = tpu.matmul %297, %299, %cst_146 {dimension_numbers = #tpu.dot_dimension_numbers<[1], [0], [0], [1], [0, 0, 1, 1], [], []>} : vector<17x64xf32>, vector<64x256xf32>, vector<17x256xf32> -> vector<17x256xf32>
    %c1_147 = arith.constant 1 : index
    %c0_148 = arith.constant 0 : index
    %c0_149 = arith.constant 0 : index
    %301 = vector.load %arg20[%c1_147, %c0_148, %c0_149] : memref<2x1x256xf32, #tpu.memory_space<vmem>>, vector<1x1x256xf32>
    %302 = vector.shape_cast %301 : vector<1x1x256xf32> to vector<1x256xf32>
    %303 = vector.broadcast %302 : vector<1x256xf32> to vector<17x256xf32>
    %304 = arith.addf %300, %303 : vector<17x256xf32>
    %cst_150 = arith.constant 0.000000e+00 : f32
    %305 = vector.broadcast %cst_150 : f32 to vector<17x256xf32>
    %306 = arith.maximumf %304, %305 : vector<17x256xf32>
    %c1_151 = arith.constant 1 : index
    %c0_152 = arith.constant 0 : index
    %c0_153 = arith.constant 0 : index
    %307 = vector.load %arg21[%c1_151, %c0_152, %c0_153] : memref<2x256x64xf32, #tpu.memory_space<vmem>>, vector<1x256x64xf32>
    %308 = vector.shape_cast %307 : vector<1x256x64xf32> to vector<256x64xf32>
    %cst_154 = arith.constant dense<0.000000e+00> : vector<17x64xf32>
    %309 = tpu.matmul %306, %308, %cst_154 {dimension_numbers = #tpu.dot_dimension_numbers<[1], [0], [0], [1], [0, 0, 1, 1], [], []>} : vector<17x256xf32>, vector<256x64xf32>, vector<17x64xf32> -> vector<17x64xf32>
    %c1_155 = arith.constant 1 : index
    %c0_156 = arith.constant 0 : index
    %c0_157 = arith.constant 0 : index
    %310 = vector.load %arg22[%c1_155, %c0_156, %c0_157] : memref<2x1x64xf32, #tpu.memory_space<vmem>>, vector<1x1x64xf32>
    %311 = vector.shape_cast %310 : vector<1x1x64xf32> to vector<1x64xf32>
    %312 = vector.broadcast %311 : vector<1x64xf32> to vector<17x64xf32>
    %313 = arith.addf %309, %312 : vector<17x64xf32>
    %314 = arith.addf %297, %313 : vector<17x64xf32>
    %c1_158 = arith.constant 1 : index
    %c0_159 = arith.constant 0 : index
    %c0_160 = arith.constant 0 : index
    %315 = vector.load %arg23[%c1_158, %c0_159, %c0_160] : memref<2x1x64xf32, #tpu.memory_space<vmem>>, vector<1x1x64xf32>
    %316 = vector.shape_cast %315 : vector<1x1x64xf32> to vector<1x64xf32>
    %c1_161 = arith.constant 1 : index
    %c0_162 = arith.constant 0 : index
    %c0_163 = arith.constant 0 : index
    %317 = vector.load %arg24[%c1_161, %c0_162, %c0_163] : memref<2x1x64xf32, #tpu.memory_space<vmem>>, vector<1x1x64xf32>
    %318 = vector.shape_cast %317 : vector<1x1x64xf32> to vector<1x64xf32>
    %cst_164 = arith.constant dense<0.000000e+00> : vector<17xf32>
    %319 = vector.multi_reduction <add>, %314, %cst_164 [1] : vector<17x64xf32> to vector<17xf32>
    %320 = vector.shape_cast %319 : vector<17xf32> to vector<17x1xf32>
    %cst_165 = arith.constant 6.400000e+01 : f32
    %321 = vector.broadcast %cst_165 : f32 to vector<17x1xf32>
    %322 = arith.divf %320, %321 : vector<17x1xf32>
    %323 = vector.broadcast %322 : vector<17x1xf32> to vector<17x64xf32>
    %324 = arith.subf %314, %323 : vector<17x64xf32>
    %325 = vector.broadcast %322 : vector<17x1xf32> to vector<17x64xf32>
    %326 = arith.subf %314, %325 : vector<17x64xf32>
    %327 = arith.mulf %324, %326 : vector<17x64xf32>
    %cst_166 = arith.constant dense<0.000000e+00> : vector<17xf32>
    %328 = vector.multi_reduction <add>, %327, %cst_166 [1] : vector<17x64xf32> to vector<17xf32>
    %329 = vector.shape_cast %328 : vector<17xf32> to vector<17x1xf32>
    %cst_167 = arith.constant 6.400000e+01 : f32
    %330 = vector.broadcast %cst_167 : f32 to vector<17x1xf32>
    %331 = arith.divf %329, %330 : vector<17x1xf32>
    %332 = vector.broadcast %322 : vector<17x1xf32> to vector<17x64xf32>
    %333 = arith.subf %314, %332 : vector<17x64xf32>
    %cst_168 = arith.constant 9.99999974E-6 : f32
    %334 = vector.broadcast %cst_168 : f32 to vector<17x1xf32>
    %335 = arith.addf %331, %334 : vector<17x1xf32>
    %336 = math.rsqrt %335 : vector<17x1xf32>
    %337 = vector.broadcast %336 : vector<17x1xf32> to vector<17x64xf32>
    %338 = arith.mulf %333, %337 : vector<17x64xf32>
    %339 = vector.broadcast %316 : vector<1x64xf32> to vector<17x64xf32>
    %340 = arith.mulf %338, %339 : vector<17x64xf32>
    %341 = vector.broadcast %318 : vector<1x64xf32> to vector<17x64xf32>
    %342 = arith.addf %340, %341 : vector<17x64xf32>
    %343 = vector.extract_strided_slice %342 {offsets = [0, 0], sizes = [1, 64], strides = [1, 1]} : vector<17x64xf32> to vector<1x64xf32>
    %344 = vector.extract_strided_slice %87 {offsets = [16, 0], sizes = [16, 64], strides = [1, 1]} : vector<32x64xf32> to vector<16x64xf32>
    %345 = tpu.concatenate %88, %344 in 0 : vector<1x64xf32>, vector<16x64xf32> -> vector<17x64xf32>
    %c0_169 = arith.constant 0 : index
    %c0_170 = arith.constant 0 : index
    %c0_171 = arith.constant 0 : index
    %346 = vector.load %arg13[%c0_169, %c0_170, %c0_171] : memref<2x64x192xf32, #tpu.memory_space<vmem>>, vector<1x64x192xf32>
    %347 = vector.shape_cast %346 : vector<1x64x192xf32> to vector<64x192xf32>
    %cst_172 = arith.constant dense<0.000000e+00> : vector<17x192xf32>
    %348 = tpu.matmul %345, %347, %cst_172 {dimension_numbers = #tpu.dot_dimension_numbers<[1], [0], [0], [1], [0, 0, 1, 1], [], []>} : vector<17x64xf32>, vector<64x192xf32>, vector<17x192xf32> -> vector<17x192xf32>
    %c0_173 = arith.constant 0 : index
    %c0_174 = arith.constant 0 : index
    %c0_175 = arith.constant 0 : index
    %349 = vector.load %arg14[%c0_173, %c0_174, %c0_175] : memref<2x1x192xf32, #tpu.memory_space<vmem>>, vector<1x1x192xf32>
    %350 = vector.shape_cast %349 : vector<1x1x192xf32> to vector<1x192xf32>
    %351 = vector.broadcast %350 : vector<1x192xf32> to vector<17x192xf32>
    %352 = arith.addf %348, %351 : vector<17x192xf32>
    %c0_176 = arith.constant 0 : index
    %c0_177 = arith.constant 0 : index
    %c0_178 = arith.constant 0 : index
    %353 = vector.load %arg15[%c0_176, %c0_177, %c0_178] : memref<2x64x64xf32, #tpu.memory_space<vmem>>, vector<1x64x64xf32>
    %354 = vector.shape_cast %353 : vector<1x64x64xf32> to vector<64x64xf32>
    %cst_179 = arith.constant 0.000000e+00 : f32
    %355 = vector.broadcast %cst_179 : f32 to vector<17x64xf32>
    %356 = vector.extract_strided_slice %352 {offsets = [0, 0], sizes = [17, 32], strides = [1, 1]} : vector<17x192xf32> to vector<17x32xf32>
    %357 = vector.extract_strided_slice %352 {offsets = [0, 64], sizes = [17, 32], strides = [1, 1]} : vector<17x192xf32> to vector<17x32xf32>
    %358 = vector.extract_strided_slice %352 {offsets = [0, 128], sizes = [17, 32], strides = [1, 1]} : vector<17x192xf32> to vector<17x32xf32>
    %cst_180 = arith.constant dense<0.000000e+00> : vector<17x17xf32>
    %359 = tpu.matmul %356, %357, %cst_180 {dimension_numbers = #tpu.dot_dimension_numbers<[1], [1], [0], [0], [0, 0, 1, 0], [], []>} : vector<17x32xf32>, vector<17x32xf32>, vector<17x17xf32> -> vector<17x17xf32>
    %cst_181 = arith.constant 0.176776692 : f32
    %360 = vector.broadcast %cst_181 : f32 to vector<17x17xf32>
    %361 = arith.mulf %359, %360 : vector<17x17xf32>
    %cst_182 = arith.constant dense<0xFF800000> : vector<17xf32>
    %362 = vector.multi_reduction <maximumf>, %361, %cst_182 [1] : vector<17x17xf32> to vector<17xf32>
    %363 = vector.shape_cast %362 : vector<17xf32> to vector<17x1xf32>
    %364 = vector.broadcast %363 : vector<17x1xf32> to vector<17x17xf32>
    %365 = arith.subf %361, %364 : vector<17x17xf32>
    %366 = math.exp %365 : vector<17x17xf32>
    %cst_183 = arith.constant dense<0.000000e+00> : vector<17xf32>
    %367 = vector.multi_reduction <add>, %366, %cst_183 [1] : vector<17x17xf32> to vector<17xf32>
    %368 = vector.shape_cast %367 : vector<17xf32> to vector<17x1xf32>
    %369 = vector.broadcast %368 : vector<17x1xf32> to vector<17x17xf32>
    %370 = arith.divf %366, %369 : vector<17x17xf32>
    %cst_184 = arith.constant dense<0.000000e+00> : vector<17x32xf32>
    %371 = tpu.matmul %370, %358, %cst_184 {dimension_numbers = #tpu.dot_dimension_numbers<[1], [0], [0], [1], [0, 0, 1, 1], [], []>} : vector<17x17xf32>, vector<17x32xf32>, vector<17x32xf32> -> vector<17x32xf32>
    %372 = vector.extract_strided_slice %354 {offsets = [0, 0], sizes = [32, 64], strides = [1, 1]} : vector<64x64xf32> to vector<32x64xf32>
    %cst_185 = arith.constant dense<0.000000e+00> : vector<17x64xf32>
    %373 = tpu.matmul %371, %372, %cst_185 {dimension_numbers = #tpu.dot_dimension_numbers<[1], [0], [0], [1], [0, 0, 1, 1], [], []>} : vector<17x32xf32>, vector<32x64xf32>, vector<17x64xf32> -> vector<17x64xf32>
    %374 = arith.addf %355, %373 : vector<17x64xf32>
    %375 = vector.extract_strided_slice %352 {offsets = [0, 32], sizes = [17, 32], strides = [1, 1]} : vector<17x192xf32> to vector<17x32xf32>
    %376 = vector.extract_strided_slice %352 {offsets = [0, 96], sizes = [17, 32], strides = [1, 1]} : vector<17x192xf32> to vector<17x32xf32>
    %377 = vector.extract_strided_slice %352 {offsets = [0, 160], sizes = [17, 32], strides = [1, 1]} : vector<17x192xf32> to vector<17x32xf32>
    %cst_186 = arith.constant dense<0.000000e+00> : vector<17x17xf32>
    %378 = tpu.matmul %375, %376, %cst_186 {dimension_numbers = #tpu.dot_dimension_numbers<[1], [1], [0], [0], [0, 0, 1, 0], [], []>} : vector<17x32xf32>, vector<17x32xf32>, vector<17x17xf32> -> vector<17x17xf32>
    %cst_187 = arith.constant 0.176776692 : f32
    %379 = vector.broadcast %cst_187 : f32 to vector<17x17xf32>
    %380 = arith.mulf %378, %379 : vector<17x17xf32>
    %cst_188 = arith.constant dense<0xFF800000> : vector<17xf32>
    %381 = vector.multi_reduction <maximumf>, %380, %cst_188 [1] : vector<17x17xf32> to vector<17xf32>
    %382 = vector.shape_cast %381 : vector<17xf32> to vector<17x1xf32>
    %383 = vector.broadcast %382 : vector<17x1xf32> to vector<17x17xf32>
    %384 = arith.subf %380, %383 : vector<17x17xf32>
    %385 = math.exp %384 : vector<17x17xf32>
    %cst_189 = arith.constant dense<0.000000e+00> : vector<17xf32>
    %386 = vector.multi_reduction <add>, %385, %cst_189 [1] : vector<17x17xf32> to vector<17xf32>
    %387 = vector.shape_cast %386 : vector<17xf32> to vector<17x1xf32>
    %388 = vector.broadcast %387 : vector<17x1xf32> to vector<17x17xf32>
    %389 = arith.divf %385, %388 : vector<17x17xf32>
    %cst_190 = arith.constant dense<0.000000e+00> : vector<17x32xf32>
    %390 = tpu.matmul %389, %377, %cst_190 {dimension_numbers = #tpu.dot_dimension_numbers<[1], [0], [0], [1], [0, 0, 1, 1], [], []>} : vector<17x17xf32>, vector<17x32xf32>, vector<17x32xf32> -> vector<17x32xf32>
    %391 = vector.extract_strided_slice %354 {offsets = [32, 0], sizes = [32, 64], strides = [1, 1]} : vector<64x64xf32> to vector<32x64xf32>
    %cst_191 = arith.constant dense<0.000000e+00> : vector<17x64xf32>
    %392 = tpu.matmul %390, %391, %cst_191 {dimension_numbers = #tpu.dot_dimension_numbers<[1], [0], [0], [1], [0, 0, 1, 1], [], []>} : vector<17x32xf32>, vector<32x64xf32>, vector<17x64xf32> -> vector<17x64xf32>
    %393 = arith.addf %374, %392 : vector<17x64xf32>
    %c0_192 = arith.constant 0 : index
    %c0_193 = arith.constant 0 : index
    %c0_194 = arith.constant 0 : index
    %394 = vector.load %arg16[%c0_192, %c0_193, %c0_194] : memref<2x1x64xf32, #tpu.memory_space<vmem>>, vector<1x1x64xf32>
    %395 = vector.shape_cast %394 : vector<1x1x64xf32> to vector<1x64xf32>
    %396 = vector.broadcast %395 : vector<1x64xf32> to vector<17x64xf32>
    %397 = arith.addf %393, %396 : vector<17x64xf32>
    %398 = arith.addf %345, %397 : vector<17x64xf32>
    %c0_195 = arith.constant 0 : index
    %c0_196 = arith.constant 0 : index
    %c0_197 = arith.constant 0 : index
    %399 = vector.load %arg17[%c0_195, %c0_196, %c0_197] : memref<2x1x64xf32, #tpu.memory_space<vmem>>, vector<1x1x64xf32>
    %400 = vector.shape_cast %399 : vector<1x1x64xf32> to vector<1x64xf32>
    %c0_198 = arith.constant 0 : index
    %c0_199 = arith.constant 0 : index
    %c0_200 = arith.constant 0 : index
    %401 = vector.load %arg18[%c0_198, %c0_199, %c0_200] : memref<2x1x64xf32, #tpu.memory_space<vmem>>, vector<1x1x64xf32>
    %402 = vector.shape_cast %401 : vector<1x1x64xf32> to vector<1x64xf32>
    %cst_201 = arith.constant dense<0.000000e+00> : vector<17xf32>
    %403 = vector.multi_reduction <add>, %398, %cst_201 [1] : vector<17x64xf32> to vector<17xf32>
    %404 = vector.shape_cast %403 : vector<17xf32> to vector<17x1xf32>
    %cst_202 = arith.constant 6.400000e+01 : f32
    %405 = vector.broadcast %cst_202 : f32 to vector<17x1xf32>
    %406 = arith.divf %404, %405 : vector<17x1xf32>
    %407 = vector.broadcast %406 : vector<17x1xf32> to vector<17x64xf32>
    %408 = arith.subf %398, %407 : vector<17x64xf32>
    %409 = vector.broadcast %406 : vector<17x1xf32> to vector<17x64xf32>
    %410 = arith.subf %398, %409 : vector<17x64xf32>
    %411 = arith.mulf %408, %410 : vector<17x64xf32>
    %cst_203 = arith.constant dense<0.000000e+00> : vector<17xf32>
    %412 = vector.multi_reduction <add>, %411, %cst_203 [1] : vector<17x64xf32> to vector<17xf32>
    %413 = vector.shape_cast %412 : vector<17xf32> to vector<17x1xf32>
    %cst_204 = arith.constant 6.400000e+01 : f32
    %414 = vector.broadcast %cst_204 : f32 to vector<17x1xf32>
    %415 = arith.divf %413, %414 : vector<17x1xf32>
    %416 = vector.broadcast %406 : vector<17x1xf32> to vector<17x64xf32>
    %417 = arith.subf %398, %416 : vector<17x64xf32>
    %cst_205 = arith.constant 9.99999974E-6 : f32
    %418 = vector.broadcast %cst_205 : f32 to vector<17x1xf32>
    %419 = arith.addf %415, %418 : vector<17x1xf32>
    %420 = math.rsqrt %419 : vector<17x1xf32>
    %421 = vector.broadcast %420 : vector<17x1xf32> to vector<17x64xf32>
    %422 = arith.mulf %417, %421 : vector<17x64xf32>
    %423 = vector.broadcast %400 : vector<1x64xf32> to vector<17x64xf32>
    %424 = arith.mulf %422, %423 : vector<17x64xf32>
    %425 = vector.broadcast %402 : vector<1x64xf32> to vector<17x64xf32>
    %426 = arith.addf %424, %425 : vector<17x64xf32>
    %c0_206 = arith.constant 0 : index
    %c0_207 = arith.constant 0 : index
    %c0_208 = arith.constant 0 : index
    %427 = vector.load %arg19[%c0_206, %c0_207, %c0_208] : memref<2x64x256xf32, #tpu.memory_space<vmem>>, vector<1x64x256xf32>
    %428 = vector.shape_cast %427 : vector<1x64x256xf32> to vector<64x256xf32>
    %cst_209 = arith.constant dense<0.000000e+00> : vector<17x256xf32>
    %429 = tpu.matmul %426, %428, %cst_209 {dimension_numbers = #tpu.dot_dimension_numbers<[1], [0], [0], [1], [0, 0, 1, 1], [], []>} : vector<17x64xf32>, vector<64x256xf32>, vector<17x256xf32> -> vector<17x256xf32>
    %c0_210 = arith.constant 0 : index
    %c0_211 = arith.constant 0 : index
    %c0_212 = arith.constant 0 : index
    %430 = vector.load %arg20[%c0_210, %c0_211, %c0_212] : memref<2x1x256xf32, #tpu.memory_space<vmem>>, vector<1x1x256xf32>
    %431 = vector.shape_cast %430 : vector<1x1x256xf32> to vector<1x256xf32>
    %432 = vector.broadcast %431 : vector<1x256xf32> to vector<17x256xf32>
    %433 = arith.addf %429, %432 : vector<17x256xf32>
    %cst_213 = arith.constant 0.000000e+00 : f32
    %434 = vector.broadcast %cst_213 : f32 to vector<17x256xf32>
    %435 = arith.maximumf %433, %434 : vector<17x256xf32>
    %c0_214 = arith.constant 0 : index
    %c0_215 = arith.constant 0 : index
    %c0_216 = arith.constant 0 : index
    %436 = vector.load %arg21[%c0_214, %c0_215, %c0_216] : memref<2x256x64xf32, #tpu.memory_space<vmem>>, vector<1x256x64xf32>
    %437 = vector.shape_cast %436 : vector<1x256x64xf32> to vector<256x64xf32>
    %cst_217 = arith.constant dense<0.000000e+00> : vector<17x64xf32>
    %438 = tpu.matmul %435, %437, %cst_217 {dimension_numbers = #tpu.dot_dimension_numbers<[1], [0], [0], [1], [0, 0, 1, 1], [], []>} : vector<17x256xf32>, vector<256x64xf32>, vector<17x64xf32> -> vector<17x64xf32>
    %c0_218 = arith.constant 0 : index
    %c0_219 = arith.constant 0 : index
    %c0_220 = arith.constant 0 : index
    %439 = vector.load %arg22[%c0_218, %c0_219, %c0_220] : memref<2x1x64xf32, #tpu.memory_space<vmem>>, vector<1x1x64xf32>
    %440 = vector.shape_cast %439 : vector<1x1x64xf32> to vector<1x64xf32>
    %441 = vector.broadcast %440 : vector<1x64xf32> to vector<17x64xf32>
    %442 = arith.addf %438, %441 : vector<17x64xf32>
    %443 = arith.addf %426, %442 : vector<17x64xf32>
    %c0_221 = arith.constant 0 : index
    %c0_222 = arith.constant 0 : index
    %c0_223 = arith.constant 0 : index
    %444 = vector.load %arg23[%c0_221, %c0_222, %c0_223] : memref<2x1x64xf32, #tpu.memory_space<vmem>>, vector<1x1x64xf32>
    %445 = vector.shape_cast %444 : vector<1x1x64xf32> to vector<1x64xf32>
    %c0_224 = arith.constant 0 : index
    %c0_225 = arith.constant 0 : index
    %c0_226 = arith.constant 0 : index
    %446 = vector.load %arg24[%c0_224, %c0_225, %c0_226] : memref<2x1x64xf32, #tpu.memory_space<vmem>>, vector<1x1x64xf32>
    %447 = vector.shape_cast %446 : vector<1x1x64xf32> to vector<1x64xf32>
    %cst_227 = arith.constant dense<0.000000e+00> : vector<17xf32>
    %448 = vector.multi_reduction <add>, %443, %cst_227 [1] : vector<17x64xf32> to vector<17xf32>
    %449 = vector.shape_cast %448 : vector<17xf32> to vector<17x1xf32>
    %cst_228 = arith.constant 6.400000e+01 : f32
    %450 = vector.broadcast %cst_228 : f32 to vector<17x1xf32>
    %451 = arith.divf %449, %450 : vector<17x1xf32>
    %452 = vector.broadcast %451 : vector<17x1xf32> to vector<17x64xf32>
    %453 = arith.subf %443, %452 : vector<17x64xf32>
    %454 = vector.broadcast %451 : vector<17x1xf32> to vector<17x64xf32>
    %455 = arith.subf %443, %454 : vector<17x64xf32>
    %456 = arith.mulf %453, %455 : vector<17x64xf32>
    %cst_229 = arith.constant dense<0.000000e+00> : vector<17xf32>
    %457 = vector.multi_reduction <add>, %456, %cst_229 [1] : vector<17x64xf32> to vector<17xf32>
    %458 = vector.shape_cast %457 : vector<17xf32> to vector<17x1xf32>
    %cst_230 = arith.constant 6.400000e+01 : f32
    %459 = vector.broadcast %cst_230 : f32 to vector<17x1xf32>
    %460 = arith.divf %458, %459 : vector<17x1xf32>
    %461 = vector.broadcast %451 : vector<17x1xf32> to vector<17x64xf32>
    %462 = arith.subf %443, %461 : vector<17x64xf32>
    %cst_231 = arith.constant 9.99999974E-6 : f32
    %463 = vector.broadcast %cst_231 : f32 to vector<17x1xf32>
    %464 = arith.addf %460, %463 : vector<17x1xf32>
    %465 = math.rsqrt %464 : vector<17x1xf32>
    %466 = vector.broadcast %465 : vector<17x1xf32> to vector<17x64xf32>
    %467 = arith.mulf %462, %466 : vector<17x64xf32>
    %468 = vector.broadcast %445 : vector<1x64xf32> to vector<17x64xf32>
    %469 = arith.mulf %467, %468 : vector<17x64xf32>
    %470 = vector.broadcast %447 : vector<1x64xf32> to vector<17x64xf32>
    %471 = arith.addf %469, %470 : vector<17x64xf32>
    %c1_232 = arith.constant 1 : index
    %c0_233 = arith.constant 0 : index
    %c0_234 = arith.constant 0 : index
    %472 = vector.load %arg13[%c1_232, %c0_233, %c0_234] : memref<2x64x192xf32, #tpu.memory_space<vmem>>, vector<1x64x192xf32>
    %473 = vector.shape_cast %472 : vector<1x64x192xf32> to vector<64x192xf32>
    %cst_235 = arith.constant dense<0.000000e+00> : vector<17x192xf32>
    %474 = tpu.matmul %471, %473, %cst_235 {dimension_numbers = #tpu.dot_dimension_numbers<[1], [0], [0], [1], [0, 0, 1, 1], [], []>} : vector<17x64xf32>, vector<64x192xf32>, vector<17x192xf32> -> vector<17x192xf32>
    %c1_236 = arith.constant 1 : index
    %c0_237 = arith.constant 0 : index
    %c0_238 = arith.constant 0 : index
    %475 = vector.load %arg14[%c1_236, %c0_237, %c0_238] : memref<2x1x192xf32, #tpu.memory_space<vmem>>, vector<1x1x192xf32>
    %476 = vector.shape_cast %475 : vector<1x1x192xf32> to vector<1x192xf32>
    %477 = vector.broadcast %476 : vector<1x192xf32> to vector<17x192xf32>
    %478 = arith.addf %474, %477 : vector<17x192xf32>
    %c1_239 = arith.constant 1 : index
    %c0_240 = arith.constant 0 : index
    %c0_241 = arith.constant 0 : index
    %479 = vector.load %arg15[%c1_239, %c0_240, %c0_241] : memref<2x64x64xf32, #tpu.memory_space<vmem>>, vector<1x64x64xf32>
    %480 = vector.shape_cast %479 : vector<1x64x64xf32> to vector<64x64xf32>
    %cst_242 = arith.constant 0.000000e+00 : f32
    %481 = vector.broadcast %cst_242 : f32 to vector<17x64xf32>
    %482 = vector.extract_strided_slice %478 {offsets = [0, 0], sizes = [17, 32], strides = [1, 1]} : vector<17x192xf32> to vector<17x32xf32>
    %483 = vector.extract_strided_slice %478 {offsets = [0, 64], sizes = [17, 32], strides = [1, 1]} : vector<17x192xf32> to vector<17x32xf32>
    %484 = vector.extract_strided_slice %478 {offsets = [0, 128], sizes = [17, 32], strides = [1, 1]} : vector<17x192xf32> to vector<17x32xf32>
    %cst_243 = arith.constant dense<0.000000e+00> : vector<17x17xf32>
    %485 = tpu.matmul %482, %483, %cst_243 {dimension_numbers = #tpu.dot_dimension_numbers<[1], [1], [0], [0], [0, 0, 1, 0], [], []>} : vector<17x32xf32>, vector<17x32xf32>, vector<17x17xf32> -> vector<17x17xf32>
    %cst_244 = arith.constant 0.176776692 : f32
    %486 = vector.broadcast %cst_244 : f32 to vector<17x17xf32>
    %487 = arith.mulf %485, %486 : vector<17x17xf32>
    %cst_245 = arith.constant dense<0xFF800000> : vector<17xf32>
    %488 = vector.multi_reduction <maximumf>, %487, %cst_245 [1] : vector<17x17xf32> to vector<17xf32>
    %489 = vector.shape_cast %488 : vector<17xf32> to vector<17x1xf32>
    %490 = vector.broadcast %489 : vector<17x1xf32> to vector<17x17xf32>
    %491 = arith.subf %487, %490 : vector<17x17xf32>
    %492 = math.exp %491 : vector<17x17xf32>
    %cst_246 = arith.constant dense<0.000000e+00> : vector<17xf32>
    %493 = vector.multi_reduction <add>, %492, %cst_246 [1] : vector<17x17xf32> to vector<17xf32>
    %494 = vector.shape_cast %493 : vector<17xf32> to vector<17x1xf32>
    %495 = vector.broadcast %494 : vector<17x1xf32> to vector<17x17xf32>
    %496 = arith.divf %492, %495 : vector<17x17xf32>
    %cst_247 = arith.constant dense<0.000000e+00> : vector<17x32xf32>
    %497 = tpu.matmul %496, %484, %cst_247 {dimension_numbers = #tpu.dot_dimension_numbers<[1], [0], [0], [1], [0, 0, 1, 1], [], []>} : vector<17x17xf32>, vector<17x32xf32>, vector<17x32xf32> -> vector<17x32xf32>
    %498 = vector.extract_strided_slice %480 {offsets = [0, 0], sizes = [32, 64], strides = [1, 1]} : vector<64x64xf32> to vector<32x64xf32>
    %cst_248 = arith.constant dense<0.000000e+00> : vector<17x64xf32>
    %499 = tpu.matmul %497, %498, %cst_248 {dimension_numbers = #tpu.dot_dimension_numbers<[1], [0], [0], [1], [0, 0, 1, 1], [], []>} : vector<17x32xf32>, vector<32x64xf32>, vector<17x64xf32> -> vector<17x64xf32>
    %500 = arith.addf %481, %499 : vector<17x64xf32>
    %501 = vector.extract_strided_slice %478 {offsets = [0, 32], sizes = [17, 32], strides = [1, 1]} : vector<17x192xf32> to vector<17x32xf32>
    %502 = vector.extract_strided_slice %478 {offsets = [0, 96], sizes = [17, 32], strides = [1, 1]} : vector<17x192xf32> to vector<17x32xf32>
    %503 = vector.extract_strided_slice %478 {offsets = [0, 160], sizes = [17, 32], strides = [1, 1]} : vector<17x192xf32> to vector<17x32xf32>
    %cst_249 = arith.constant dense<0.000000e+00> : vector<17x17xf32>
    %504 = tpu.matmul %501, %502, %cst_249 {dimension_numbers = #tpu.dot_dimension_numbers<[1], [1], [0], [0], [0, 0, 1, 0], [], []>} : vector<17x32xf32>, vector<17x32xf32>, vector<17x17xf32> -> vector<17x17xf32>
    %cst_250 = arith.constant 0.176776692 : f32
    %505 = vector.broadcast %cst_250 : f32 to vector<17x17xf32>
    %506 = arith.mulf %504, %505 : vector<17x17xf32>
    %cst_251 = arith.constant dense<0xFF800000> : vector<17xf32>
    %507 = vector.multi_reduction <maximumf>, %506, %cst_251 [1] : vector<17x17xf32> to vector<17xf32>
    %508 = vector.shape_cast %507 : vector<17xf32> to vector<17x1xf32>
    %509 = vector.broadcast %508 : vector<17x1xf32> to vector<17x17xf32>
    %510 = arith.subf %506, %509 : vector<17x17xf32>
    %511 = math.exp %510 : vector<17x17xf32>
    %cst_252 = arith.constant dense<0.000000e+00> : vector<17xf32>
    %512 = vector.multi_reduction <add>, %511, %cst_252 [1] : vector<17x17xf32> to vector<17xf32>
    %513 = vector.shape_cast %512 : vector<17xf32> to vector<17x1xf32>
    %514 = vector.broadcast %513 : vector<17x1xf32> to vector<17x17xf32>
    %515 = arith.divf %511, %514 : vector<17x17xf32>
    %cst_253 = arith.constant dense<0.000000e+00> : vector<17x32xf32>
    %516 = tpu.matmul %515, %503, %cst_253 {dimension_numbers = #tpu.dot_dimension_numbers<[1], [0], [0], [1], [0, 0, 1, 1], [], []>} : vector<17x17xf32>, vector<17x32xf32>, vector<17x32xf32> -> vector<17x32xf32>
    %517 = vector.extract_strided_slice %480 {offsets = [32, 0], sizes = [32, 64], strides = [1, 1]} : vector<64x64xf32> to vector<32x64xf32>
    %cst_254 = arith.constant dense<0.000000e+00> : vector<17x64xf32>
    %518 = tpu.matmul %516, %517, %cst_254 {dimension_numbers = #tpu.dot_dimension_numbers<[1], [0], [0], [1], [0, 0, 1, 1], [], []>} : vector<17x32xf32>, vector<32x64xf32>, vector<17x64xf32> -> vector<17x64xf32>
    %519 = arith.addf %500, %518 : vector<17x64xf32>
    %c1_255 = arith.constant 1 : index
    %c0_256 = arith.constant 0 : index
    %c0_257 = arith.constant 0 : index
    %520 = vector.load %arg16[%c1_255, %c0_256, %c0_257] : memref<2x1x64xf32, #tpu.memory_space<vmem>>, vector<1x1x64xf32>
    %521 = vector.shape_cast %520 : vector<1x1x64xf32> to vector<1x64xf32>
    %522 = vector.broadcast %521 : vector<1x64xf32> to vector<17x64xf32>
    %523 = arith.addf %519, %522 : vector<17x64xf32>
    %524 = arith.addf %471, %523 : vector<17x64xf32>
    %c1_258 = arith.constant 1 : index
    %c0_259 = arith.constant 0 : index
    %c0_260 = arith.constant 0 : index
    %525 = vector.load %arg17[%c1_258, %c0_259, %c0_260] : memref<2x1x64xf32, #tpu.memory_space<vmem>>, vector<1x1x64xf32>
    %526 = vector.shape_cast %525 : vector<1x1x64xf32> to vector<1x64xf32>
    %c1_261 = arith.constant 1 : index
    %c0_262 = arith.constant 0 : index
    %c0_263 = arith.constant 0 : index
    %527 = vector.load %arg18[%c1_261, %c0_262, %c0_263] : memref<2x1x64xf32, #tpu.memory_space<vmem>>, vector<1x1x64xf32>
    %528 = vector.shape_cast %527 : vector<1x1x64xf32> to vector<1x64xf32>
    %cst_264 = arith.constant dense<0.000000e+00> : vector<17xf32>
    %529 = vector.multi_reduction <add>, %524, %cst_264 [1] : vector<17x64xf32> to vector<17xf32>
    %530 = vector.shape_cast %529 : vector<17xf32> to vector<17x1xf32>
    %cst_265 = arith.constant 6.400000e+01 : f32
    %531 = vector.broadcast %cst_265 : f32 to vector<17x1xf32>
    %532 = arith.divf %530, %531 : vector<17x1xf32>
    %533 = vector.broadcast %532 : vector<17x1xf32> to vector<17x64xf32>
    %534 = arith.subf %524, %533 : vector<17x64xf32>
    %535 = vector.broadcast %532 : vector<17x1xf32> to vector<17x64xf32>
    %536 = arith.subf %524, %535 : vector<17x64xf32>
    %537 = arith.mulf %534, %536 : vector<17x64xf32>
    %cst_266 = arith.constant dense<0.000000e+00> : vector<17xf32>
    %538 = vector.multi_reduction <add>, %537, %cst_266 [1] : vector<17x64xf32> to vector<17xf32>
    %539 = vector.shape_cast %538 : vector<17xf32> to vector<17x1xf32>
    %cst_267 = arith.constant 6.400000e+01 : f32
    %540 = vector.broadcast %cst_267 : f32 to vector<17x1xf32>
    %541 = arith.divf %539, %540 : vector<17x1xf32>
    %542 = vector.broadcast %532 : vector<17x1xf32> to vector<17x64xf32>
    %543 = arith.subf %524, %542 : vector<17x64xf32>
    %cst_268 = arith.constant 9.99999974E-6 : f32
    %544 = vector.broadcast %cst_268 : f32 to vector<17x1xf32>
    %545 = arith.addf %541, %544 : vector<17x1xf32>
    %546 = math.rsqrt %545 : vector<17x1xf32>
    %547 = vector.broadcast %546 : vector<17x1xf32> to vector<17x64xf32>
    %548 = arith.mulf %543, %547 : vector<17x64xf32>
    %549 = vector.broadcast %526 : vector<1x64xf32> to vector<17x64xf32>
    %550 = arith.mulf %548, %549 : vector<17x64xf32>
    %551 = vector.broadcast %528 : vector<1x64xf32> to vector<17x64xf32>
    %552 = arith.addf %550, %551 : vector<17x64xf32>
    %c1_269 = arith.constant 1 : index
    %c0_270 = arith.constant 0 : index
    %c0_271 = arith.constant 0 : index
    %553 = vector.load %arg19[%c1_269, %c0_270, %c0_271] : memref<2x64x256xf32, #tpu.memory_space<vmem>>, vector<1x64x256xf32>
    %554 = vector.shape_cast %553 : vector<1x64x256xf32> to vector<64x256xf32>
    %cst_272 = arith.constant dense<0.000000e+00> : vector<17x256xf32>
    %555 = tpu.matmul %552, %554, %cst_272 {dimension_numbers = #tpu.dot_dimension_numbers<[1], [0], [0], [1], [0, 0, 1, 1], [], []>} : vector<17x64xf32>, vector<64x256xf32>, vector<17x256xf32> -> vector<17x256xf32>
    %c1_273 = arith.constant 1 : index
    %c0_274 = arith.constant 0 : index
    %c0_275 = arith.constant 0 : index
    %556 = vector.load %arg20[%c1_273, %c0_274, %c0_275] : memref<2x1x256xf32, #tpu.memory_space<vmem>>, vector<1x1x256xf32>
    %557 = vector.shape_cast %556 : vector<1x1x256xf32> to vector<1x256xf32>
    %558 = vector.broadcast %557 : vector<1x256xf32> to vector<17x256xf32>
    %559 = arith.addf %555, %558 : vector<17x256xf32>
    %cst_276 = arith.constant 0.000000e+00 : f32
    %560 = vector.broadcast %cst_276 : f32 to vector<17x256xf32>
    %561 = arith.maximumf %559, %560 : vector<17x256xf32>
    %c1_277 = arith.constant 1 : index
    %c0_278 = arith.constant 0 : index
    %c0_279 = arith.constant 0 : index
    %562 = vector.load %arg21[%c1_277, %c0_278, %c0_279] : memref<2x256x64xf32, #tpu.memory_space<vmem>>, vector<1x256x64xf32>
    %563 = vector.shape_cast %562 : vector<1x256x64xf32> to vector<256x64xf32>
    %cst_280 = arith.constant dense<0.000000e+00> : vector<17x64xf32>
    %564 = tpu.matmul %561, %563, %cst_280 {dimension_numbers = #tpu.dot_dimension_numbers<[1], [0], [0], [1], [0, 0, 1, 1], [], []>} : vector<17x256xf32>, vector<256x64xf32>, vector<17x64xf32> -> vector<17x64xf32>
    %c1_281 = arith.constant 1 : index
    %c0_282 = arith.constant 0 : index
    %c0_283 = arith.constant 0 : index
    %565 = vector.load %arg22[%c1_281, %c0_282, %c0_283] : memref<2x1x64xf32, #tpu.memory_space<vmem>>, vector<1x1x64xf32>
    %566 = vector.shape_cast %565 : vector<1x1x64xf32> to vector<1x64xf32>
    %567 = vector.broadcast %566 : vector<1x64xf32> to vector<17x64xf32>
    %568 = arith.addf %564, %567 : vector<17x64xf32>
    %569 = arith.addf %552, %568 : vector<17x64xf32>
    %c1_284 = arith.constant 1 : index
    %c0_285 = arith.constant 0 : index
    %c0_286 = arith.constant 0 : index
    %570 = vector.load %arg23[%c1_284, %c0_285, %c0_286] : memref<2x1x64xf32, #tpu.memory_space<vmem>>, vector<1x1x64xf32>
    %571 = vector.shape_cast %570 : vector<1x1x64xf32> to vector<1x64xf32>
    %c1_287 = arith.constant 1 : index
    %c0_288 = arith.constant 0 : index
    %c0_289 = arith.constant 0 : index
    %572 = vector.load %arg24[%c1_287, %c0_288, %c0_289] : memref<2x1x64xf32, #tpu.memory_space<vmem>>, vector<1x1x64xf32>
    %573 = vector.shape_cast %572 : vector<1x1x64xf32> to vector<1x64xf32>
    %cst_290 = arith.constant dense<0.000000e+00> : vector<17xf32>
    %574 = vector.multi_reduction <add>, %569, %cst_290 [1] : vector<17x64xf32> to vector<17xf32>
    %575 = vector.shape_cast %574 : vector<17xf32> to vector<17x1xf32>
    %cst_291 = arith.constant 6.400000e+01 : f32
    %576 = vector.broadcast %cst_291 : f32 to vector<17x1xf32>
    %577 = arith.divf %575, %576 : vector<17x1xf32>
    %578 = vector.broadcast %577 : vector<17x1xf32> to vector<17x64xf32>
    %579 = arith.subf %569, %578 : vector<17x64xf32>
    %580 = vector.broadcast %577 : vector<17x1xf32> to vector<17x64xf32>
    %581 = arith.subf %569, %580 : vector<17x64xf32>
    %582 = arith.mulf %579, %581 : vector<17x64xf32>
    %cst_292 = arith.constant dense<0.000000e+00> : vector<17xf32>
    %583 = vector.multi_reduction <add>, %582, %cst_292 [1] : vector<17x64xf32> to vector<17xf32>
    %584 = vector.shape_cast %583 : vector<17xf32> to vector<17x1xf32>
    %cst_293 = arith.constant 6.400000e+01 : f32
    %585 = vector.broadcast %cst_293 : f32 to vector<17x1xf32>
    %586 = arith.divf %584, %585 : vector<17x1xf32>
    %587 = vector.broadcast %577 : vector<17x1xf32> to vector<17x64xf32>
    %588 = arith.subf %569, %587 : vector<17x64xf32>
    %cst_294 = arith.constant 9.99999974E-6 : f32
    %589 = vector.broadcast %cst_294 : f32 to vector<17x1xf32>
    %590 = arith.addf %586, %589 : vector<17x1xf32>
    %591 = math.rsqrt %590 : vector<17x1xf32>
    %592 = vector.broadcast %591 : vector<17x1xf32> to vector<17x64xf32>
    %593 = arith.mulf %588, %592 : vector<17x64xf32>
    %594 = vector.broadcast %571 : vector<1x64xf32> to vector<17x64xf32>
    %595 = arith.mulf %593, %594 : vector<17x64xf32>
    %596 = vector.broadcast %573 : vector<1x64xf32> to vector<17x64xf32>
    %597 = arith.addf %595, %596 : vector<17x64xf32>
    %598 = vector.extract_strided_slice %597 {offsets = [0, 0], sizes = [1, 64], strides = [1, 1]} : vector<17x64xf32> to vector<1x64xf32>
    %599 = tpu.concatenate %343, %598 in 0 : vector<1x64xf32>, vector<1x64xf32> -> vector<2x64xf32>
    %c0_295 = arith.constant 0 : index
    %c0_296 = arith.constant 0 : index
    %600 = vector.load %arg25[%c0_295, %c0_296] : memref<64x32xf32, #tpu.memory_space<vmem>>, vector<64x32xf32>
    %cst_297 = arith.constant dense<0.000000e+00> : vector<2x32xf32>
    %601 = tpu.matmul %599, %600, %cst_297 {dimension_numbers = #tpu.dot_dimension_numbers<[1], [0], [0], [1], [0, 0, 1, 1], [], []>} : vector<2x64xf32>, vector<64x32xf32>, vector<2x32xf32> -> vector<2x32xf32>
    %c0_298 = arith.constant 0 : index
    %c0_299 = arith.constant 0 : index
    %602 = vector.load %arg26[%c0_298, %c0_299] : memref<1x32xf32, #tpu.memory_space<vmem>>, vector<1x32xf32>
    %603 = vector.broadcast %602 : vector<1x32xf32> to vector<2x32xf32>
    %604 = arith.addf %601, %603 : vector<2x32xf32>
    %c0_300 = arith.constant 0 : index
    %c0_301 = arith.constant 0 : index
    %605 = vector.load %arg1[%c0_300, %c0_301] : memref<32x192xf32, #tpu.memory_space<vmem>>, vector<32x192xf32>
    %c0_302 = arith.constant 0 : index
    %c0_303 = arith.constant 0 : index
    %606 = vector.load %arg27[%c0_302, %c0_303] : memref<192x64xf32, #tpu.memory_space<vmem>>, vector<192x64xf32>
    %cst_304 = arith.constant dense<0.000000e+00> : vector<32x64xf32>
    %607 = tpu.matmul %605, %606, %cst_304 {dimension_numbers = #tpu.dot_dimension_numbers<[1], [0], [0], [1], [0, 0, 1, 1], [], []>} : vector<32x192xf32>, vector<192x64xf32>, vector<32x64xf32> -> vector<32x64xf32>
    %c0_305 = arith.constant 0 : index
    %c0_306 = arith.constant 0 : index
    %608 = vector.load %arg28[%c0_305, %c0_306] : memref<1x64xf32, #tpu.memory_space<vmem>>, vector<1x64xf32>
    %609 = vector.broadcast %608 : vector<1x64xf32> to vector<32x64xf32>
    %610 = arith.addf %607, %609 : vector<32x64xf32>
    %611 = vector.extract_strided_slice %610 {offsets = [0, 0], sizes = [16, 64], strides = [1, 1]} : vector<32x64xf32> to vector<16x64xf32>
    %cst_307 = arith.constant dense<0.000000e+00> : vector<64xf32>
    %612 = vector.multi_reduction <add>, %611, %cst_307 [0] : vector<16x64xf32> to vector<64xf32>
    %613 = vector.shape_cast %612 : vector<64xf32> to vector<1x64xf32>
    %cst_308 = arith.constant 1.600000e+01 : f32
    %614 = vector.broadcast %cst_308 : f32 to vector<1x64xf32>
    %615 = arith.divf %613, %614 : vector<1x64xf32>
    %616 = vector.extract_strided_slice %610 {offsets = [16, 0], sizes = [16, 64], strides = [1, 1]} : vector<32x64xf32> to vector<16x64xf32>
    %cst_309 = arith.constant dense<0.000000e+00> : vector<64xf32>
    %617 = vector.multi_reduction <add>, %616, %cst_309 [0] : vector<16x64xf32> to vector<64xf32>
    %618 = vector.shape_cast %617 : vector<64xf32> to vector<1x64xf32>
    %cst_310 = arith.constant 1.600000e+01 : f32
    %619 = vector.broadcast %cst_310 : f32 to vector<1x64xf32>
    %620 = arith.divf %618, %619 : vector<1x64xf32>
    %621 = tpu.concatenate %615, %620 in 0 : vector<1x64xf32>, vector<1x64xf32> -> vector<2x64xf32>
    %c0_311 = arith.constant 0 : index
    %c0_312 = arith.constant 0 : index
    %622 = vector.load %arg29[%c0_311, %c0_312] : memref<64x32xf32, #tpu.memory_space<vmem>>, vector<64x32xf32>
    %cst_313 = arith.constant dense<0.000000e+00> : vector<2x32xf32>
    %623 = tpu.matmul %621, %622, %cst_313 {dimension_numbers = #tpu.dot_dimension_numbers<[1], [0], [0], [1], [0, 0, 1, 1], [], []>} : vector<2x64xf32>, vector<64x32xf32>, vector<2x32xf32> -> vector<2x32xf32>
    %c0_314 = arith.constant 0 : index
    %c0_315 = arith.constant 0 : index
    %624 = vector.load %arg30[%c0_314, %c0_315] : memref<1x32xf32, #tpu.memory_space<vmem>>, vector<1x32xf32>
    %625 = vector.broadcast %624 : vector<1x32xf32> to vector<2x32xf32>
    %626 = arith.addf %623, %625 : vector<2x32xf32>
    %627 = arith.mulf %604, %604 : vector<2x32xf32>
    %cst_316 = arith.constant dense<0.000000e+00> : vector<2xf32>
    %628 = vector.multi_reduction <add>, %627, %cst_316 [1] : vector<2x32xf32> to vector<2xf32>
    %629 = vector.shape_cast %628 : vector<2xf32> to vector<2x1xf32>
    %630 = math.sqrt %629 : vector<2x1xf32>
    %cst_317 = arith.constant 9.99999996E-13 : f32
    %631 = vector.broadcast %cst_317 : f32 to vector<2x1xf32>
    %632 = arith.maximumf %630, %631 : vector<2x1xf32>
    %633 = vector.broadcast %632 : vector<2x1xf32> to vector<2x32xf32>
    %634 = arith.divf %604, %633 : vector<2x32xf32>
    %635 = arith.mulf %626, %626 : vector<2x32xf32>
    %cst_318 = arith.constant dense<0.000000e+00> : vector<2xf32>
    %636 = vector.multi_reduction <add>, %635, %cst_318 [1] : vector<2x32xf32> to vector<2xf32>
    %637 = vector.shape_cast %636 : vector<2xf32> to vector<2x1xf32>
    %638 = math.sqrt %637 : vector<2x1xf32>
    %cst_319 = arith.constant 9.99999996E-13 : f32
    %639 = vector.broadcast %cst_319 : f32 to vector<2x1xf32>
    %640 = arith.maximumf %638, %639 : vector<2x1xf32>
    %641 = vector.broadcast %640 : vector<2x1xf32> to vector<2x32xf32>
    %642 = arith.divf %626, %641 : vector<2x32xf32>
    %cst_320 = arith.constant dense<0.000000e+00> : vector<2x2xf32>
    %643 = tpu.matmul %642, %634, %cst_320 {dimension_numbers = #tpu.dot_dimension_numbers<[1], [1], [0], [0], [0, 0, 1, 0], [], []>} : vector<2x32xf32>, vector<2x32xf32>, vector<2x2xf32> -> vector<2x2xf32>
    %cst_321 = arith.constant 14.2857141 : f32
    %644 = vector.broadcast %cst_321 : f32 to vector<2x2xf32>
    %645 = arith.mulf %644, %643 : vector<2x2xf32>
    %cst_322 = arith.constant dense<0.000000e+00> : vector<2x2xf32>
    %646 = tpu.matmul %634, %642, %cst_322 {dimension_numbers = #tpu.dot_dimension_numbers<[1], [1], [0], [0], [0, 0, 1, 0], [], []>} : vector<2x32xf32>, vector<2x32xf32>, vector<2x2xf32> -> vector<2x2xf32>
    %cst_323 = arith.constant 14.2857141 : f32
    %647 = vector.broadcast %cst_323 : f32 to vector<2x2xf32>
    %648 = arith.mulf %647, %646 : vector<2x2xf32>
    %649 = tpu.concatenate %645, %648 in 0 : vector<2x2xf32>, vector<2x2xf32> -> vector<4x2xf32>
    %c0_324 = arith.constant 0 : index
    %c0_325 = arith.constant 0 : index
    %650 = vector.load %arg31[%c0_324, %c0_325] : memref<4x2xf32, #tpu.memory_space<vmem>>, vector<4x2xf32>
    tpu.vector_store %arg31[%c0_324, %c0_325], %649 {strides = array<i32>} : memref<4x2xf32, #tpu.memory_space<vmem>>, vector<4x2xf32>,
    return
  }
}

</mosaic_0001>

<bundles_post_ra>
// kernel: tile.29
= control target key start
LH: loop header
LB: loop body
LE: loop exit
PB: predicated region body
PF: predicated region fallthrough
CT: control target
= control target key end

     0   :  { %s85_s0 = inlined_call_operand.vmem [shape: s32[2,2], index: 0, kind: input, shape index: {}]   ;;  %s86_s1 = inlined_call_operand.hbm [shape: s32[4], index: 1, kind: output, shape index: {}]  }
   0x1   :  { %v5_v0 = vld [vmem:[%s85_s0] sm:$0x3] }
   0x2   :  { %6 = vst [vmem:[#allocation3] sm:$0x3] %v5_v0 }
   0x3   :  { %2 = vsyncpa [#allocation1], 0  ;;  %vm8_vm0 = vcmask 15360   ;;  %s58_s0 = smov 2   ;;  %vm14_vm1 = vcmask 31760   ;;  %s59_s8 = smov [#allocation0]  }
   0x4   :  { %s26_s9 = sshll.u32 %s59_s8, 4  ;;  %s27_s9 = int_to_ptr.vmem [resolvable:$true] %s26_s9 }
   0x5   :  { %s34_s10 = scalar_lea.vmem %s27_s9, 16  ;;  %s38_s11 = scalar_lea.vmem %s27_s9, 32 }
   0x6   :  { %p35_p0 = scmp.ne.s32.totalorder %s27_s9, %s34_s10  ;;  %p39_p1 = scmp.lt.s32.totalorder %s27_s9, %s27_s9 }
   0x7   :  { %p40_p2 = scmp.lt.s32.totalorder %s38_s11, %s34_s10 }
   0x9   :  { %v11_v1 = vld [vmem:[#allocation3 + $0x1] sm:$0x1]   ;;  %v7_v2 = vld [vmem:[#allocation3] sm:$0x1]   ;;  %p41_p3 = por %p40_p2, %p39_p1 }
   0xa   :  { %12 = vrot.lane.b32.xlu0 %v11_v1, %s58_s0  ;;  %9 = vst.msk [vmem:[#allocation2] sm:$0x1] %vm8_vm0, %v7_v2  }
   0xb   :  { %p42_p4 = pnand %p41_p3, %p35_p0 }
  0x7c   :  { %v13_v3 = vpop.permute.xlu0 %12  }
  0x7d   :  { %15 = vst.msk [vmem:[#allocation2] sm:$0x1] %vm14_vm1, %v13_v3  }
  0x84   :  { %v19_v4 = vld [vmem:[#allocation2] sm:$0x1] }
  0x85   :  { %21 = vst [vmem:[#allocation0] sm:$0x1] %v19_v4 }
  0x86   :  { %45 = shalt.err (!%p42_p4)
}
  0x87   :  { %s46_s14 = scalar_lea.hbm %s86_s1, 16 }
  0x88   :  { %p47_p5 = scmp.ne.s32.totalorder %s86_s1, %s46_s14  ;;  %p50_p6 = scmp.lt.u32.totalorder %s46_s14, %s86_s1 }
  0x8a   :  { %p52_p7 = pnand %p50_p6, %p47_p5 }
  0x8c   :  { %55 = shalt.err (!%p52_p7)
}
  0x8d   :  { %29 = dma.vmem_to_hbm [thread:$0]  %s27_s9, 16, %s86_s1, [#allocation1]  }
  0x8e   :  { %56 = dma.done.wait [#allocation1], 16  }
  0x8f   :  { %57 = vsyncadd [#allocation1], 4294967280 }
  0x90   :  { %31 = vsyncpa [#allocation1], 1 }

// kernel: patch_game_forward.1
= control target key start
LH: loop header
LB: loop body
LE: loop exit
PB: predicated region body
PF: predicated region fallthrough
CT: control target
= control target key end

     0   :  { %v9282_v0 = vmov 0.0|0.0   ;;  %s7599_s3 = smov 3   ;;  %s7600_s7 = smov 5   ;;  %vm224_vm0 = vcmask 523264   ;;  %vm586_vm1 = vcmask 261120   ;;  %vm442_vm2 = vcmask 130048   ;;  %s9281_s0 = inlined_call_operand.smem [shape: u32[32], index: -1, kind: input, shape index: {}] }
   0x1   :  { %6777 = vmatprep.subr.bf16.mxu0 %v9282_v0  ;;  %6813 = vmatprep.subr.bf16.mxu1 %v9282_v0  ;;  %s7649_s6 = sld [smem:[%s9281_s0 + %s7599_s3]]   ;;  %s7601_s14 = smov 8   ;;  %vm468_vm3 = vcmask 7168   ;;  %vm688_vm4 = vcmask 64512   ;;  %vm862_vm7 = vcmask 1040384   ;;  %vm7618_vm10 = vmmov 0   ;;  %vm8012_vm11 = vmpackc.low %vm586_vm1, %vm586_vm1 }
   0x2   :  { %s7654_s10 = sld [smem:[%s9281_s0 + %s7600_s7]]   ;;  %s7602_s18 = smov 7   ;;  %vm1100_vm12 = vcmask 138240   ;;  %vm1107_vm13 = vcmask 131072   ;;  %vm1667_vm14 = vcmask 516096   ;;  %vm5506_vm15 = vcmask 254976  }
   0x3   :  { %s7676_s13 = sld [smem:[%s9281_s0]]   ;;  %s7603_s22 = smov 4  }
   0x4   :  { %s7723_s17 = sld [smem:[%s9281_s0 + %s7601_s14]]   ;;  %s7604_s26 = smov 6  }
   0x5   :  { %s5699_s21 = sld [smem:[%s9281_s0 + %s7602_s18]]   ;;  %s7605_s30 = smov 2  }
   0x6   :  { %s7762_s25 = sld [smem:[%s9281_s0 + %s7603_s22]]   ;;  %s7606_s4 = smov 127  }
   0x7   :  { %v196_v1 = vld [vmem:[%s7649_s6] sm:$0xff]  ;;  %v197_v2 = vld [vmem:[%s7649_s6 + $0x8] sm:$0xff]  ;;  %v198_v6 = vld [vmem:[%s7649_s6 + $0x10] sm:$0xff]  ;;  %s5698_s29 = sld [smem:[%s9281_s0 + %s7604_s26]]   ;;  %s7607_s5 = smov 9  }
   0x8   :  { %v322_v3 = vld [vmem:[%s7654_s10] sm:$0xff]  ;;  %v6778_v4 = vpack.c.bf16 %v197_v2, %v196_v1  ;;  %v323_v5 = vld [vmem:[%s7654_s10 + $0x8] sm:$0xff]  ;;  %v199_v7 = vld [vmem:[%s7649_s6 + $0x18] sm:$0xff]  ;;  %s7780_s3 = sld [smem:[%s9281_s0 + %s7605_s30]]   ;;  %s7608_s9 = smov 120  }
   0x9   :  { %v6814_v8 = vpack.c.bf16 %v323_v5, %v322_v3  ;;  %v324_v9 = vld [vmem:[%s7654_s10 + $0x10] sm:$0xff]  ;;  %v325_v10 = vld [vmem:[%s7654_s10 + $0x18] sm:$0xff]  ;;  %v6781_v11 = vpack.c.bf16 %v199_v7, %v198_v6  ;;  %v200_v13 = vld [vmem:[%s7649_s6 + $0x20] sm:$0xff]  ;;  %s5701_s8 = sld [smem:[%s9281_s0 + %s7607_s5]]   ;;  %s7610_s12 = smov 1e-12  }
   0xa   :  { %6779 = vmatpush1.bf16.msra.mxu0 %v6778_v4  ;;  %v6817_v12 = vpack.c.bf16 %v325_v10, %v324_v9  ;;  %v201_v14 = vld [vmem:[%s7649_s6 + $0x28] sm:$0xff]  ;;  %v326_v15 = vld [vmem:[%s7654_s10 + $0x20] sm:$0xff]  ;;  %v202_v19 = vld [vmem:[%s7649_s6 + $0x30] sm:$0xff]  ;;  %s7611_s14 = smov 10   ;;  %s7612_s18 = smov 13  }
   0xb   :  { %6815 = vmatpush1.bf16.msra.mxu1 %v6814_v8  ;;  %6780 = vmatprep.subr.bf16.mxu0 %v9282_v0  ;;  %v327_v16 = vld [vmem:[%s7654_s10 + $0x28] sm:$0xff]  ;;  %v6784_v17 = vpack.c.bf16 %v201_v14, %v200_v13  ;;  %v203_v20 = vld [vmem:[%s7649_s6 + $0x38] sm:$0xff]  ;;  %v328_v21 = vld [vmem:[%s7654_s10 + $0x30] sm:$0xff]  ;;  %s7614_s22 = smov 11   ;;  %s7615_s26 = smov 12  }
   0xc   :  { %6816 = vmatprep.subr.bf16.mxu1 %v9282_v0  ;;  %v6820_v18 = vpack.c.bf16 %v327_v16, %v326_v15  ;;  %v329_v22 = vld [vmem:[%s7654_s10 + $0x38] sm:$0xff]  ;;  %v6787_v23 = vpack.c.bf16 %v203_v20, %v202_v19  ;;  %v204_v25 = vld [vmem:[%s7649_s6 + $0x40] sm:$0xff]  ;;  %v205_v26 = vld [vmem:[%s7649_s6 + $0x48] sm:$0xff]  ;;  %s7617_s7 = smov 64   ;;  %s7624_s23 = smov 21  }
   0xd   :  { %v6823_v24 = vpack.c.bf16 %v329_v22, %v328_v21  ;;  %v330_v27 = vld [vmem:[%s7654_s10 + $0x40] sm:$0xff]  ;;  %v331_v28 = vld [vmem:[%s7654_s10 + $0x48] sm:$0xff]  ;;  %v6790_v29 = vpack.c.bf16 %v205_v26, %v204_v25  ;;  %v206_v31 = vld [vmem:[%s7649_s6 + $0x50] sm:$0xff]  ;;  %s8215_s27 = sld [smem:[%s9281_s0 + %s7624_s23]]   ;;  %s7625_s28 = smov 17  }
   0xe   :  { %6782 = vmatpush1.bf16.msra.mxu0 %v6781_v11  ;;  %v6826_v30 = vpack.c.bf16 %v331_v28, %v330_v27  ;;  %v207_v32 = vld [vmem:[%s7649_s6 + $0x58] sm:$0xff]  ;;  %v189_v33 = vld [vmem:[%s7676_s13 + $0x8] sm:$0xff]  ;;  %v332_v34 = vld [vmem:[%s7654_s10 + $0x50] sm:$0xff]  ;;  %s7628_s16 = smov 22   ;;  %s7629_s23 = smov 23  }
   0xf   :  { %6818 = vmatpush1.bf16.msra.mxu1 %v6817_v12  ;;  %6783 = vmatprep.subr.bf16.mxu0 %v9282_v0  ;;  %v333_v35 = vld [vmem:[%s7654_s10 + $0x58] sm:$0xff]  ;;  %v6793_v36 = vpack.c.bf16 %v207_v32, %v206_v31  ;;  %v208_v38 = vld [vmem:[%s7649_s6 + $0x60] sm:$0xff]  ;;  %v209_v39 = vld [vmem:[%s7649_s6 + $0x68] sm:$0xff]  ;;  %s8351_s20 = sld [smem:[%s9281_s0 + %s7628_s16]]   ;;  %s7634_s5 = smov 29  }
  0x10   :  { %6819 = vmatprep.subr.bf16.mxu1 %v9282_v0  ;;  %5724 = vmatprep.mubr.msk.f32.mxu0 %vm224_vm0, %v189_v33  ;;  %v6829_v37 = vpack.c.bf16 %v333_v35, %v332_v34  ;;  %v334_v40 = vld [vmem:[%s7654_s10 + $0x60] sm:$0xff]  ;;  %v335_v41 = vld [vmem:[%s7654_s10 + $0x68] sm:$0xff]  ;;  %v6796_v42 = vpack.c.bf16 %v209_v39, %v208_v38  ;;  %v210_v44 = vld [vmem:[%s7649_s6 + $0x70] sm:$0xff]  ;;  %s7636_s19 = smov 28  }
  0x11   :  { %5728 = vmatprep.mubr.msk.f32.mxu1 %vm224_vm0, %v189_v33  ;;  %v6832_v43 = vpack.c.bf16 %v335_v41, %v334_v40  ;;  %v211_v45 = vld [vmem:[%s7649_s6 + $0x78] sm:$0xff]  ;;  %v336_v46 = vld [vmem:[%s7654_s10 + $0x70] sm:$0xff]  ;;  %v212_v50 = vld [vmem:[%s7649_s6 + $0x80] sm:$0xff]  ;;  %s5720_s24 = sld [smem:[%s9281_s0 + %s7636_s19]]  }
  0x12   :  { %6785 = vmatpush1.bf16.msra.mxu0 %v6784_v17  ;;  %v337_v47 = vld [vmem:[%s7654_s10 + $0x78] sm:$0xff]  ;;  %v6799_v48 = vpack.c.bf16 %v211_v45, %v210_v44  ;;  %v213_v51 = vld [vmem:[%s7649_s6 + $0x88] sm:$0xff]  ;;  %v338_v52 = vld [vmem:[%s7654_s10 + $0x80] sm:$0xff] }
  0x13   :  { %6821 = vmatpush1.bf16.msra.mxu1 %v6820_v18  ;;  %6786 = vmatprep.subr.bf16.mxu0 %v9282_v0  ;;  %v6835_v49 = vpack.c.bf16 %v337_v47, %v336_v46  ;;  %v339_v53 = vld [vmem:[%s7654_s10 + $0x88] sm:$0xff]  ;;  %v6802_v54 = vpack.c.bf16 %v213_v51, %v212_v50  ;;  %v214_v56 = vld [vmem:[%s7649_s6 + $0x90] sm:$0xff]  ;;  %v215_v57 = vld [vmem:[%s7649_s6 + $0x98] sm:$0xff] }
  0x14   :  { %6822 = vmatprep.subr.bf16.mxu1 %v9282_v0  ;;  %v6838_v55 = vpack.c.bf16 %v339_v53, %v338_v52  ;;  %v340_v58 = vld [vmem:[%s7654_s10 + $0x90] sm:$0xff]  ;;  %v341_v59 = vld [vmem:[%s7654_s10 + $0x98] sm:$0xff]  ;;  %v6805_v60 = vpack.c.bf16 %v215_v57, %v214_v56  ;;  %v216_v62 = vld [vmem:[%s7649_s6 + $0xa0] sm:$0xff] }
  0x15   :  { %v6841_v61 = vpack.c.bf16 %v341_v59, %v340_v58  ;;  %v217_v63 = vld [vmem:[%s7649_s6 + $0xa8] sm:$0xff]  ;;  %v342_v1 = vld [vmem:[%s7654_s10 + $0xa0] sm:$0xff]  ;;  %v218_v5 = vld [vmem:[%s7649_s6 + $0xb0] sm:$0xff] }
  0x16   :  { %6788 = vmatpush1.bf16.msra.mxu0 %v6787_v23  ;;  %v343_v2 = vld [vmem:[%s7654_s10 + $0xa8] sm:$0xff]  ;;  %v6808_v3 = vpack.c.bf16 %v217_v63, %v216_v62  ;;  %v219_v6 = vld [vmem:[%s7649_s6 + $0xb8] sm:$0xff]  ;;  %v344_v7 = vld [vmem:[%s7654_s10 + $0xb0] sm:$0xff] }
  0x17   :  { %6824 = vmatpush1.bf16.msra.mxu1 %v6823_v24  ;;  %6789 = vmatprep.subr.bf16.mxu0 %v9282_v0  ;;  %v6844_v4 = vpack.c.bf16 %v343_v2, %v342_v1  ;;  %v345_v8 = vld [vmem:[%s7654_s10 + $0xb8] sm:$0xff]  ;;  %v575_v9 = vld [vmem:[%s7723_s17] sm:$0xff]  ;;  %v576_v10 = vld [vmem:[%s7723_s17 + $0x8] sm:$0xff]  ;;  %v6811_v11 = vpack.c.bf16 %v219_v6, %v218_v5  ;;  %v68_v24 = vstv %s5699_s21  ;;  %s7871_s21 = sld [smem:[%s9281_s0 + %s7612_s18]]   ;;  %s7623_s18 = smov 19  }
  0x18   :  { %6825 = vmatprep.subr.bf16.mxu1 %v9282_v0  ;;  %v6847_v12 = vpack.c.bf16 %v345_v8, %v344_v7  ;;  %v6849_v13 = vpack.c.bf16 %v576_v10, %v575_v9  ;;  %v188_v14 = vld [vmem:[%s7676_s13] sm:$0xff]  ;;  %v191_v15 = vld [vmem:[%s7676_s13 + $0x18] sm:$0xff]  ;;  %v190_v16 = vld [vmem:[%s7676_s13 + $0x10] sm:$0xff]  ;;  %69 = vst [vmem:[#allocation2] sm:$0x1] %v68_v24 }
  0x19   :  { %v193_v17 = vld [vmem:[%s7676_s13 + $0x28] sm:$0xff]  ;;  %v192_v18 = vld [vmem:[%s7676_s13 + $0x20] sm:$0xff]  ;;  %v577_v19 = vld [vmem:[%s7723_s17 + $0x10] sm:$0xff] }
  0x1a   :  { %6791 = vmatpush1.bf16.msra.mxu0 %v6790_v29  ;;  %v578_v20 = vld [vmem:[%s7723_s17 + $0x18] sm:$0xff]  ;;  %v194_v22 = vld [vmem:[%s7676_s13 + $0x30] sm:$0xff]  ;;  %v220_v25 = vld [vmem:[%s7762_s25] sm:$0xff]  ;;  %s5702_s17 = sld [smem:[%s9281_s0 + %s7611_s14]]   ;;  %s7622_s14 = smov 16  }
  0x1b   :  { %6827 = vmatpush1.bf16.msra.mxu1 %v6826_v30  ;;  %6792 = vmatprep.subr.bf16.mxu0 %v9282_v0  ;;  %v195_v21 = vld [vmem:[%s7676_s13 + $0x38] sm:$0xff]  ;;  %v6853_v23 = vpack.c.bf16 %v578_v20, %v577_v19  ;;  %v7768_v26 = vld [vmem:[%s5698_s29] ss:$0 sm:$0xff]  ;;  %v221_v33 = vld [vmem:[%s7762_s25 + $0x8] sm:$0xff]  ;;  %s7936_s29 = sld [smem:[%s9281_s0 + %s7615_s26]]   ;;  %s7637_s26 = smov 30  }
  0x1c   :  { %6828 = vmatprep.subr.bf16.mxu1 %v9282_v0  ;;  %v7811_v19 = vld [vmem:[%s5701_s8] ss:$0 sm:$0xff]  ;;  %s7619_s8 = smov 32  }
  0x1e   :  { %6794 = vmatpush1.bf16.msra.mxu0 %v6793_v36 }
  0x1f   :  { %6830 = vmatpush1.bf16.msra.mxu1 %v6829_v37  ;;  %6795 = vmatprep.subr.bf16.mxu0 %v9282_v0  ;;  %v7789_v59 = vld [vmem:[#allocation2] ss:$0 sm:$0xff] }
  0x20   :  { %6831 = vmatprep.subr.bf16.mxu1 %v9282_v0 }
  0x22   :  { %6797 = vmatpush1.bf16.msra.mxu0 %v6796_v42  ;;  %v133_v42 = vld [vmem:[%s7780_s3 + $0x8] sm:$0xff] }
  0x23   :  { %6833 = vmatpush1.bf16.msra.mxu1 %v6832_v43  ;;  %6798 = vmatprep.subr.bf16.mxu0 %v9282_v0  ;;  %v137_v43 = vadd.f32 1e-20, %v133_v42 }
  0x24   :  { %6834 = vmatprep.subr.bf16.mxu1 %v9282_v0 }
  0x25   :  { %7388 = vlog2.f32 %v137_v43 }
  0x26   :  { %6800 = vmatpush1.bf16.msra.mxu0 %v6799_v48 }
  0x27   :  { %6836 = vmatpush1.bf16.msra.mxu1 %v6835_v49  ;;  %6801 = vmatprep.subr.bf16.mxu0 %v9282_v0 }
  0x28   :  { %6837 = vmatprep.subr.bf16.mxu1 %v9282_v0 }
  0x2a   :  { %6803 = vmatpush1.bf16.msra.mxu0 %v6802_v54 }
  0x2b   :  { %6839 = vmatpush1.bf16.msra.mxu1 %v6838_v55  ;;  %6804 = vmatprep.subr.bf16.mxu0 %v9282_v0  ;;  %v132_v55 = vld [vmem:[%s7780_s3] sm:$0xff] }
  0x2c   :  { %6840 = vmatprep.subr.bf16.mxu1 %v9282_v0  ;;  %v136_v56 = vadd.f32 1e-20, %v132_v55 }
  0x2e   :  { %6806 = vmatpush1.bf16.msra.mxu0 %v6805_v60 }
  0x2f   :  { %6842 = vmatpush1.bf16.msra.mxu1 %v6841_v61  ;;  %6807 = vmatprep.subr.bf16.mxu0 %v9282_v0  ;;  %v7389_v44 = vpop.eup %7388 }
  0x30   :  { %6843 = vmatprep.subr.bf16.mxu1 %v9282_v0  ;;  %v143_v45 = vmul.f32 0.6931472, %v7389_v44 }
  0x32   :  { %6809 = vmatpush1.bf16.msra.mxu0 %v6808_v3  ;;  %v149_v46 = vsub.f32 0.0, %v143_v45 }
  0x33   :  { %6845 = vmatpush1.bf16.msra.mxu1 %v6844_v4  ;;  %6810 = vmatprep.subr.bf16.mxu0 %v9282_v0 }
  0x34   :  { %6846 = vmatprep.subr.bf16.mxu1 %v9282_v0  ;;  %v153_v49 = vadd.f32 1e-20, %v149_v46 }
  0x36   :  { %6812 = vmatpush1.bf16.msra.mxu0 %v6811_v11  ;;  %7390 = vlog2.f32 %v153_v49  ;;  %v222_v11 = vld [vmem:[%s7762_s25 + $0x10] sm:$0xff] }
  0x37   :  { %6848 = vmatpush1.bf16.msra.mxu1 %v6847_v12  ;;  %7392 = vlog2.f32 %v136_v56 }
  0x38   :  { %6850 = vmatprep.subr.bf16.mxu1 %v6849_v13 }
  0x39   :  { %302 = vmatmul.mubr.f32.vlgmr.msra.gmra.mrb[0].mxu0 %v188_v14 }
  0x3a   :  { %411 = vmatmul.mubr.f32.vlgmr.msra.gmra.mrb[0].mxu1 %v188_v14  ;;  %5725 = vmatprep.mubr.msk.f32.mxu0 %vm224_vm0, %v191_v15 }
  0x3b   :  { %5729 = vmatprep.mubr.msk.f32.mxu1 %vm224_vm0, %v191_v15  ;;  %6852 = vmatpush3.bf16.msra.mxu1 %v6849_v13  ;;  %v223_v13 = vld [vmem:[%s7762_s25 + $0x18] sm:$0xff]  ;;  %s7929_s25 = sld [smem:[%s9281_s0 + %s7614_s22]]  }
  0x3c   :  { %6854 = vmatprep.subr.bf16.mxu1 %v6853_v23  ;;  %s8170_s22 = sld [smem:[%s9281_s0 + %s7623_s18]]  }
  0x3d   :  { %307 = vmatmul.mubr.f32.gmra.mrb[2].mxu0 %v190_v16 }
  0x3e   :  { %416 = vmatmul.mubr.f32.gmra.mrb[2].mxu1 %v190_v16  ;;  %5726 = vmatprep.mubr.msk.f32.mxu0 %vm224_vm0, %v193_v17 }
  0x3f   :  { %5730 = vmatprep.mubr.msk.f32.mxu1 %vm224_vm0, %v193_v17  ;;  %6856 = vmatpush3.bf16.msra.mxu1 %v6853_v23 }
  0x40   :  { %v7391_v50 = vpop.eup %7390 }
  0x41   :  { %312 = vmatmul.mubr.f32.gmra.mrb[4].mxu0 %v192_v18  ;;  %v159_v51 = vmul.f32 0.6931472, %v7391_v50  ;;  %v7393_v57 = vpop.eup %7392 }
  0x42   :  { %421 = vmatmul.mubr.f32.gmra.mrb[4].mxu1 %v192_v18  ;;  %5727 = vmatprep.mubr.msk.f32.mxu0 %vm224_vm0, %v195_v21  ;;  %v141_v58 = vmul.f32 0.6931472, %v7393_v57 }
  0x43   :  { %5731 = vmatprep.mubr.msk.f32.mxu1 %vm224_vm0, %v195_v21  ;;  %v165_v52 = vsub.f32 0.0, %v159_v51 }
  0x44   :  { %v148_v61 = vsub.f32 0.0, %v141_v58 }
  0x45   :  { %317 = vmatmul.mubr.f32.gmra.mrb[6].mxu0 %v194_v22 }
  0x46   :  { %426 = vmatmul.mubr.f32.gmra.mrb[6].mxu1 %v194_v22  ;;  %v152_v1 = vadd.f32 1e-20, %v148_v61 }
  0x48   :  { %7394 = vlog2.f32 %v152_v1 }
  0x52   :  { %v7395_v8 = vpop.eup %7394 }
  0x53   :  { %v157_v9 = vmul.f32 0.6931472, %v7395_v8 }
  0x55   :  { %v164_v10 = vsub.f32 0.0, %v157_v9 }
 0x10c   :  { %v303_v27 = vpop.f32.mrb[0].mxu0 }
 0x10d   :  { %v412_v28 = vpop.f32.mrb[0].mxu1  ;;  %v304_v29 = vadd.f32 %v303_v27, %v220_v25  ;;  %v305_v30 = vpop.f32.mrb[1].mxu0 }
 0x10e   :  { %v438_v31 = vmul.f32 %v7768_v26, %v412_v28  ;;  %v414_v32 = vpop.f32.mrb[1].mxu1 }
 0x10f   :  { %6339 = vmatprep.mubr.msk.f32.mxu1 %vm586_vm1, %v304_v29 }
 0x110   :  { %v443_v34 = vsel %vm442_vm2, %v438_v31, 0.0  ;;  %v308_v35 = vpop.f32.mrb[2].mxu0 }
 0x111   :  { %444 = vadd.xlane.f32.xlu0 %v443_v34  ;;  %v309_v36 = vadd.f32 %v308_v35, %v221_v33  ;;  %v417_v37 = vpop.f32.mrb[2].mxu1  ;;  %v310_v38 = vpop.f32.mrb[3].mxu0 }
 0x112   :  { %v439_v39 = vmul.f32 %v7768_v26, %v417_v37  ;;  %v419_v40 = vpop.f32.mrb[3].mxu1 }
 0x113   :  { %6340 = vmatmul.mubr.msk.f32.vlgmr.msra.gmra.mrb[8].mxu1 %vm586_vm1, %v309_v36  ;;  %v7609_v40 = vmov 0  }
 0x114   :  { %v446_v41 = vsel %vm442_vm2, %v439_v39, 0.0  ;;  %v313_v12 = vpop.f32.mrb[4].mxu0  ;;  %7327 = vset.pattern.permute.xlu0 %v7609_v40  ;;  %7326 = vset.pattern.permute.xlu1 %v7609_v40 }
 0x115   :  { %447 = vadd.xlane.f32.xlu0 %v446_v41  ;;  %v7783_v47 = vpop.f32.mrb[4].mxu1  ;;  %v314_v14 = vadd.f32 %v313_v12, %v222_v11  ;;  %v315_v15 = vpop.f32.mrb[5].mxu0 }
 0x116   :  { %v424_v48 = vpop.f32.mrb[5].mxu1 }
 0x117   :  { %6342 = vmatprep.mubr.msk.f32.mxu1 %vm586_vm1, %v314_v14 }
 0x118   :  { %v318_v16 = vpop.f32.mrb[6].mxu0 }
 0x119   :  { %v7786_v53 = vpop.f32.mrb[6].mxu1  ;;  %v319_v17 = vadd.f32 %v318_v16, %v223_v13  ;;  %v320_v18 = vpop.f32.mrb[7].mxu0  ;;  %v135_v16 = vld [vmem:[%s7780_s3 + $0x18] sm:$0xff] }
 0x11a   :  { %v429_v54 = vpop.f32.mrb[7].mxu1 }
 0x11b   :  { %6343 = vmatmul.mubr.msk.f32.gmra.mrb[10].mxu1 %vm586_vm1, %v319_v17  ;;  %v139_v17 = vadd.f32 1e-20, %v135_v16  ;;  %v876_v16 = vld [vmem:[%s7871_s21 + $0x30] sm:$0xff] }
 0x12b   :  { %174 = vrot.lane.b32.xlu0 %v165_v52, %s7606_s4 }
 0x19e   :  { %v445_v60 = vpop.xlane.xlu0 %444 }
 0x19f   :  { %v7792_v62 = vadd.f32 %v7789_v59, %v445_v60 }
 0x1a1   :  { %v466_v3 = vmul.f32 %v7792_v62, %v7792_v62 }
 0x1a2   :  { %v448_v63 = vpop.xlane.xlu0 %447 }
 0x1a3   :  { %v7795_v2 = vadd.f32 %v7789_v59, %v448_v63  ;;  %v469_v5 = vsel %vm468_vm3, %v466_v3, 0.0 }
 0x1a5   :  { %v467_v4 = vmul.f32 %v7795_v2, %v7795_v2 }
 0x1a6   :  { %v175_v29 = vpop.permute.xlu0 %174 }
 0x1a7   :  { %v470_v6 = vsel %vm468_vm3, %v467_v4, 0.0  ;;  %v185_v30 = vsub.f32 %v165_v52, %v175_v29 }
 0x1a8   :  { %v471_v7 = vadd.f32 %v470_v6, %v469_v5 }
 0x1aa   :  { %472 = vadd.xlane.f32.xlu1 %v471_v7 }
 0x1bb   :  { %172 = vrot.lane.b32.xlu1 %v164_v10, %s7606_s4 }
 0x1e6   :  { %v6341_v20 = vpop.f32.mrb[8].mxu1 }
 0x1e7   :  { %v671_v21 = vadd.f32 %v6341_v20, %v7811_v19  ;;  %v665_v22 = vpop.f32.mrb[9].mxu1 }
 0x1e8   :  { %v666_v23 = vadd.f32 %v7811_v19, %v665_v22 }
 0x1e9   :  { %v685_v24 = vadd.f32 %v671_v21, %v165_v52 }
 0x1ea   :  { %v684_v25 = vadd.f32 %v666_v23, %v164_v10 }
 0x1eb   :  { %v692_v27 = vsel %vm688_vm4, %v685_v24, -inf }
 0x1ec   :  { %693 = vmax.xlane.f32.xlu0 %v692_v27  ;;  %v689_v28 = vsel %vm688_vm4, %v684_v25, -inf  ;;  %v757_v27 = vld [vmem:[%s5702_s17] sm:$0xff]  ;;  %s8143_s17 = sld [smem:[%s9281_s0 + %s7622_s14]]   ;;  %s7635_s14 = smov 26  }
 0x1ed   :  { %690 = vmax.xlane.f32.xlu1 %v689_v28  ;;  %6345 = vmatprep.subr.mxu1 %v757_v27  ;;  %s5718_s18 = sld [smem:[%s9281_s0 + %s7635_s14]]  }
 0x1ee   :  { %v6344_v60 = vpop.f32.mrb[10].mxu1  ;;  %6346 = vmatpush3.msra.mxu1 %v757_v27  ;;  %v882_v27 = vld [vmem:[%s7871_s21 + $0x60] sm:$0xff] }
 0x1ef   :  { %6873 = vmatprep.subr.bf16.mxu1 %v9282_v0 }
 0x202   :  { %537 = vrot.lane.b32.xlu0 %v185_v30, %s7608_s9 }
 0x237   :  { %v473_v31 = vpop.xlane.xlu1 %472 }
 0x238   :  { %v474_v32 = vrot.slane %v473_v31, 4 }
 0x23a   :  { %v475_v33 = vadd.f32 %v474_v32, %v473_v31  ;;  %v681_v31 = vadd.f32 %v6344_v60, %v7811_v19 }
 0x23b   :  { %v173_v34 = vpop.permute.xlu1 %172 }
 0x23c   :  { %v476_v35 = vrot.slane %v475_v33, 2  ;;  %v184_v36 = vsub.f32 %v164_v10, %v173_v34 }
 0x23e   :  { %v477_v37 = vadd.f32 %v476_v35, %v475_v33  ;;  %535 = vrot.lane.b32.xlu1 %v184_v36, %s7608_s9  ;;  %v441_v33 = vmul.f32 %v7768_v26, %v7786_v53  ;;  %v440_v36 = vmul.f32 %v7768_v26, %v7783_v47 }
 0x240   :  { %v478_v38 = vrot.slane %v477_v37, 1  ;;  %v452_v35 = vsel %vm442_vm2, %v441_v33, 0.0 }
 0x242   :  { %v479_v39 = vadd.f32 %v478_v38, %v477_v37  ;;  %v449_v38 = vsel %vm442_vm2, %v440_v36, 0.0 }
 0x244   :  { %7277 = vpush %v479_v39  ;;  %v7849_v39 = vpop.f32.mrb[11].mxu1 }
 0x245   :  { %v676_v36 = vadd.f32 %v7811_v19, %v7849_v39 }
 0x275   :  { %s7278_s10 = spop %7277 }
 0x276   :  { %v481_v41 = vstv %s7278_s10  ;;  %s7621_s10 = smov 15  }
 0x277   :  { %7396 = vrsqrt.f32 %v481_v41  ;;  %vm484_vm5 = vcmp.eq.f32.partialorder %v481_v41, inf  ;;  %v487_v51 = vand.u32 2147483648, %v481_v41  ;;  %vm486_vm6 = vcmp.eq.f32.partialorder %v481_v41, 0.0 }
 0x279   :  { %v694_v42 = vpop.xlane.xlu0 %693 }
 0x27a   :  { %v702_v43 = vsub.f32 %v685_v24, %v694_v42  ;;  %v691_v44 = vpop.xlane.xlu1 %690 }
 0x27b   :  { %v701_v45 = vsub.f32 %v684_v25, %v691_v44 }
 0x27c   :  { %v707_v46 = vmul.f32 1.442695, %v702_v43 }
 0x27d   :  { %v705_v48 = vmul.f32 1.442695, %v701_v45  ;;  %v538_v6 = vpop.permute.xlu0 %537 }
 0x27e   :  { %7398 = vpow2.f32 %v707_v46 }
 0x27f   :  { %7400 = vpow2.f32 %v705_v48  ;;  %v134_v48 = vld [vmem:[%s7780_s3 + $0x10] sm:$0xff]  ;;  %s7616_s3 = smov 14  }
 0x280   :  { %s7969_s6 = sld [smem:[%s9281_s0 + %s7616_s3]]   ;;  %s7626_s3 = smov 18  }
 0x281   :  { %v7397_v49 = vpop.eup %7396 }
 0x282   :  { %v483_v50 = vmul.f32 %v7397_v49, %v481_v41  ;;  %v138_v49 = vadd.f32 1e-20, %v134_v48  ;;  %v759_v48 = vld [vmem:[%s7929_s25 + $0x8] sm:$0xff] }
 0x284   :  { %v485_v52 = vsel %vm484_vm5, %v481_v41, %v483_v50  ;;  %vm5685_vm5 = vcmask 1041408  }
 0x285   :  { %v488_v54 = vsel %vm486_vm6, %v487_v51, %v485_v52  ;;  %vm5687_vm6 = vcmask 11264  }
 0x286   :  { %7279 = vpush %v488_v54 }
 0x288   :  { %v7819_v55 = vpop.eup %7398 }
 0x289   :  { %v7821_v56 = vpop.eup %7400  ;;  %v716_v57 = vsel %vm688_vm4, %v7819_v55, 0.0 }
 0x28a   :  { %717 = vadd.xlane.f32.xlu0 %v716_v57  ;;  %v713_v58 = vsel %vm688_vm4, %v7821_v56, 0.0 }
 0x28b   :  { %714 = vadd.xlane.f32.xlu1 %v713_v58 }
 0x2b0   :  { %v536_v7 = vpop.permute.xlu1 %535 }
 0x2b7   :  { %s7280_s11 = spop %7279 }
 0x2b8   :  { %s490_s13 = smax.f32 %s7610_s12, %s7280_s11  ;;  %s7627_s11 = smov 20  }
 0x2b9   :  { %v491_v61 = vstv %s490_s13  ;;  %s8083_s13 = sld [smem:[%s9281_s0 + %s7621_s10]]  }
 0x2ba   :  { %7402 = vrcp.f32 %v491_v61  ;;  %s8290_s10 = sld [smem:[%s9281_s0 + %s7626_s3]]  }
 0x2bb   :  { %s8331_s15 = sld [smem:[%s9281_s0 + %s7627_s11]]  }
 0x2c4   :  { %v7403_v63 = vpop.eup %7402 }
 0x2c5   :  { %v494_v1 = vmul.f32 %v7403_v63, %v7795_v2  ;;  %v493_v3 = vmul.f32 %v7403_v63, %v7792_v62 }
 0x2c7   :  { %v524_v4 = vmul.f32 2.0, %v494_v1  ;;  %v523_v5 = vmul.f32 2.0, %v493_v3 }
 0x2c9   :  { %v5735_v8 = vadd.f32 -1.0, %v524_v4  ;;  %v5734_v9 = vadd.f32 -1.0, %v523_v5 }
 0x2cb   :  { %v548_v10 = vadd.f32 %v5735_v8, %v538_v6  ;;  %v547_v11 = vadd.f32 %v5734_v9, %v536_v7  ;;  %v871_v6 = vld [vmem:[%s7871_s21 + $0x8] sm:$0xff]  ;;  %v873_v7 = vld [vmem:[%s7871_s21 + $0x18] sm:$0xff]  ;;  %v870_v8 = vld [vmem:[%s7871_s21] sm:$0xff] }
 0x2cc   :  { %v7877_v9 = vpack.c.bf16 %v873_v7, %v871_v6 }
 0x2cd   :  { %v552_v12 = vsub.f32 0.0, %v548_v10  ;;  %v551_v13 = vsub.f32 0.0, %v547_v11  ;;  %v872_v10 = vld [vmem:[%s7871_s21 + $0x10] sm:$0xff]  ;;  %v875_v11 = vld [vmem:[%s7871_s21 + $0x28] sm:$0xff] }
 0x2ce   :  { %6858 = vmatprep.subr.bf16.mxu0 %v7877_v9 }
 0x2cf   :  { %v557_v14 = vmul.f32 1.442695, %v552_v12  ;;  %v555_v15 = vmul.f32 1.442695, %v551_v13  ;;  %v877_v12 = vld [vmem:[%s7871_s21 + $0x38] sm:$0xff]  ;;  %v7882_v13 = vpack.c.bf16 %v872_v10, %v870_v8 }
 0x2d1   :  { %7404 = vpow2.f32 %v557_v14  ;;  %v7884_v14 = vpack.c.bf16 %v877_v12, %v875_v11  ;;  %6860 = vmatpush1.bf16.msra.mxu0 %v7882_v13 }
 0x2d2   :  { %7406 = vpow2.f32 %v555_v15  ;;  %v874_v15 = vld [vmem:[%s7871_s21 + $0x20] sm:$0xff] }
 0x2d3   :  { %7408 = vlog2.f32 %v139_v17  ;;  %v7892_v17 = vpack.c.bf16 %v876_v16, %v874_v15  ;;  %6862 = vmatprep.subr.bf16.mxu0 %v7884_v14 }
 0x2d5   :  { %6864 = vmatpush1.bf16.msra.mxu0 %v7892_v17 }
 0x2db   :  { %v7405_v2 = vpop.eup %7404 }
 0x2dc   :  { %v7407_v18 = vpop.eup %7406  ;;  %v564_v62 = vadd.f32 1.0, %v7405_v2  ;;  %v879_v2 = vld [vmem:[%s7871_s21 + $0x48] sm:$0xff] }
 0x2dd   :  { %v563_v20 = vadd.f32 1.0, %v7407_v18  ;;  %v7409_v21 = vpop.eup %7408  ;;  %v881_v18 = vld [vmem:[%s7871_s21 + $0x58] sm:$0xff] }
 0x2de   :  { %7410 = vrcp.f32 %v564_v62  ;;  %v147_v22 = vmul.f32 0.6931472, %v7409_v21  ;;  %v7898_v62 = vpack.c.bf16 %v881_v18, %v879_v2  ;;  %v880_v21 = vld [vmem:[%s7871_s21 + $0x50] sm:$0xff] }
 0x2df   :  { %7412 = vrcp.f32 %v563_v20  ;;  %v878_v20 = vld [vmem:[%s7871_s21 + $0x40] sm:$0xff] }
 0x2e0   :  { %v151_v24 = vsub.f32 0.0, %v147_v22  ;;  %v7902_v22 = vpack.c.bf16 %v880_v21, %v878_v20  ;;  %6866 = vmatprep.subr.bf16.mxu0 %v7898_v62 }
 0x2e2   :  { %v155_v28 = vadd.f32 1e-20, %v151_v24  ;;  %6868 = vmatpush1.bf16.msra.mxu0 %v7902_v22  ;;  %v885_v24 = vld [vmem:[%s7871_s21 + $0x78] sm:$0xff] }
 0x2e4   :  { %7414 = vlog2.f32 %v155_v28  ;;  %v884_v28 = vld [vmem:[%s7871_s21 + $0x70] sm:$0xff] }
 0x2e8   :  { %v7411_v23 = vpop.eup %7410 }
 0x2e9   :  { %v7413_v25 = vpop.eup %7412  ;;  %740 = vperm.xlu0 %7327, %v7411_v23   ;;  %v883_v23 = vld [vmem:[%s7871_s21 + $0x68] sm:$0xff] }
 0x2ea   :  { %735 = vperm.xlu1 %7326, %v7413_v25   ;;  %v7908_v25 = vpack.c.bf16 %v885_v24, %v883_v23 }
 0x2ec   :  { %6870 = vmatprep.subr.bf16.mxu0 %v7908_v25 }
 0x2ee   :  { %v7415_v29 = vpop.eup %7414 }
 0x2ef   :  { %v163_v30 = vmul.f32 0.6931472, %v7415_v29  ;;  %v7912_v29 = vpack.c.bf16 %v884_v28, %v882_v27 }
 0x2f1   :  { %v7836_v32 = vsub.f32 0.0, %v163_v30  ;;  %6872 = vmatpush1.bf16.msra.mxu0 %v7912_v29 }
 0x2f2   :  { %6880 = vmatprep.subr.bf16.mxu0 %v9282_v0 }
 0x2f3   :  { %v7841_v34 = vadd.f32 %v681_v31, %v7836_v32  ;;  %v9284_v31 = vmov 0.0  }
 0x2f4   :  { %969 = vmatprep.mubr.f32.mxu0 %v9284_v31 }
 0x2f5   :  { %v698_v37 = vsel %vm688_vm4, %v7841_v34, -inf }
 0x308   :  { %453 = vadd.xlane.f32.xlu0 %v452_v35 }
 0x30c   :  { %699 = vmax.xlane.f32.xlu0 %v698_v37 }
 0x30e   :  { %450 = vadd.xlane.f32.xlu1 %v449_v38 }
 0x317   :  { %v718_v53 = vpop.xlane.xlu0 %717 }
 0x318   :  { %v715_v40 = vpop.xlane.xlu1 %714  ;;  %7416 = vrcp.f32 %v718_v53 }
 0x319   :  { %7418 = vrcp.f32 %v715_v40 }
 0x31a   :  { %7420 = vlog2.f32 %v138_v49  ;;  %v758_v49 = vld [vmem:[%s7929_s25] sm:$0xff] }
 0x322   :  { %v7417_v41 = vpop.eup %7416 }
 0x323   :  { %v7419_v42 = vpop.eup %7418  ;;  %v728_v43 = vmul.f32 %v7417_v41, %v7819_v55 }
 0x324   :  { %v726_v26 = vmul.f32 %v7419_v42, %v7821_v56  ;;  %v7421_v50 = vpop.eup %7420 }
 0x325   :  { %v145_v51 = vmul.f32 0.6931472, %v7421_v50 }
 0x327   :  { %v150_v54 = vsub.f32 0.0, %v145_v51 }
 0x329   :  { %v154_v58 = vadd.f32 1e-20, %v150_v54 }
 0x32b   :  { %7422 = vlog2.f32 %v154_v58 }
 0x335   :  { %v7423_v4 = vpop.eup %7422 }
 0x336   :  { %v161_v5 = vmul.f32 0.6931472, %v7423_v4 }
 0x368   :  { %v741_v44 = vpop.permute.xlu0 %740 }
 0x369   :  { %v754_v47 = vmul.f32 %v741_v44, %v728_v43  ;;  %v736_v45 = vpop.permute.xlu1 %735 }
 0x36a   :  { %v753_v46 = vmul.f32 %v736_v45, %v726_v26 }
 0x36c   :  { %6347 = vmatprep.mubr.msk.f32.mxu1 %vm688_vm4, %v753_v46 }
 0x36d   :  { %6348 = vmatmul.mubr.msk.f32.vlgmr.msra.gmra.mrb[12].mxu1 %vm688_vm4, %v754_v47 }
 0x395   :  { %v454_v52 = vpop.xlane.xlu0 %453 }
 0x396   :  { %v7857_v57 = vadd.f32 %v7789_v59, %v454_v52 }
 0x398   :  { %v496_v56 = vmul.f32 %v7857_v57, %v7857_v57 }
 0x399   :  { %v700_v30 = vpop.xlane.xlu0 %699 }
 0x39a   :  { %v498_v1 = vsel %vm468_vm3, %v496_v56, 0.0  ;;  %v704_v33 = vsub.f32 %v7841_v34, %v700_v30 }
 0x39b   :  { %v451_v55 = vpop.xlane.xlu1 %450 }
 0x39c   :  { %v7862_v60 = vadd.f32 %v7789_v59, %v451_v55  ;;  %v166_v59 = vsub.f32 0.0, %v161_v5  ;;  %v711_v35 = vmul.f32 1.442695, %v704_v33  ;;  %v859_v55 = vld [vmem:[%s7936_s29] sm:$0x1] }
 0x39e   :  { %v495_v61 = vmul.f32 %v7862_v60, %v7862_v60  ;;  %7424 = vpow2.f32 %v711_v35  ;;  %v686_v37 = vadd.f32 %v676_v36, %v166_v59 }
 0x3a0   :  { %v497_v63 = vsel %vm468_vm3, %v495_v61, 0.0  ;;  %v695_v38 = vsel %vm688_vm4, %v686_v37, -inf }
 0x3a1   :  { %v499_v3 = vadd.f32 %v498_v1, %v497_v63 }
 0x3a3   :  { %500 = vadd.xlane.f32.xlu1 %v499_v3 }
 0x3a8   :  { %v7922_v53 = vpop.eup %7424 }
 0x3a9   :  { %v722_v40 = vsel %vm688_vm4, %v7922_v53, 0.0 }
 0x3b4   :  { %176 = vrot.lane.b32.xlu1 %v166_v59, %s7606_s4 }
 0x3b8   :  { %178 = vrot.lane.b32.xlu1 %v7836_v32, %s7606_s4 }
 0x3dc   :  { %696 = vmax.xlane.f32.xlu1 %v695_v38 }
 0x3e0   :  { %723 = vadd.xlane.f32.xlu1 %v722_v40 }
 0x430   :  { %v501_v41 = vpop.xlane.xlu1 %500 }
 0x431   :  { %v502_v42 = vrot.slane %v501_v41, 4 }
 0x433   :  { %v503_v43 = vadd.f32 %v502_v42, %v501_v41 }
 0x434   :  { %v177_v44 = vpop.permute.xlu1 %176 }
 0x435   :  { %v504_v34 = vrot.slane %v503_v43, 2  ;;  %v186_v26 = vsub.f32 %v166_v59, %v177_v44 }
 0x437   :  { %v505_v47 = vadd.f32 %v504_v34, %v503_v43  ;;  %539 = vrot.lane.b32.xlu0 %v186_v26, %s7608_s9  ;;  %v888_v43 = vlaneseq  ;;  %v886_v26 = vld [vmem:[%s7969_s6] sm:$0x3] }
 0x438   :  { %v179_v19 = vpop.permute.xlu1 %178 }
 0x439   :  { %v506_v39 = vrot.slane %v505_v47, 1  ;;  %v187_v45 = vsub.f32 %v7836_v32, %v179_v19  ;;  %v889_v44 = vshrl.u32 %v888_v43, 7 }
 0x43b   :  { %v507_v46 = vadd.f32 %v506_v39, %v505_v47  ;;  %541 = vrot.lane.b32.xlu0 %v187_v45, %s7608_s9  ;;  %v7971_v34 = vsub.s32 0, %v889_v44  ;;  %v7974_v47 = vsub.s32 1, %v889_v44  ;;  %s7620_s9 = smov 96  }
 0x43d   :  { %7281 = vpush %v507_v46  ;;  %v7977_v39 = vrot.slane %v886_v26, %v7971_v34  ;;  %v7980_v46 = vrot.slane %v886_v26, %v7974_v47 }
 0x440   :  { %v6349_v50 = vpop.f32.mrb[12].mxu1 }
 0x441   :  { %v840_v51 = vpop.f32.mrb[13].mxu1  ;;  %v846_v52 = vadd.f32 %v6349_v50, %v759_v48 }
 0x442   :  { %v841_v54 = vadd.f32 %v840_v51, %v758_v49 }
 0x443   :  { %v7942_v58 = vrot.slane %v846_v52, 7 }
 0x444   :  { %v863_v32 = vrot.slane %v841_v54, 7 }
 0x446   :  { %v7945_v56 = vsel %vm862_vm7, %v859_v55, %v863_v32  ;;  %v7952_v61 = vsel %vm862_vm7, %v863_v32, %v7942_v58 }
 0x447   :  { %5747 = vmatmul.mubr.msk.f32.vlgmr.msra.gmra.mrb[8].mxu0 %vm224_vm0, %v7945_v56 }
 0x448   :  { %975 = vmatprep.mubr.f32.mxu0 %v9284_v31 }
 0x44b   :  { %5748 = vmatmul.mubr.msk.f32.gmra.mrb[10].mxu0 %vm224_vm0, %v7952_v61 }
 0x44c   :  { %981 = vmatprep.mubr.f32.mxu0 %v9284_v31 }
 0x44f   :  { %5749 = vmatmul.mubr.msk.f32.gmra.mrb[12].mxu0 %vm224_vm0, %v7942_v58 }
 0x450   :  { %6389 = vmatprep.mubr.msk.f32.mxu0 %vm7618_vm10, %v9284_v31 }
 0x469   :  { %v697_v63 = vpop.xlane.xlu1 %696 }
 0x46a   :  { %v703_v1 = vsub.f32 %v686_v37, %v697_v63 }
 0x46c   :  { %v709_v3 = vmul.f32 1.442695, %v703_v1 }
 0x46e   :  { %7426 = vpow2.f32 %v709_v3  ;;  %s7282_s30 = spop %7281 }
 0x46f   :  { %v509_v4 = vstv %s7282_s30  ;;  %s5722_s30 = sld [smem:[%s9281_s0 + %s7637_s26]]  }
 0x470   :  { %7428 = vrsqrt.f32 %v509_v4  ;;  %vm512_vm8 = vcmp.eq.f32.partialorder %v509_v4, inf  ;;  %v515_v8 = vand.u32 2147483648, %v509_v4  ;;  %vm514_vm9 = vcmp.eq.f32.partialorder %v509_v4, 0.0 }
 0x478   :  { %v7959_v5 = vpop.eup %7426 }
 0x479   :  { %v719_v59 = vsel %vm688_vm4, %v7959_v5, 0.0 }
 0x47a   :  { %v7429_v6 = vpop.eup %7428  ;;  %720 = vadd.xlane.f32.xlu0 %v719_v59 }
 0x47b   :  { %v511_v7 = vmul.f32 %v7429_v6, %v509_v4  ;;  %v724_v6 = vpop.xlane.xlu1 %723 }
 0x47d   :  { %v513_v10 = vsel %vm512_vm8, %v509_v4, %v511_v7 }
 0x47e   :  { %v516_v11 = vsel %vm514_vm9, %v515_v8, %v513_v10 }
 0x47f   :  { %7283 = vpush %v516_v11 }
 0x4a9   :  { %v540_v15 = vpop.permute.xlu0 %539 }
 0x4ad   :  { %v542_v23 = vpop.permute.xlu0 %541 }
 0x4b0   :  { %s7284_s1 = spop %7283 }
 0x4b1   :  { %s518_s2 = smax.f32 %s7610_s12, %s7284_s1  ;;  %s5721_s12 = sld [smem:[%s9281_s0 + %s7634_s5]]  }
 0x4b2   :  { %v519_v12 = vstv %s518_s2  ;;  %s8285_s2 = sld [smem:[%s9281_s0 + %s7625_s28]]   ;;  %s7638_s1 = smov 31  }
 0x4b3   :  { %7430 = vrcp.f32 %v519_v12  ;;  %s8419_s28 = sld [smem:[%s9281_s0 + %s7629_s23]]  }
 0x4bd   :  { %v7431_v16 = vpop.eup %7430 }
 0x4be   :  { %v521_v2 = vmul.f32 %v7431_v16, %v7862_v60  ;;  %v522_v18 = vmul.f32 %v7431_v16, %v7857_v57 }
 0x4c0   :  { %v525_v20 = vmul.f32 2.0, %v521_v2  ;;  %v526_v21 = vmul.f32 2.0, %v522_v18 }
 0x4c2   :  { %v5736_v24 = vadd.f32 -1.0, %v525_v20  ;;  %v5737_v27 = vadd.f32 -1.0, %v526_v21 }
 0x4c4   :  { %v549_v28 = vadd.f32 %v5736_v24, %v540_v15  ;;  %v550_v30 = vadd.f32 %v5737_v27, %v542_v23 }
 0x4c6   :  { %v553_v33 = vsub.f32 0.0, %v549_v28  ;;  %v554_v35 = vsub.f32 0.0, %v550_v30 }
 0x4c8   :  { %v559_v36 = vmul.f32 1.442695, %v553_v33  ;;  %v561_v37 = vmul.f32 1.442695, %v554_v35 }
 0x4ca   :  { %7432 = vpow2.f32 %v559_v36 }
 0x4cb   :  { %7434 = vpow2.f32 %v561_v37 }
 0x4d4   :  { %v7433_v38 = vpop.eup %7432 }
 0x4d5   :  { %v7435_v40 = vpop.eup %7434  ;;  %v565_v41 = vadd.f32 1.0, %v7433_v38 }
 0x4d6   :  { %v566_v60 = vadd.f32 1.0, %v7435_v40 }
 0x4d7   :  { %7436 = vrcp.f32 %v565_v41 }
 0x4d8   :  { %7438 = vrcp.f32 %v566_v60 }
 0x4e1   :  { %v7437_v57 = vpop.eup %7436 }
 0x4e2   :  { %745 = vperm.xlu1 %7326, %v7437_v57   ;;  %v7439_v42 = vpop.eup %7438 }
 0x4e6   :  { %750 = vperm.xlu1 %7326, %v7439_v42  }
 0x507   :  { %v721_v59 = vpop.xlane.xlu0 %720 }
 0x508   :  { %7440 = vrcp.f32 %v721_v59 }
 0x509   :  { %7442 = vrcp.f32 %v724_v6 }
 0x512   :  { %v7441_v7 = vpop.eup %7440 }
 0x513   :  { %v730_v8 = vmul.f32 %v7441_v7, %v7959_v5  ;;  %v7443_v10 = vpop.eup %7442 }
 0x514   :  { %v732_v15 = vmul.f32 %v7443_v10, %v7922_v53 }
 0x51a   :  { %v971_v19 = vpop.f32.mrb[8].mxu0 }
 0x51b   :  { %v973_v45 = vpop.f32.mrb[9].mxu0  ;;  %v972_v49 = vadd.f32 %v971_v19, %v7977_v39 }
 0x51c   :  { %v7985_v52 = vadd.f32 %v973_v45, %v7980_v46 }
 0x51e   :  { %v977_v48 = vpop.f32.mrb[10].mxu0 }
 0x51f   :  { %v978_v50 = vadd.f32 %v977_v48, %v7977_v39  ;;  %v979_v51 = vpop.f32.mrb[11].mxu0 }
 0x520   :  { %v7988_v54 = vadd.f32 %v979_v51, %v7980_v46 }
 0x521   :  { %v7328_v55 = vpack.i.bf16 %v978_v50, %v972_v49 }
 0x522   :  { %v7338_v32 = vpack.i.bf16 %v7988_v54, %v7985_v52  ;;  %v6878_v63 = vpack.c.bf16 %v7988_v54, %v7985_v52  ;;  %v983_v1 = vpop.f32.mrb[12].mxu0 }
 0x523   :  { %v984_v3 = vadd.f32 %v983_v1, %v7977_v39  ;;  %v985_v4 = vpop.f32.mrb[13].mxu0  ;;  %7329 = vrot.lane.b32.xlu1 %v7328_v55, %s7617_s7 }
 0x524   :  { %v8030_v36 = vadd.f32 %v985_v4, %v7980_v46 }
 0x525   :  { %1003 = vrot.lane.b32.xlu0 %v984_v3, %s7617_s7 }
 0x527   :  { %7334 = vrot.lane.b32.xlu1 %v7328_v55, %s7619_s8 }
 0x52b   :  { %1237 = vrot.lane.b32.xlu1 %v984_v3, %s7619_s8 }
 0x52f   :  { %1227 = vrot.lane.b32.xlu1 %v972_v49, %s7620_s9 }
 0x533   :  { %1229 = vrot.lane.b32.xlu1 %v978_v50, %s7620_s9 }
 0x537   :  { %1231 = vrot.lane.b32.xlu1 %v984_v3, %s7620_s9 }
 0x561   :  { %v746_v11 = vpop.permute.xlu1 %745 }
 0x562   :  { %v755_v12 = vmul.f32 %v746_v11, %v730_v8 }
 0x564   :  { %6350 = vmatprep.mubr.msk.f32.mxu1 %vm688_vm4, %v755_v12 }
 0x565   :  { %v751_v16 = vpop.permute.xlu1 %750 }
 0x566   :  { %v756_v2 = vmul.f32 %v751_v16, %v732_v15 }
 0x568   :  { %6351 = vmatmul.mubr.msk.f32.gmra.mrb[14].mxu1 %vm688_vm4, %v756_v2 }
 0x569   :  { %6359 = vmatprep.mubr.msk.f32.mxu1 %vm7618_vm10, %v9284_v31 }
 0x595   :  { %v7330_v18 = vpop.permute.xlu1 %7329 }
 0x596   :  { %v7332_v20 = vunpack.i.h.bf16 %v7330_v18  ;;  %v7331_v21 = vunpack.i.l.bf16 %v7330_v18 }
 0x597   :  { %v1004_v33 = vpop.permute.xlu0 %1003 }
 0x598   :  { %v6874_v23 = vpack.c.bf16 %v7332_v20, %v7331_v21 }
 0x599   :  { %v7335_v24 = vpop.permute.xlu1 %7334 }
 0x59a   :  { %v7337_v27 = vunpack.i.h.bf16 %v7335_v24  ;;  %v7336_v53 = vunpack.i.l.bf16 %v7335_v24  ;;  %6876 = vmatpush3.bf16.xpose.msk.msra.mxu1 %vm8012_vm11, %v6874_v23 }
 0x59b   :  { %6357 = vmatprep.subr.mxu1 %v9284_v31 }
 0x59c   :  { %v6881_v28 = vpack.c.bf16 %v7337_v27, %v7336_v53 }
 0x59d   :  { %v1238_v30 = vpop.permute.xlu1 %1237 }
 0x59e   :  { %6883 = vmatpush3.bf16.xpose.msk.msra.mxu0 %vm8012_vm11, %v6881_v28 }
 0x59f   :  { %6387 = vmatprep.subr.mxu0 %v9284_v31 }
 0x5a1   :  { %v1228_v35 = vpop.permute.xlu1 %1227 }
 0x5a2   :  { %6358 = vmatpush3.xpose.msk.msra.mxu1 %vm586_vm1, %v1004_v33 }
 0x5a3   :  { %6877 = vmatprep.subr.bf16.mxu1 %v9282_v0 }
 0x5a5   :  { %6360 = vmatmul.mubr.msk.f32.vlgmr.msra.gmra.mrb[16].mxu1 %vm586_vm1, %v972_v49  ;;  %v1230_v37 = vpop.permute.xlu1 %1229 }
 0x5a6   :  { %6879 = vmatpush3.bf16.msra.mxu1 %v6878_v63  ;;  %6388 = vmatpush3.xpose.msk.msra.mxu0 %vm586_vm1, %v1238_v30 }
 0x5a7   :  { %6362 = vmatprep.mubr.msk.f32.mxu1 %vm7618_vm10, %v9284_v31  ;;  %6372 = vmatprep.subr.mxu1 %v9284_v31 }
 0x5a8   :  { %6887 = vmatprep.subr.bf16.mxu0 %v9282_v0 }
 0x5a9   :  { %6363 = vmatmul.mubr.msk.f32.gmra.mrb[18].mxu1 %vm586_vm1, %v978_v50  ;;  %6390 = vmatmul.mubr.msk.f32.vlgmr.msra.gmra.mrb[14].mxu0 %vm586_vm1, %v1228_v35  ;;  %v1232_v38 = vpop.permute.xlu1 %1231 }
 0x5aa   :  { %6373 = vmatpush3.msk.msra.mxu1 %vm862_vm7, %v8030_v36  ;;  %6365 = vmatprep.mubr.msk.f32.mxu1 %vm7618_vm10, %v9284_v31 }
 0x5ab   :  { %6392 = vmatprep.mubr.msk.f32.mxu0 %vm7618_vm10, %v9284_v31  ;;  %6884 = vmatprep.subr.bf16.mxu1 %v9282_v0 }
 0x5ad   :  { %6366 = vmatmul.mubr.msk.f32.gmra.mrb[20].mxu1 %vm586_vm1, %v984_v3  ;;  %6393 = vmatmul.mubr.msk.f32.gmra.mrb[16].mxu0 %vm586_vm1, %v1230_v37 }
 0x5ae   :  { %6395 = vmatprep.mubr.msk.f32.mxu0 %vm7618_vm10, %v9284_v31  ;;  %6374 = vmatprep.mubr.msk.f32.mxu1 %vm7618_vm10, %v9284_v31 }
 0x5b1   :  { %6396 = vmatmul.mubr.msk.f32.gmra.mrb[18].mxu0 %vm586_vm1, %v1232_v38 }
 0x5b2   :  { %6421 = vmatprep.mubr.msk.f32.mxu0 %vm7618_vm10, %v9284_v31 }
 0x63b   :  { %v8051_v40 = vpop.f32.mrb[14].mxu1 }
 0x63c   :  { %v8053_v41 = vpop.f32.mrb[15].mxu1 }
 0x678   :  { %v1083_v60 = vpop.f32.mrb[16].mxu1 }
 0x679   :  { %v1097_v57 = vmul.f32 0.17677669, %v1083_v60  ;;  %v6361_v42 = vpop.f32.mrb[17].mxu1 }
 0x67b   :  { %v1101_v43 = vsel %vm1100_vm12, %v1097_v57, -inf }
 0x67c   :  { %v1317_v44 = vpop.f32.mrb[14].mxu0  ;;  %1102 = vmax.xlane.f32.xlu0 %v1101_v43  ;;  %v1088_v26 = vpop.f32.mrb[18].mxu1 }
 0x67d   :  { %v1098_v19 = vmul.f32 0.17677669, %v1088_v26  ;;  %v6364_v45 = vpop.f32.mrb[19].mxu1  ;;  %v6391_v48 = vpop.f32.mrb[15].mxu0  ;;  %v1331_v4 = vmul.f32 0.17677669, %v1317_v44 }
 0x67f   :  { %v1104_v49 = vsel %vm1100_vm12, %v1098_v19, -inf  ;;  %v1334_v11 = vsel %vm1100_vm12, %v1331_v4, -inf }
 0x680   :  { %v1322_v50 = vpop.f32.mrb[16].mxu0  ;;  %1105 = vmax.xlane.f32.xlu1 %v1104_v49  ;;  %v1093_v51 = vpop.f32.mrb[20].mxu1 }
 0x681   :  { %v1332_v55 = vmul.f32 0.17677669, %v1322_v50  ;;  %v1099_v63 = vmul.f32 0.17677669, %v1093_v51  ;;  %v6367_v1 = vpop.f32.mrb[21].mxu1  ;;  %v6394_v3 = vpop.f32.mrb[17].mxu0 }
 0x683   :  { %v1337_v59 = vsel %vm1100_vm12, %v1332_v55, -inf  ;;  %v1108_v6 = vsel %vm1107_vm13, %v1099_v63, -inf }
 0x684   :  { %v1327_v7 = vpop.f32.mrb[18].mxu0  ;;  %1338 = vmax.xlane.f32.xlu1 %v1337_v59  ;;  %1109 = vmax.xlane.f32.xlu0 %v1108_v6 }
 0x685   :  { %v6397_v8 = vpop.f32.mrb[19].mxu0  ;;  %v1333_v10 = vmul.f32 0.17677669, %v1327_v7 }
 0x687   :  { %v1340_v12 = vsel %vm1107_vm13, %v1333_v10, -inf }
 0x688   :  { %1335 = vmax.xlane.f32.xlu0 %v1334_v11 }
 0x68c   :  { %1341 = vmax.xlane.f32.xlu0 %v1340_v12 }
 0x709   :  { %v1103_v15 = vpop.xlane.xlu0 %1102 }
 0x70a   :  { %v1111_v16 = vsub.f32 %v1097_v57, %v1103_v15 }
 0x70c   :  { %v1114_v2 = vmul.f32 1.442695, %v1111_v16 }
 0x70d   :  { %v1106_v18 = vpop.xlane.xlu1 %1105 }
 0x70e   :  { %7444 = vpow2.f32 %v1114_v2  ;;  %v1112_v27 = vsub.f32 %v1098_v19, %v1106_v18  ;;  %v988_v18 = vld [vmem:[%s8083_s13] sm:$0xff] }
 0x710   :  { %v1116_v37 = vmul.f32 1.442695, %v1112_v27  ;;  %v990_v27 = vld [vmem:[%s8083_s13 + $0x10] sm:$0xff] }
 0x711   :  { %v1339_v20 = vpop.xlane.xlu1 %1338  ;;  %v1110_v21 = vpop.xlane.xlu0 %1109 }
 0x712   :  { %v1344_v23 = vsub.f32 %v1332_v55, %v1339_v20  ;;  %v1113_v24 = vsub.f32 %v1099_v63, %v1110_v21  ;;  %v989_v20 = vld [vmem:[%s8083_s13 + $0x8] sm:$0xff] }
 0x714   :  { %v1348_v53 = vmul.f32 1.442695, %v1344_v23  ;;  %v1118_v28 = vmul.f32 1.442695, %v1113_v24  ;;  %v8095_v23 = vpack.c.bf16 %v989_v20, %v988_v18 }
 0x715   :  { %v1336_v30 = vpop.xlane.xlu0 %1335 }
 0x716   :  { %7446 = vpow2.f32 %v1348_v53  ;;  %v1343_v33 = vsub.f32 %v1331_v4, %v1336_v30  ;;  %v991_v53 = vld [vmem:[%s8083_s13 + $0x18] sm:$0xff] }
 0x717   :  { %7448 = vpow2.f32 %v1118_v28  ;;  %v8103_v30 = vpack.c.bf16 %v991_v53, %v990_v27 }
 0x718   :  { %v7445_v35 = vpop.eup %7444  ;;  %v1346_v38 = vmul.f32 1.442695, %v1343_v33 }
 0x719   :  { %v1342_v60 = vpop.xlane.xlu0 %1341  ;;  %v1120_v57 = vsel %vm1100_vm12, %v7445_v35, 0.0 }
 0x71a   :  { %7450 = vpow2.f32 %v1346_v38  ;;  %v1345_v42 = vsub.f32 %v1333_v10, %v1342_v60  ;;  %1121 = vadd.xlane.f32.xlu1 %v1120_v57  ;;  %v992_v38 = vld [vmem:[%s8083_s13 + $0x20] sm:$0xff]  ;;  %v993_v60 = vld [vmem:[%s8083_s13 + $0x28] sm:$0xff] }
 0x71b   :  { %7452 = vpow2.f32 %v1116_v37  ;;  %v8116_v57 = vpack.c.bf16 %v993_v60, %v992_v38 }
 0x71c   :  { %v1350_v43 = vmul.f32 1.442695, %v1345_v42  ;;  %v994_v42 = vld [vmem:[%s8083_s13 + $0x30] sm:$0xff] }
 0x71d   :  { %6889 = vmatpush3.bf16.msra.mxu0 %v8116_v57 }
 0x71e   :  { %7454 = vpow2.f32 %v1350_v43  ;;  %6890 = vmatprep.subr.bf16.mxu0 %v9282_v0  ;;  %v995_v43 = vld [vmem:[%s8083_s13 + $0x38] sm:$0xff] }
 0x720   :  { %v8062_v44 = vpop.eup %7446 }
 0x721   :  { %v1355_v26 = vsel %vm1100_vm12, %v8062_v44, 0.0  ;;  %v7449_v19 = vpop.eup %7448 }
 0x722   :  { %1356 = vadd.xlane.f32.xlu1 %v1355_v26  ;;  %v1126_v48 = vsel %vm1107_vm13, %v7449_v19, 0.0 }
 0x724   :  { %v7451_v45 = vpop.eup %7450 }
 0x725   :  { %v1352_v49 = vsel %vm1100_vm12, %v7451_v45, 0.0  ;;  %v7453_v50 = vpop.eup %7452 }
 0x726   :  { %1127 = vadd.xlane.f32.xlu1 %v1126_v48  ;;  %1353 = vadd.xlane.f32.xlu0 %v1352_v49  ;;  %v1123_v51 = vsel %vm1100_vm12, %v7453_v50, 0.0 }
 0x728   :  { %v7455_v55 = vpop.eup %7454 }
 0x729   :  { %v1358_v63 = vsel %vm1107_vm13, %v7455_v55, 0.0 }
 0x72a   :  { %1124 = vadd.xlane.f32.xlu0 %v1123_v51 }
 0x72e   :  { %1359 = vadd.xlane.f32.xlu0 %v1358_v63 }
 0x737   :  { %7339 = vrot.lane.b32.xlu1 %v7338_v32, %s7620_s9 }
 0x744   :  { %1373 = vrot.lane.b32.xlu0 %v8030_v36, %s7620_s9 }
 0x7a7   :  { %v1122_v1 = vpop.xlane.xlu1 %1121 }
 0x7a8   :  { %7456 = vrcp.f32 %v1122_v1 }
 0x7af   :  { %v1357_v3 = vpop.xlane.xlu1 %1356 }
 0x7b2   :  { %v7457_v4 = vpop.eup %7456 }
 0x7b3   :  { %v1130_v59 = vmul.f32 %v7457_v4, %v7445_v35  ;;  %v1128_v6 = vpop.xlane.xlu1 %1127  ;;  %v1354_v7 = vpop.xlane.xlu0 %1353 }
 0x7b5   :  { %6375 = vmatmul.mubr.msk.f32.vlgmr.msra.gmra.mrb[22].mxu1 %vm1100_vm12, %v1130_v59 }
 0x7b6   :  { %6377 = vmatprep.mubr.msk.f32.mxu1 %vm7618_vm10, %v9284_v31 }
 0x7b7   :  { %v7340_v8 = vpop.permute.xlu1 %7339  ;;  %v1125_v10 = vpop.xlane.xlu0 %1124 }
 0x7b8   :  { %v7342_v11 = vunpack.i.h.bf16 %v7340_v8  ;;  %v7341_v52 = vunpack.i.l.bf16 %v7340_v8  ;;  %7458 = vrcp.f32 %v1125_v10 }
 0x7b9   :  { %7460 = vrcp.f32 %v1128_v6 }
 0x7ba   :  { %v6885_v54 = vpack.c.bf16 %v7342_v11, %v7341_v52  ;;  %7462 = vrcp.f32 %v1354_v7 }
 0x7bb   :  { %v1360_v32 = vpop.xlane.xlu0 %1359  ;;  %7464 = vrcp.f32 %v1357_v3 }
 0x7bc   :  { %6886 = vmatpush3.bf16.msra.mxu1 %v6885_v54  ;;  %7466 = vrcp.f32 %v1360_v32  ;;  %v5776_v54 = vld [vmem:[%s8143_s17] ss:$0 sm:$0xff] }
 0x7bd   :  { %6402 = vmatprep.subr.mxu1 %v9284_v31 }
 0x7bf   :  { %v1374_v36 = vpop.permute.xlu0 %1373 }
 0x7c0   :  { %6403 = vmatpush3.msk.msra.mxu1 %vm862_vm7, %v1374_v36 }
 0x7c1   :  { %6893 = vmatprep.subr.bf16.mxu1 %v9282_v0 }
 0x7c2   :  { %v7459_v12 = vpop.eup %7458 }
 0x7c3   :  { %v1132_v15 = vmul.f32 %v7459_v12, %v7453_v50  ;;  %v7461_v16 = vpop.eup %7460 }
 0x7c4   :  { %v1134_v2 = vmul.f32 %v7461_v16, %v7449_v19  ;;  %v7463_v21 = vpop.eup %7462 }
 0x7c5   :  { %6378 = vmatmul.mubr.msk.f32.gmra.mrb[24].mxu1 %vm1100_vm12, %v1132_v15  ;;  %v1362_v24 = vmul.f32 %v7463_v21, %v7451_v45  ;;  %v7465_v28 = vpop.eup %7464 }
 0x7c6   :  { %6380 = vmatprep.mubr.msk.f32.mxu1 %vm7618_vm10, %v9284_v31  ;;  %v1364_v33 = vmul.f32 %v7465_v28, %v8062_v44  ;;  %v7467_v35 = vpop.eup %7466  ;;  %v8122_v44 = vpack.c.bf16 %v995_v43, %v994_v42 }
 0x7c7   :  { %v1366_v37 = vmul.f32 %v7467_v35, %v7455_v55 }
 0x7c8   :  { %6892 = vmatpush3.bf16.msra.mxu0 %v8122_v44 }
 0x7c9   :  { %6381 = vmatmul.mubr.msk.f32.gmra.mrb[26].mxu1 %vm1100_vm12, %v1134_v2 }
 0x7ca   :  { %6404 = vmatprep.mubr.msk.f32.mxu1 %vm7618_vm10, %v9284_v31 }
 0x7cd   :  { %6405 = vmatmul.mubr.msk.f32.vlgmr.msra.gmra.mrb[28].mxu1 %vm1100_vm12, %v1362_v24 }
 0x7ce   :  { %6407 = vmatprep.mubr.msk.f32.mxu1 %vm7618_vm10, %v9284_v31  ;;  %6895 = vmatpush3.bf16.msra.mxu1 %v8095_v23 }
 0x7cf   :  { %6896 = vmatprep.subr.bf16.mxu1 %v9282_v0 }
 0x7d1   :  { %6408 = vmatmul.mubr.msk.f32.gmra.mrb[30].mxu1 %vm1100_vm12, %v1364_v33 }
 0x7d2   :  { %6410 = vmatprep.mubr.msk.f32.mxu1 %vm7618_vm10, %v9284_v31  ;;  %6898 = vmatpush3.bf16.msra.mxu1 %v8103_v30 }
 0x7d5   :  { %6411 = vmatmul.mubr.msk.f32.gmra.mrb[32].mxu1 %vm1100_vm12, %v1366_v37 }
 0x7d6   :  { %6438 = vmatprep.mubr.msk.f32.mxu1 %vm7618_vm10, %v9284_v31 }
 0x888   :  { %v1213_v26 = vpop.f32.mrb[22].mxu1 }
 0x889   :  { %v6376_v19 = vpop.f32.mrb[23].mxu1  ;;  %6439 = vmatmul.mubr.msk.f32.vlgmr.msra.gmra.mrb[34].mxu1 %vm586_vm1, %v1213_v26 }
 0x88a   :  { %6441 = vmatprep.mubr.msk.f32.mxu1 %vm7618_vm10, %v9284_v31 }
 0x898   :  { %v1218_v45 = vpop.f32.mrb[24].mxu1 }
 0x899   :  { %v6379_v48 = vpop.f32.mrb[25].mxu1  ;;  %6442 = vmatmul.mubr.msk.f32.gmra.mrb[36].mxu1 %vm586_vm1, %v1218_v45 }
 0x89a   :  { %6444 = vmatprep.mubr.msk.f32.mxu1 %vm7618_vm10, %v9284_v31 }
 0x89c   :  { %v1223_v49 = vpop.f32.mrb[26].mxu1 }
 0x89d   :  { %v6382_v50 = vpop.f32.mrb[27].mxu1  ;;  %6445 = vmatmul.mubr.msk.f32.gmra.mrb[38].mxu1 %vm586_vm1, %v1223_v49 }
 0x8a0   :  { %v1454_v51 = vpop.f32.mrb[28].mxu1 }
 0x8a1   :  { %v6406_v55 = vpop.f32.mrb[29].mxu1  ;;  %6422 = vmatmul.mubr.msk.f32.vlgmr.msra.gmra.mrb[20].mxu0 %vm586_vm1, %v1454_v51 }
 0x8a2   :  { %6424 = vmatprep.mubr.msk.f32.mxu0 %vm7618_vm10, %v9284_v31 }
 0x8a4   :  { %v1459_v63 = vpop.f32.mrb[30].mxu1 }
 0x8a5   :  { %v6409_v1 = vpop.f32.mrb[31].mxu1  ;;  %6425 = vmatmul.mubr.msk.f32.gmra.mrb[22].mxu0 %vm586_vm1, %v1459_v63 }
 0x8a6   :  { %6427 = vmatprep.mubr.msk.f32.mxu0 %vm7618_vm10, %v9284_v31  ;;  %v1721_v1 = vld [vmem:[%s8170_s22 + $0x8] sm:$0xff] }
 0x8a8   :  { %v1464_v3 = vpop.f32.mrb[32].mxu1 }
 0x8a9   :  { %v6412_v4 = vpop.f32.mrb[33].mxu1  ;;  %6428 = vmatmul.mubr.msk.f32.gmra.mrb[24].mxu0 %vm586_vm1, %v1464_v3  ;;  %v1723_v3 = vld [vmem:[%s8170_s22 + $0x18] sm:$0xff] }
 0x8aa   :  { %1821 = vmatprep.mubr.f32.mxu0 %v9284_v31  ;;  %v8174_v4 = vpack.c.bf16 %v1723_v3, %v1721_v1  ;;  %v1851_v1 = vld [vmem:[%s8215_s27 + $0x28] sm:$0xff]  ;;  %v1868_v3 = vld [vmem:[%s8215_s27 + $0xb0] sm:$0xff] }
 0x8ac   :  { %6900 = vmatprep.subr.bf16.mxu0 %v8174_v4 }
 0x95c   :  { %v1632_v59 = vpop.f32.mrb[34].mxu1 }
 0x95d   :  { %v6440_v6 = vpop.f32.mrb[35].mxu1 }
 0x95e   :  { %v1722_v6 = vld [vmem:[%s8170_s22 + $0x10] sm:$0xff] }
 0x96c   :  { %v1637_v7 = vpop.f32.mrb[36].mxu1 }
 0x96d   :  { %v6443_v8 = vpop.f32.mrb[37].mxu1 }
 0x96e   :  { %v1725_v8 = vld [vmem:[%s8170_s22 + $0x28] sm:$0xff] }
 0x970   :  { %v1642_v10 = vpop.f32.mrb[38].mxu1 }
 0x971   :  { %v6446_v11 = vpop.f32.mrb[39].mxu1 }
 0x974   :  { %v1543_v52 = vpop.f32.mrb[20].mxu0 }
 0x975   :  { %v1633_v32 = vadd.f32 %v1632_v59, %v1543_v52  ;;  %v6423_v36 = vpop.f32.mrb[21].mxu0  ;;  %v1720_v59 = vld [vmem:[%s8170_s22] sm:$0xff] }
 0x976   :  { %v1724_v52 = vld [vmem:[%s8170_s22 + $0x20] sm:$0xff]  ;;  %v1729_v36 = vld [vmem:[%s8170_s22 + $0x48] sm:$0xff] }
 0x977   :  { %v1653_v12 = vadd.f32 %v5776_v54, %v1633_v32 }
 0x978   :  { %v1548_v15 = vpop.f32.mrb[22].mxu0 }
 0x979   :  { %v1638_v16 = vadd.f32 %v1637_v7, %v1548_v15  ;;  %v6426_v2 = vpop.f32.mrb[23].mxu0  ;;  %v1656_v18 = vadd.f32 %v1653_v12, %v7945_v56  ;;  %v8178_v7 = vpack.c.bf16 %v1722_v6, %v1720_v59  ;;  %v1731_v12 = vld [vmem:[%s8170_s22 + $0x58] sm:$0xff] }
 0x97a   :  { %v8194_v15 = vpack.c.bf16 %v1731_v12, %v1729_v36  ;;  %v1730_v2 = vld [vmem:[%s8170_s22 + $0x50] sm:$0xff]  ;;  %v1869_v59 = vld [vmem:[%s8215_s27 + $0xb8] sm:$0xff]  ;;  %v1871_v36 = vld [vmem:[%s8215_s27 + $0xc8] sm:$0xff] }
 0x97b   :  { %v1654_v20 = vadd.f32 %v5776_v54, %v1638_v16  ;;  %v1661_v21 = vsel %vm224_vm0, %v1656_v18, 0.0  ;;  %6902 = vmatpush1.bf16.msra.mxu0 %v8178_v7  ;;  %v1728_v16 = vld [vmem:[%s8170_s22 + $0x40] sm:$0xff] }
 0x97c   :  { %v1553_v24 = vpop.f32.mrb[24].mxu0  ;;  %1662 = vadd.xlane.f32.xlu1 %v1661_v21  ;;  %9328 = vst [vmem:[#allocation3_spill] sm:$0xff] %v8194_v15  ;;  %v1735_v21 = vld [vmem:[%s8170_s22 + $0x78] sm:$0xff] }
 0x97d   :  { %v1643_v27 = vadd.f32 %v1642_v10, %v1553_v24  ;;  %v6429_v53 = vpop.f32.mrb[25].mxu0  ;;  %v1657_v28 = vadd.f32 %v1654_v20, %v7952_v61  ;;  %v1727_v10 = vld [vmem:[%s8170_s22 + $0x38] sm:$0xff]  ;;  %v1733_v20 = vld [vmem:[%s8170_s22 + $0x68] sm:$0xff] }
 0x97e   :  { %v8184_v11 = vpack.c.bf16 %v1727_v10, %v1725_v8  ;;  %v8204_v24 = vpack.c.bf16 %v1735_v21, %v1733_v20  ;;  %v1734_v53 = vld [vmem:[%s8170_s22 + $0x70] sm:$0xff]  ;;  %v8248_v8 = vpack.c.bf16 %v1869_v59, %v1868_v3  ;;  %v1855_v20 = vld [vmem:[%s8215_s27 + $0x48] sm:$0xff] }
 0x97f   :  { %v1655_v33 = vadd.f32 %v5776_v54, %v1643_v27  ;;  %v1664_v35 = vsel %vm224_vm0, %v1657_v28, 0.0  ;;  %v1726_v54 = vld [vmem:[%s8170_s22 + $0x30] sm:$0xff]  ;;  %v1732_v27 = vld [vmem:[%s8170_s22 + $0x60] sm:$0xff] }
 0x980   :  { %1665 = vadd.xlane.f32.xlu0 %v1664_v35  ;;  %v8188_v32 = vpack.c.bf16 %v1726_v54, %v1724_v52  ;;  %6904 = vmatprep.subr.bf16.mxu0 %v8184_v11  ;;  %9330 = vst [vmem:[#allocation5_spill] sm:$0xff] %v8204_v24  ;;  %v1863_v35 = vld [vmem:[%s8215_s27 + $0x88] sm:$0xff]  ;;  %v1852_v10 = vld [vmem:[%s8215_s27 + $0x30] sm:$0xff]  ;;  %v1853_v52 = vld [vmem:[%s8215_s27 + $0x38] sm:$0xff] }
 0x981   :  { %v1658_v37 = vadd.f32 %v1655_v33, %v7942_v58  ;;  %v1862_v33 = vld [vmem:[%s8215_s27 + $0x80] sm:$0xff]  ;;  %v8255_v12 = vpack.c.bf16 %v1853_v52, %v1852_v10  ;;  %v1872_v21 = vld [vmem:[%s8215_s27 + $0xd0] sm:$0xff] }
 0x982   :  { %6906 = vmatpush1.bf16.msra.mxu0 %v8188_v32  ;;  %v1870_v54 = vld [vmem:[%s8215_s27 + $0xc0] sm:$0xff] }
 0x983   :  { %v1668_v38 = vsel %vm1667_vm14, %v1658_v37, 0.0  ;;  %6908 = vmatprep.subr.bf16.mxu0 %v8194_v15 }
 0x984   :  { %1669 = vadd.xlane.f32.xlu1 %v1668_v38  ;;  %v8220_v38 = vpack.c.bf16 %v1863_v35, %v1862_v33  ;;  %v1856_v35 = vld [vmem:[%s8215_s27 + $0x50] sm:$0xff] }
 0x986   :  { %6916 = vmatprep.subr.bf16.mxu1 %v8220_v38 }
 0xa09   :  { %v1663_v56 = vpop.xlane.xlu1 %1662 }
 0xa0a   :  { %v1672_v60 = vmul.f32 0.015625, %v1663_v56  ;;  %v1847_v56 = vld [vmem:[%s8215_s27 + $0x8] sm:$0xff] }
 0xa0c   :  { %v8152_v42 = vsub.f32 %v1656_v18, %v1672_v60  ;;  %v8198_v18 = vpack.c.bf16 %v1730_v2, %v1728_v16  ;;  %v1864_v60 = vld [vmem:[%s8215_s27 + $0x90] sm:$0xff]  ;;  %v8258_v16 = vpack.c.bf16 %v1871_v36, %v1870_v54  ;;  %v1854_v2 = vld [vmem:[%s8215_s27 + $0x40] sm:$0xff] }
 0xa0d   :  { %v1666_v43 = vpop.xlane.xlu0 %1665  ;;  %v5777_v36 = vld [vmem:[%s8285_s2] ss:$0 sm:$0xff] }
 0xa0e   :  { %v1673_v26 = vmul.f32 0.015625, %v1666_v43  ;;  %v1678_v19 = vmul.f32 %v8152_v42, %v8152_v42  ;;  %9329 = vst [vmem:[#allocation4_spill] sm:$0xff] %v8198_v18  ;;  %6910 = vmatpush1.bf16.msra.mxu0 %v8198_v18  ;;  %v1865_v43 = vld [vmem:[%s8215_s27 + $0x98] sm:$0xff] }
 0xa0f   :  { %6912 = vmatprep.subr.bf16.mxu0 %v8204_v24 }
 0xa10   :  { %v8156_v61 = vsub.f32 %v1657_v28, %v1673_v26  ;;  %v1681_v45 = vsel %vm224_vm0, %v1678_v19, 0.0  ;;  %v8208_v28 = vpack.c.bf16 %v1734_v53, %v1732_v27  ;;  %v8227_v19 = vpack.c.bf16 %v1865_v43, %v1864_v60  ;;  %v1873_v27 = vld [vmem:[%s8215_s27 + $0xd8] sm:$0xff]  ;;  %v1875_v60 = vld [vmem:[%s8215_s27 + $0xe8] sm:$0xff] }
 0xa11   :  { %1682 = vadd.xlane.f32.xlu0 %v1681_v45  ;;  %v1670_v48 = vpop.xlane.xlu1 %1669  ;;  %v1848_v45 = vld [vmem:[%s8215_s27 + $0x10] sm:$0xff]  ;;  %v8265_v53 = vpack.c.bf16 %v1855_v20, %v1854_v2  ;;  %v8268_v33 = vpack.c.bf16 %v1873_v27, %v1872_v21  ;;  %v5778_v20 = vld [vmem:[%s8290_s10] ss:$0 sm:$0xff] }
 0xa12   :  { %v1674_v49 = vmul.f32 0.015625, %v1670_v48  ;;  %v1679_v58 = vmul.f32 %v8156_v61, %v8156_v61  ;;  %9331 = vst [vmem:[#allocation6_spill] sm:$0xff] %v8208_v28  ;;  %6914 = vmatpush1.bf16.msra.mxu0 %v8208_v28  ;;  %v1849_v48 = vld [vmem:[%s8215_s27 + $0x18] sm:$0xff] }
 0xa14   :  { %v8161_v50 = vsub.f32 %v1658_v37, %v1674_v49  ;;  %v1684_v51 = vsel %vm224_vm0, %v1679_v58, 0.0  ;;  %v1846_v37 = vld [vmem:[%s8215_s27] sm:$0xff]  ;;  %v1867_v58 = vld [vmem:[%s8215_s27 + $0xa8] sm:$0xff] }
 0xa15   :  { %1685 = vadd.xlane.f32.xlu1 %v1684_v51  ;;  %v8225_v26 = vpack.c.bf16 %v1847_v56, %v1846_v37  ;;  %v1866_v49 = vld [vmem:[%s8215_s27 + $0xa0] sm:$0xff]  ;;  %v8235_v51 = vpack.c.bf16 %v1849_v48, %v1848_v45  ;;  %v1857_v37 = vld [vmem:[%s8215_s27 + $0x58] sm:$0xff] }
 0xa16   :  { %v1680_v55 = vmul.f32 %v8161_v50, %v8161_v50  ;;  %v1874_v56 = vld [vmem:[%s8215_s27 + $0xe0] sm:$0xff]  ;;  %v8275_v43 = vpack.c.bf16 %v1857_v37, %v1856_v35 }
 0xa17   :  { %6918 = vmatpush3.bf16.msra.mxu1 %v8225_v26  ;;  %v8278_v45 = vpack.c.bf16 %v1875_v60, %v1874_v56 }
 0xa18   :  { %v1687_v63 = vsel %vm1667_vm14, %v1680_v55, 0.0  ;;  %6920 = vmatprep.subr.bf16.mxu1 %v8227_v19  ;;  %v8238_v55 = vpack.c.bf16 %v1867_v58, %v1866_v49  ;;  %9332 = vst [vmem:[#allocation7_spill] sm:$0xff] %v8275_v43 }
 0xa19   :  { %1688 = vadd.xlane.f32.xlu0 %v1687_v63  ;;  %v1850_v63 = vld [vmem:[%s8215_s27 + $0x20] sm:$0xff]  ;;  %9333 = vst [vmem:[#allocation8_spill] sm:$0xff] %v8278_v45 }
 0xa1a   :  { %v8245_v6 = vpack.c.bf16 %v1851_v1, %v1850_v63 }
 0xa1b   :  { %6922 = vmatpush3.bf16.msra.mxu1 %v8235_v51 }
 0xa1c   :  { %6924 = vmatprep.subr.bf16.mxu1 %v8238_v55 }
 0xa1f   :  { %6926 = vmatpush3.bf16.msra.mxu1 %v8245_v6 }
 0xa20   :  { %6928 = vmatprep.subr.bf16.mxu1 %v8248_v8 }
 0xa23   :  { %6930 = vmatpush3.bf16.msra.mxu1 %v8255_v12 }
 0xa24   :  { %6932 = vmatprep.subr.bf16.mxu1 %v8258_v16 }
 0xa27   :  { %6934 = vmatpush3.bf16.msra.mxu1 %v8265_v53 }
 0xa28   :  { %6936 = vmatprep.subr.bf16.mxu1 %v8268_v33 }
 0xa2b   :  { %6938 = vmatpush3.bf16.msra.mxu1 %v8275_v43 }
 0xa2c   :  { %6940 = vmatprep.subr.bf16.mxu1 %v8278_v45 }
 0xa9e   :  { %v1683_v48 = vpop.xlane.xlu0 %1682 }
 0xa9f   :  { %v1690_v49 = vmul.f32 0.015625, %v1683_v48 }
 0xaa1   :  { %v1693_v58 = vadd.f32 1e-05, %v1690_v49 }
 0xaa2   :  { %v1686_v63 = vpop.xlane.xlu1 %1685 }
 0xaa3   :  { %7468 = vrsqrt.f32 %v1693_v58  ;;  %v1691_v1 = vmul.f32 0.015625, %v1686_v63  ;;  %v1858_v58 = vld [vmem:[%s8215_s27 + $0x60] sm:$0xff]  ;;  %v1859_v63 = vld [vmem:[%s8215_s27 + $0x68] sm:$0xff] }
 0xaa5   :  { %v1694_v3 = vadd.f32 1e-05, %v1691_v1  ;;  %v8314_v1 = vpack.c.bf16 %v1859_v63, %v1858_v58 }
 0xaa6   :  { %v1689_v59 = vpop.xlane.xlu0 %1688 }
 0xaa7   :  { %7470 = vrsqrt.f32 %v1694_v3  ;;  %v1692_v10 = vmul.f32 0.015625, %v1689_v59  ;;  %9334 = vst [vmem:[#allocation9_spill] sm:$0xff] %v8314_v1  ;;  %6942 = vmatpush3.bf16.msra.mxu1 %v8314_v1  ;;  %v1877_v3 = vld [vmem:[%s8215_s27 + $0xf8] sm:$0xff] }
 0xaa9   :  { %v1695_v52 = vadd.f32 1e-05, %v1692_v10  ;;  %v1860_v10 = vld [vmem:[%s8215_s27 + $0x70] sm:$0xff] }
 0xaab   :  { %7472 = vrsqrt.f32 %v1695_v52  ;;  %v1861_v52 = vld [vmem:[%s8215_s27 + $0x78] sm:$0xff] }
 0xaad   :  { %v7469_v54 = vpop.eup %7468 }
 0xaae   :  { %v1699_v2 = vmul.f32 %v7469_v54, %v8152_v42  ;;  %v8323_v54 = vpack.c.bf16 %v1861_v52, %v1860_v10 }
 0xab0   :  { %v1708_v21 = vmul.f32 %v5777_v36, %v1699_v2  ;;  %9336 = vst [vmem:[#allocation11_spill] sm:$0xff] %v8323_v54 }
 0xab1   :  { %v7471_v27 = vpop.eup %7470 }
 0xab2   :  { %v8295_v35 = vadd.f32 %v5778_v20, %v1708_v21  ;;  %v1700_v37 = vmul.f32 %v7471_v27, %v8156_v61 }
 0xab4   :  { %5779 = vmatmul.mubr.msk.f32.vlgmr.msra.gmra.mrb[26].mxu0 %vm224_vm0, %v8295_v35  ;;  %v1709_v56 = vmul.f32 %v5777_v36, %v1700_v37 }
 0xab5   :  { %v7473_v60 = vpop.eup %7472  ;;  %1827 = vmatprep.mubr.f32.mxu0 %v9284_v31 }
 0xab6   :  { %v8301_v42 = vadd.f32 %v5778_v20, %v1709_v56  ;;  %v1701_v48 = vmul.f32 %v7473_v60, %v8161_v50  ;;  %v1876_v50 = vld [vmem:[%s8215_s27 + $0xf0] sm:$0xff] }
 0xab7   :  { %v8319_v59 = vpack.c.bf16 %v1877_v3, %v1876_v50 }
 0xab8   :  { %5780 = vmatmul.mubr.msk.f32.gmra.mrb[28].mxu0 %vm224_vm0, %v8301_v42  ;;  %v1710_v49 = vmul.f32 %v5777_v36, %v1701_v48  ;;  %v1736_v36 = vld [vmem:[%s8331_s15] sm:$0x3] }
 0xab9   :  { %1833 = vmatprep.mubr.f32.mxu0 %v9284_v31  ;;  %9335 = vst [vmem:[#allocation10_spill] sm:$0xff] %v8319_v59  ;;  %6944 = vmatprep.subr.bf16.mxu1 %v8319_v59  ;;  %v8335_v2 = vrot.slane %v1736_v36, %v7971_v34 }
 0xaba   :  { %v8307_v61 = vadd.f32 %v5778_v20, %v1710_v49  ;;  %6946 = vmatpush3.bf16.msra.mxu1 %v8323_v54  ;;  %v8338_v20 = vrot.slane %v1736_v36, %v7974_v47 }
 0xabb   :  { %6967 = vmatprep.subr.bf16.mxu1 %v9282_v0  ;;  %9337 = vst [vmem:[#allocation12_spill] sm:$0xff] %v8335_v2 }
 0xabc   :  { %5781 = vmatmul.mubr.msk.f32.gmra.mrb[30].mxu0 %vm224_vm0, %v8307_v61  ;;  %9338 = vst [vmem:[#allocation13_spill] sm:$0xff] %v8338_v20 }
 0xabd   :  { %2130 = vmatprep.mubr.f32.mxu0 %v9284_v31 }
 0xb87   :  { %v1823_v21 = vpop.f32.mrb[26].mxu0 }
 0xb88   :  { %v1824_v27 = vadd.f32 %v1823_v21, %v8335_v2  ;;  %v1825_v37 = vpop.f32.mrb[27].mxu0 }
 0xb89   :  { %v1826_v56 = vadd.f32 %v1825_v37, %v8338_v20 }
 0xb8a   :  { %v1840_v49 = vmax.f32 %v1824_v27, 0.0 }
 0xb8b   :  { %v1841_v60 = vmax.f32 %v1826_v56, 0.0  ;;  %v1829_v48 = vpop.f32.mrb[28].mxu0 }
 0xb8c   :  { %v1830_v58 = vadd.f32 %v1829_v48, %v8335_v2  ;;  %v1831_v63 = vpop.f32.mrb[29].mxu0 }
 0xb8d   :  { %v1832_v50 = vadd.f32 %v1831_v63, %v8338_v20  ;;  %1949 = vmatprep.mubr.f32.mxu1 %v1841_v60  ;;  %v5782_v60 = vld [vmem:[%s8351_s20] ss:$0 sm:$0xff] }
 0xb8e   :  { %1950 = vmatmul.mubr.f32.vlgmr.msra.gmra.mrb[40].mxu1 %v1840_v49  ;;  %v1842_v52 = vmax.f32 %v1830_v58, 0.0 }
 0xb8f   :  { %v1843_v3 = vmax.f32 %v1832_v50, 0.0  ;;  %v1835_v10 = vpop.f32.mrb[30].mxu0 }
 0xb90   :  { %v1836_v36 = vadd.f32 %v1835_v10, %v8335_v2  ;;  %v1837_v0 = vpop.f32.mrb[31].mxu0 }
 0xb91   :  { %v1838_v21 = vadd.f32 %v1837_v0, %v8338_v20  ;;  %1954 = vmatprep.mubr.f32.mxu1 %v1843_v3 }
 0xb92   :  { %1955 = vmatmul.mubr.f32.gmra.mrb[42].mxu1 %v1842_v52  ;;  %v1844_v56 = vmax.f32 %v1836_v36, 0.0 }
 0xb93   :  { %v1845_v37 = vmax.f32 %v1838_v21, 0.0 }
 0xb95   :  { %1959 = vmatprep.mubr.f32.mxu1 %v1845_v37 }
 0xb96   :  { %1960 = vmatmul.mubr.f32.gmra.mrb[44].mxu1 %v1844_v56 }
 0xb97   :  { %6468 = vmatprep.mubr.msk.f32.mxu1 %vm7618_vm10, %v9284_v31 }
 0xc61   :  { %v6063_v27 = vpop.f32.mrb[40].mxu1 }
 0xc62   :  { %v6064_v48 = vpop.f32.mrb[41].mxu1 }
 0xc63   :  { %v6065_v0 = vadd.f32 %v6064_v48, %v6063_v27 }
 0xc65   :  { %v1952_v49 = vadd.f32 %v6065_v0, %v5782_v60  ;;  %v6066_v58 = vpop.f32.mrb[42].mxu1 }
 0xc66   :  { %v6067_v63 = vpop.f32.mrb[43].mxu1 }
 0xc67   :  { %v6068_v50 = vadd.f32 %v6067_v63, %v6066_v58  ;;  %v1965_v3 = vadd.f32 %v1952_v49, %v8295_v35 }
 0xc69   :  { %v1957_v10 = vadd.f32 %v6068_v50, %v5782_v60  ;;  %v6069_v52 = vpop.f32.mrb[44].mxu1  ;;  %v1970_v36 = vsel %vm224_vm0, %v1965_v3, 0.0 }
 0xc6a   :  { %v6070_v21 = vpop.f32.mrb[45].mxu1  ;;  %1971 = vadd.xlane.f32.xlu1 %v1970_v36 }
 0xc6b   :  { %v6071_v37 = vadd.f32 %v6070_v21, %v6069_v52  ;;  %v1966_v56 = vadd.f32 %v1957_v10, %v8301_v42  ;;  %v5786_v21 = vld [vmem:[%s7871_s21 + $0x88] sm:$0xff] }
 0xc6d   :  { %v1962_v31 = vadd.f32 %v6071_v37, %v5782_v60  ;;  %v1973_v20 = vsel %vm224_vm0, %v1966_v56, 0.0  ;;  %v5788_v37 = vld [vmem:[%s7871_s21 + $0x98] sm:$0xff] }
 0xc6e   :  { %1974 = vadd.xlane.f32.xlu0 %v1973_v20 }
 0xc6f   :  { %v1967_v27 = vadd.f32 %v1962_v31, %v8307_v61 }
 0xc71   :  { %v1976_v48 = vsel %vm1667_vm14, %v1967_v27, 0.0 }
 0xc72   :  { %1977 = vadd.xlane.f32.xlu1 %v1976_v48  ;;  %v5785_v48 = vld [vmem:[%s7871_s21 + $0x80] sm:$0xff] }
 0xcf7   :  { %v1972_v0 = vpop.xlane.xlu1 %1971 }
 0xcf8   :  { %v1979_v35 = vmul.f32 0.015625, %v1972_v0 }
 0xcfa   :  { %v8360_v49 = vsub.f32 %v1965_v3, %v1979_v35  ;;  %v5790_v35 = vld [vmem:[%s7871_s21 + $0xa8] sm:$0xff] }
 0xcfb   :  { %v1975_v58 = vpop.xlane.xlu0 %1974 }
 0xcfc   :  { %v1980_v63 = vmul.f32 0.015625, %v1975_v58  ;;  %v1985_v42 = vmul.f32 %v8360_v49, %v8360_v49  ;;  %v5792_v58 = vld [vmem:[%s7871_s21 + $0xb8] sm:$0xff] }
 0xcfe   :  { %v8364_v60 = vsub.f32 %v1966_v56, %v1980_v63  ;;  %v1988_v31 = vsel %vm224_vm0, %v1985_v42, 0.0  ;;  %v8377_v56 = vpack.c.bf16 %v5788_v37, %v5786_v21  ;;  %v8387_v63 = vpack.c.bf16 %v5792_v58, %v5790_v35  ;;  %v5789_v42 = vld [vmem:[%s7871_s21 + $0xa0] sm:$0xff]  ;;  %v5798_v37 = vld [vmem:[%s7871_s21 + $0xe8] sm:$0xff]  ;;  %v5799_v58 = vld [vmem:[%s7871_s21 + $0xf0] sm:$0xff] }
 0xcff   :  { %1989 = vadd.xlane.f32.xlu0 %v1988_v31  ;;  %v1978_v61 = vpop.xlane.xlu1 %1977  ;;  %v5791_v31 = vld [vmem:[%s7871_s21 + $0xb0] sm:$0xff]  ;;  %v5797_v35 = vld [vmem:[%s7871_s21 + $0xe0] sm:$0xff] }
 0xd00   :  { %v1981_v20 = vmul.f32 0.015625, %v1978_v61  ;;  %v1986_v50 = vmul.f32 %v8364_v60, %v8364_v60  ;;  %9339 = vst [vmem:[#allocation14_spill] sm:$0xff] %v8377_v56  ;;  %6948 = vmatprep.subr.bf16.mxu0 %v8377_v56  ;;  %9341 = vst [vmem:[#allocation16_spill] sm:$0xff] %v8387_v63  ;;  %v8391_v61 = vpack.c.bf16 %v5791_v31, %v5789_v42  ;;  %v9347_v31 = vmov 0.0|0.0  }
 0xd01   :  { %v8411_v42 = vpack.c.bf16 %v5799_v58, %v5797_v35 }
 0xd02   :  { %v8369_v3 = vsub.f32 %v1967_v27, %v1981_v20  ;;  %v1991_v10 = vsel %vm224_vm0, %v1986_v50, 0.0  ;;  %v5787_v27 = vld [vmem:[%s7871_s21 + $0x90] sm:$0xff]  ;;  %9342 = vst [vmem:[#allocation17_spill] sm:$0xff] %v8391_v61  ;;  %v5794_v20 = vld [vmem:[%s7871_s21 + $0xc8] sm:$0xff]  ;;  %v5796_v50 = vld [vmem:[%s7871_s21 + $0xd8] sm:$0xff] }
 0xd03   :  { %1992 = vadd.xlane.f32.xlu1 %v1991_v10  ;;  %v8381_v0 = vpack.c.bf16 %v5787_v27, %v5785_v48  ;;  %v8397_v10 = vpack.c.bf16 %v5796_v50, %v5794_v20  ;;  %v5800_v48 = vld [vmem:[%s7871_s21 + $0xf8] sm:$0xff]  ;;  %9346 = vst [vmem:[#allocation21_spill] sm:$0xff] %v8411_v42 }
 0xd04   :  { %v1987_v52 = vmul.f32 %v8369_v3, %v8369_v3  ;;  %v8407_v27 = vpack.c.bf16 %v5800_v48, %v5798_v37 }
 0xd05   :  { %9340 = vst [vmem:[#allocation15_spill] sm:$0xff] %v8381_v0  ;;  %6950 = vmatpush1.bf16.msra.mxu0 %v8381_v0  ;;  %9343 = vst [vmem:[#allocation18_spill] sm:$0xff] %v8397_v10 }
 0xd06   :  { %v1994_v36 = vsel %vm1667_vm14, %v1987_v52, 0.0  ;;  %6952 = vmatprep.subr.bf16.mxu0 %v8387_v63  ;;  %v5793_v52 = vld [vmem:[%s7871_s21 + $0xc0] sm:$0xff]  ;;  %9345 = vst [vmem:[#allocation20_spill] sm:$0xff] %v8407_v27 }
 0xd07   :  { %1995 = vadd.xlane.f32.xlu0 %v1994_v36  ;;  %v5795_v36 = vld [vmem:[%s7871_s21 + $0xd0] sm:$0xff]  ;;  %s7630_s21 = smov 24  }
 0xd08   :  { %v8401_v21 = vpack.c.bf16 %v5795_v36, %v5793_v52  ;;  %s8424_s3 = sld [smem:[%s9281_s0 + %s7630_s21]]  }
 0xd09   :  { %6954 = vmatpush1.bf16.msra.mxu0 %v8391_v61 }
 0xd0a   :  { %9344 = vst [vmem:[#allocation19_spill] sm:$0xff] %v8401_v21  ;;  %6956 = vmatprep.subr.bf16.mxu0 %v8397_v10 }
 0xd0d   :  { %6958 = vmatpush1.bf16.msra.mxu0 %v8401_v21 }
 0xd0e   :  { %6960 = vmatprep.subr.bf16.mxu0 %v8407_v27 }
 0xd11   :  { %6962 = vmatpush1.bf16.msra.mxu0 %v8411_v42 }
 0xd12   :  { %6963 = vmatprep.subr.bf16.mxu0 %v9347_v31 }
 0xd8c   :  { %v1990_v20 = vpop.xlane.xlu0 %1989 }
 0xd8d   :  { %v1997_v50 = vmul.f32 0.015625, %v1990_v20 }
 0xd8f   :  { %v2000_v52 = vadd.f32 1e-05, %v1997_v50  ;;  %v5783_v50 = vld [vmem:[%s8419_s28] ss:$0 sm:$0xff] }
 0xd90   :  { %v1993_v36 = vpop.xlane.xlu1 %1992 }
 0xd91   :  { %7474 = vrsqrt.f32 %v2000_v52  ;;  %v1998_v2 = vmul.f32 0.015625, %v1993_v36  ;;  %v5784_v36 = vld [vmem:[%s8424_s3] ss:$0 sm:$0xff] }
 0xd93   :  { %v2001_v37 = vadd.f32 1e-05, %v1998_v2 }
 0xd94   :  { %v1996_v48 = vpop.xlane.xlu0 %1995 }
 0xd95   :  { %7476 = vrsqrt.f32 %v2001_v37  ;;  %v1999_v35 = vmul.f32 0.015625, %v1996_v48  ;;  %v9348_v48 = vmov 0.0  }
 0xd97   :  { %v2002_v58 = vadd.f32 1e-05, %v1999_v35 }
 0xd99   :  { %7478 = vrsqrt.f32 %v2002_v58 }
 0xd9b   :  { %v7475_v20 = vpop.eup %7474 }
 0xd9c   :  { %v2006_v52 = vmul.f32 %v7475_v20, %v8360_v49 }
 0xd9e   :  { %v2015_v42 = vmul.f32 %v5783_v50, %v2006_v52 }
 0xd9f   :  { %v7477_v2 = vpop.eup %7476 }
 0xda0   :  { %v8429_v27 = vadd.f32 %v5784_v36, %v2015_v42  ;;  %v2007_v21 = vmul.f32 %v7477_v2, %v8364_v60  ;;  %v5801_v60 = vld [vmem:[%s7969_s6 + $0x2] sm:$0x3] }
 0xda1   :  { %v8452_v20 = vrot.slane %v5801_v60, %v7974_v47 }
 0xda2   :  { %5802 = vmatmul.mubr.msk.f32.vlgmr.msra.gmra.mrb[32].mxu0 %vm224_vm0, %v8429_v27  ;;  %v2016_v10 = vmul.f32 %v5783_v50, %v2007_v21 }
 0xda3   :  { %v7479_v37 = vpop.eup %7478  ;;  %2136 = vmatprep.mubr.f32.mxu0 %v9348_v48  ;;  %9350 = vst [vmem:[#allocation23_spill] sm:$0xff] %v8452_v20 }
 0xda4   :  { %v8435_v35 = vadd.f32 %v5784_v36, %v2016_v10  ;;  %v2008_v58 = vmul.f32 %v7479_v37, %v8369_v3  ;;  %v8449_v10 = vrot.slane %v5801_v60, %v7971_v34 }
 0xda6   :  { %5803 = vmatmul.mubr.msk.f32.gmra.mrb[34].mxu0 %vm224_vm0, %v8435_v35  ;;  %v2017_v49 = vmul.f32 %v5783_v50, %v2008_v58  ;;  %9349 = vst [vmem:[#allocation22_spill] sm:$0xff] %v8449_v10 }
 0xda7   :  { %2142 = vmatprep.mubr.f32.mxu0 %v9348_v48 }
 0xda8   :  { %v8441_v42 = vadd.f32 %v5784_v36, %v2017_v49 }
 0xdaa   :  { %5804 = vmatmul.mubr.msk.f32.gmra.mrb[36].mxu0 %vm224_vm0, %v8441_v42 }
 0xdab   :  { %6453 = vmatprep.mubr.msk.f32.mxu0 %vm7618_vm10, %v9348_v48 }
 0xe75   :  { %v2132_v21 = vpop.f32.mrb[32].mxu0 }
 0xe76   :  { %v2134_v3 = vpop.f32.mrb[33].mxu0  ;;  %v2133_v52 = vadd.f32 %v2132_v21, %v8449_v10 }
 0xe77   :  { %v8457_v37 = vadd.f32 %v2134_v3, %v8452_v20 }
 0xe79   :  { %v2138_v50 = vpop.f32.mrb[34].mxu0 }
 0xe7a   :  { %v2139_v36 = vadd.f32 %v2138_v50, %v8449_v10  ;;  %v2140_v2 = vpop.f32.mrb[35].mxu0 }
 0xe7b   :  { %v8460_v58 = vadd.f32 %v2140_v2, %v8452_v20 }
 0xe7c   :  { %v7343_v49 = vpack.i.bf16 %v2139_v36, %v2133_v52 }
 0xe7d   :  { %v6968_v60 = vpack.c.bf16 %v8460_v58, %v8457_v37  ;;  %v2144_v63 = vpop.f32.mrb[36].mxu0 }
 0xe7e   :  { %v2145_v0 = vadd.f32 %v2144_v63, %v8449_v10  ;;  %v2146_v21 = vpop.f32.mrb[37].mxu0  ;;  %7344 = vrot.lane.b32.xlu1 %v7343_v49, %s7617_s7 }
 0xe7f   :  { %6969 = vmatpush3.bf16.msra.mxu1 %v6968_v60  ;;  %v8471_v3 = vadd.f32 %v2146_v21, %v8452_v20 }
 0xe80   :  { %2165 = vrot.lane.b32.xlu0 %v2145_v0, %s7617_s7  ;;  %6466 = vmatprep.subr.mxu1 %v9348_v48 }
 0xe82   :  { %7349 = vrot.lane.b32.xlu1 %v7343_v49, %s7619_s8 }
 0xe83   :  { %6467 = vmatpush3.msk.msra.mxu1 %vm862_vm7, %v8471_v3 }
 0xe84   :  { %2387 = vrot.lane.b32.xlu0 %v2133_v52, %s7620_s9  ;;  %6974 = vmatprep.subr.bf16.mxu1 %v9347_v31 }
 0xe86   :  { %2397 = vrot.lane.b32.xlu1 %v2145_v0, %s7619_s8 }
 0xe88   :  { %2391 = vrot.lane.b32.xlu0 %v2145_v0, %s7620_s9 }
 0xe8a   :  { %2389 = vrot.lane.b32.xlu1 %v2139_v36, %s7620_s9 }
 0xef0   :  { %v7345_v63 = vpop.permute.xlu1 %7344 }
 0xef1   :  { %v7347_v50 = vunpack.i.h.bf16 %v7345_v63  ;;  %v7346_v2 = vunpack.i.l.bf16 %v7345_v63 }
 0xef2   :  { %v2166_v20 = vpop.permute.xlu0 %2165 }
 0xef3   :  { %v6964_v60 = vpack.c.bf16 %v7347_v50, %v7346_v2 }
 0xef4   :  { %v7350_v49 = vpop.permute.xlu1 %7349 }
 0xef5   :  { %6966 = vmatpush3.bf16.xpose.msk.msra.mxu0 %vm8012_vm11, %v6964_v60  ;;  %v7352_v21 = vunpack.i.h.bf16 %v7350_v49  ;;  %v7351_v61 = vunpack.i.l.bf16 %v7350_v49 }
 0xef6   :  { %6451 = vmatprep.subr.mxu0 %v9348_v48 }
 0xef7   :  { %v6971_v10 = vpack.c.bf16 %v7352_v21, %v7351_v61  ;;  %v2388_v61 = vpop.permute.xlu0 %2387 }
 0xef8   :  { %v2398_v63 = vpop.permute.xlu1 %2397 }
 0xefd   :  { %6452 = vmatpush3.xpose.msk.msra.mxu0 %vm586_vm1, %v2166_v20 }
 0xefe   :  { %6970 = vmatprep.subr.bf16.mxu0 %v9347_v31 }
 0xf00   :  { %6454 = vmatmul.mubr.msk.f32.vlgmr.msra.gmra.mrb[38].mxu0 %vm586_vm1, %v2133_v52 }
 0xf01   :  { %6973 = vmatpush3.bf16.xpose.msk.msra.mxu0 %vm8012_vm11, %v6971_v10  ;;  %6456 = vmatprep.mubr.msk.f32.mxu0 %vm7618_vm10, %v9348_v48  ;;  %v2390_v10 = vpop.permute.xlu1 %2389 }
 0xf02   :  { %6481 = vmatprep.subr.mxu0 %v9348_v48 }
 0xf04   :  { %6457 = vmatmul.mubr.msk.f32.gmra.mrb[40].mxu0 %vm586_vm1, %v2139_v36 }
 0xf05   :  { %6459 = vmatprep.mubr.msk.f32.mxu0 %vm7618_vm10, %v9348_v48 }
 0xf08   :  { %6460 = vmatmul.mubr.msk.f32.gmra.mrb[42].mxu0 %vm586_vm1, %v2145_v0  ;;  %v2392_v0 = vpop.permute.xlu0 %2391 }
 0xf09   :  { %6482 = vmatpush3.xpose.msk.msra.mxu0 %vm586_vm1, %v2398_v63  ;;  %6483 = vmatprep.mubr.msk.f32.mxu0 %vm7618_vm10, %v9348_v48 }
 0xf0a   :  { %6977 = vmatprep.subr.bf16.mxu0 %v9347_v31 }
 0xf0c   :  { %6484 = vmatmul.mubr.msk.f32.vlgmr.msra.gmra.mrb[44].mxu0 %vm586_vm1, %v2388_v61 }
 0xf0d   :  { %6486 = vmatprep.mubr.msk.f32.mxu0 %vm7618_vm10, %v9348_v48 }
 0xf10   :  { %6487 = vmatmul.mubr.msk.f32.gmra.mrb[46].mxu0 %vm586_vm1, %v2390_v10 }
 0xf11   :  { %6489 = vmatprep.mubr.msk.f32.mxu0 %vm7618_vm10, %v9348_v48 }
 0xf14   :  { %6490 = vmatmul.mubr.msk.f32.gmra.mrb[48].mxu0 %vm586_vm1, %v2392_v0 }
 0xf15   :  { %6515 = vmatprep.mubr.msk.f32.mxu0 %vm7618_vm10, %v9348_v48 }
 0xfd3   :  { %v2245_v20 = vpop.f32.mrb[38].mxu0 }
 0xfd4   :  { %v2259_v52 = vmul.f32 0.17677669, %v2245_v20  ;;  %v6455_v36 = vpop.f32.mrb[39].mxu0 }
 0xfd6   :  { %v2262_v50 = vsel %vm1100_vm12, %v2259_v52, -inf }
 0xfd7   :  { %2263 = vmax.xlane.f32.xlu1 %v2262_v50  ;;  %v2250_v2 = vpop.f32.mrb[40].mxu0 }
 0xfd8   :  { %v2260_v60 = vmul.f32 0.17677669, %v2250_v2  ;;  %v6458_v49 = vpop.f32.mrb[41].mxu0 }
 0xfda   :  { %v2265_v21 = vsel %vm1100_vm12, %v2260_v60, -inf }
 0xfdb   :  { %2266 = vmax.xlane.f32.xlu0 %v2265_v21  ;;  %v2255_v63 = vpop.f32.mrb[42].mxu0 }
 0xfdc   :  { %v2261_v61 = vmul.f32 0.17677669, %v2255_v63  ;;  %v6461_v10 = vpop.f32.mrb[43].mxu0 }
 0xfde   :  { %v2268_v0 = vsel %vm1107_vm13, %v2261_v61, -inf }
 0xfdf   :  { %2269 = vmax.xlane.f32.xlu0 %v2268_v0  ;;  %v2477_v56 = vpop.f32.mrb[44].mxu0 }
 0xfe0   :  { %v2491_v54 = vmul.f32 0.17677669, %v2477_v56  ;;  %v6485_v28 = vpop.f32.mrb[45].mxu0 }
 0xfe2   :  { %v2494_v20 = vsel %vm1100_vm12, %v2491_v54, -inf }
 0xfe3   :  { %2495 = vmax.xlane.f32.xlu1 %v2494_v20  ;;  %v2482_v36 = vpop.f32.mrb[46].mxu0 }
 0xfe4   :  { %v2492_v50 = vmul.f32 0.17677669, %v2482_v36  ;;  %v6488_v59 = vpop.f32.mrb[47].mxu0 }
 0xfe6   :  { %v2497_v2 = vsel %vm1100_vm12, %v2492_v50, -inf }
 0xfe7   :  { %2498 = vmax.xlane.f32.xlu0 %v2497_v2  ;;  %v2487_v49 = vpop.f32.mrb[48].mxu0 }
 0xfe8   :  { %v2493_v21 = vmul.f32 0.17677669, %v2487_v49  ;;  %v6491_v1 = vpop.f32.mrb[49].mxu0 }
 0xfea   :  { %v2500_v63 = vsel %vm1107_vm13, %v2493_v21, -inf }
 0xfeb   :  { %2501 = vmax.xlane.f32.xlu1 %v2500_v63 }
0x1064   :  { %v2264_v10 = vpop.xlane.xlu1 %2263 }
0x1065   :  { %v2271_v0 = vsub.f32 %v2259_v52, %v2264_v10 }
0x1067   :  { %v2274_v24 = vmul.f32 1.442695, %v2271_v0 }
0x1068   :  { %v2267_v56 = vpop.xlane.xlu0 %2266 }
0x1069   :  { %7480 = vpow2.f32 %v2274_v24  ;;  %v2272_v28 = vsub.f32 %v2260_v60, %v2267_v56 }
0x106b   :  { %v2276_v18 = vmul.f32 1.442695, %v2272_v28 }
0x106c   :  { %v2270_v20 = vpop.xlane.xlu0 %2269 }
0x106d   :  { %7482 = vpow2.f32 %v2276_v18  ;;  %v2273_v36 = vsub.f32 %v2261_v61, %v2270_v20 }
0x106f   :  { %v2278_v59 = vmul.f32 1.442695, %v2273_v36 }
0x1070   :  { %v2496_v45 = vpop.xlane.xlu1 %2495 }
0x1071   :  { %7484 = vpow2.f32 %v2278_v59  ;;  %v2503_v2 = vsub.f32 %v2491_v54, %v2496_v45 }
0x1073   :  { %v7481_v43 = vpop.eup %7480  ;;  %v2506_v49 = vmul.f32 1.442695, %v2503_v2 }
0x1074   :  { %v2499_v1 = vpop.xlane.xlu0 %2498  ;;  %v2280_v15 = vsel %vm1100_vm12, %v7481_v43, 0.0 }
0x1075   :  { %7486 = vpow2.f32 %v2506_v49  ;;  %v2504_v63 = vsub.f32 %v2492_v50, %v2499_v1  ;;  %2281 = vadd.xlane.f32.xlu0 %v2280_v15 }
0x1077   :  { %v7483_v52 = vpop.eup %7482  ;;  %v2508_v10 = vmul.f32 1.442695, %v2504_v63 }
0x1078   :  { %v2502_v24 = vpop.xlane.xlu1 %2501  ;;  %v2283_v60 = vsel %vm1100_vm12, %v7483_v52, 0.0 }
0x1079   :  { %7488 = vpow2.f32 %v2508_v10  ;;  %v2505_v18 = vsub.f32 %v2493_v21, %v2502_v24  ;;  %2284 = vadd.xlane.f32.xlu1 %v2283_v60  ;;  %v9351_v21 = vpack.i.bf16 %v8460_v58, %v8457_v37 }
0x107b   :  { %v7485_v61 = vpop.eup %7484  ;;  %v2510_v0 = vmul.f32 1.442695, %v2505_v18 }
0x107c   :  { %v2286_v45 = vsel %vm1107_vm13, %v7485_v61, 0.0 }
0x107d   :  { %7490 = vpow2.f32 %v2510_v0  ;;  %2287 = vadd.xlane.f32.xlu0 %v2286_v45 }
0x107f   :  { %v7487_v54 = vpop.eup %7486 }
0x1080   :  { %v2512_v56 = vsel %vm1100_vm12, %v7487_v54, 0.0 }
0x1081   :  { %2513 = vadd.xlane.f32.xlu1 %v2512_v56  ;;  %v5806_v56 = vld [vmem:[%s8083_s13 + $0x48] sm:$0xff] }
0x1083   :  { %v7489_v50 = vpop.eup %7488 }
0x1084   :  { %v2515_v15 = vsel %vm1100_vm12, %v7489_v50, 0.0 }
0x1085   :  { %2516 = vadd.xlane.f32.xlu0 %v2515_v15 }
0x1087   :  { %v7491_v28 = vpop.eup %7490 }
0x1088   :  { %v2518_v20 = vsel %vm1107_vm13, %v7491_v28, 0.0 }
0x1089   :  { %2519 = vadd.xlane.f32.xlu1 %v2518_v20 }
0x109a   :  { %2533 = vrot.lane.b32.xlu1 %v8471_v3, %s7620_s9 }
0x109b   :  { %7354 = vrot.lane.b32.xlu0 %v9351_v21, %s7620_s9 }
0x1102   :  { %v2282_v36 = vpop.xlane.xlu0 %2281 }
0x1103   :  { %7492 = vrcp.f32 %v2282_v36  ;;  %v5807_v36 = vld [vmem:[%s8083_s13 + $0x50] sm:$0xff] }
0x1106   :  { %v2285_v59 = vpop.xlane.xlu1 %2284 }
0x1107   :  { %7494 = vrcp.f32 %v2285_v59  ;;  %v5808_v59 = vld [vmem:[%s8083_s13 + $0x58] sm:$0xff] }
0x110a   :  { %v2288_v2 = vpop.xlane.xlu0 %2287 }
0x110b   :  { %7496 = vrcp.f32 %v2288_v2 }
0x110d   :  { %v7493_v49 = vpop.eup %7492 }
0x110e   :  { %v2290_v1 = vmul.f32 %v7493_v49, %v7481_v43  ;;  %v2514_v63 = vpop.xlane.xlu1 %2513 }
0x110f   :  { %7498 = vrcp.f32 %v2514_v63 }
0x1110   :  { %6469 = vmatmul.mubr.msk.f32.vlgmr.msra.gmra.mrb[46].mxu1 %vm1100_vm12, %v2290_v1 }
0x1111   :  { %v7495_v10 = vpop.eup %7494  ;;  %6471 = vmatprep.mubr.msk.f32.mxu1 %vm7618_vm10, %v9348_v48 }
0x1112   :  { %v2517_v3 = vpop.xlane.xlu0 %2516  ;;  %v2292_v37 = vmul.f32 %v7495_v10, %v7483_v52  ;;  %v5805_v52 = vld [vmem:[%s8083_s13 + $0x40] sm:$0xff] }
0x1113   :  { %7500 = vrcp.f32 %v2517_v3  ;;  %v8539_v20 = vpack.c.bf16 %v5806_v56, %v5805_v52  ;;  %v5809_v10 = vld [vmem:[%s8083_s13 + $0x60] sm:$0xff]  ;;  %v5810_v3 = vld [vmem:[%s8083_s13 + $0x68] sm:$0xff] }
0x1114   :  { %6472 = vmatmul.mubr.msk.f32.gmra.mrb[48].mxu1 %vm1100_vm12, %v2292_v37  ;;  %v8561_v37 = vpack.c.bf16 %v5810_v3, %v5809_v10 }
0x1115   :  { %v7497_v58 = vpop.eup %7496  ;;  %6474 = vmatprep.mubr.msk.f32.mxu1 %vm7618_vm10, %v9348_v48 }
0x1116   :  { %v7355_v43 = vpop.permute.xlu0 %7354  ;;  %v2520_v24 = vpop.xlane.xlu1 %2519  ;;  %v2294_v60 = vmul.f32 %v7497_v58, %v7485_v61  ;;  %v5812_v58 = vld [vmem:[%s8083_s13 + $0x78] sm:$0xff]  ;;  %6979 = vmatpush3.bf16.msra.mxu0 %v8561_v37 }
0x1117   :  { %v7357_v18 = vunpack.i.h.bf16 %v7355_v43  ;;  %v7356_v0 = vunpack.i.l.bf16 %v7355_v43  ;;  %7502 = vrcp.f32 %v2520_v24  ;;  %6980 = vmatprep.subr.bf16.mxu0 %v9347_v31 }
0x1118   :  { %6475 = vmatmul.mubr.msk.f32.gmra.mrb[50].mxu1 %vm1100_vm12, %v2294_v60 }
0x1119   :  { %v6975_v45 = vpack.c.bf16 %v7357_v18, %v7356_v0  ;;  %6498 = vmatprep.mubr.msk.f32.mxu1 %vm7618_vm10, %v9348_v48  ;;  %v7499_v15 = vpop.eup %7498 }
0x111a   :  { %v2522_v21 = vmul.f32 %v7499_v15, %v7487_v54  ;;  %v2534_v61 = vpop.permute.xlu1 %2533  ;;  %v8549_v54 = vpack.c.bf16 %v5808_v59, %v5807_v36 }
0x111b   :  { %6976 = vmatpush3.bf16.msra.mxu1 %v6975_v45 }
0x111c   :  { %6496 = vmatprep.subr.mxu1 %v9348_v48 }
0x111d   :  { %v7501_v2 = vpop.eup %7500 }
0x111e   :  { %v2524_v49 = vmul.f32 %v7501_v2, %v7489_v50  ;;  %v5811_v50 = vld [vmem:[%s8083_s13 + $0x70] sm:$0xff] }
0x111f   :  { %6497 = vmatpush3.msk.msra.mxu1 %vm862_vm7, %v2534_v61  ;;  %v8566_v43 = vpack.c.bf16 %v5812_v58, %v5811_v50  ;;  %v5840_v50 = vld [vmem:[%s8143_s17 + $0x1] ss:$0 sm:$0xff] }
0x1120   :  { %6499 = vmatmul.mubr.msk.f32.vlgmr.msra.gmra.mrb[52].mxu1 %vm1100_vm12, %v2522_v21  ;;  %6983 = vmatprep.subr.bf16.mxu1 %v9347_v31 }
0x1121   :  { %6501 = vmatprep.mubr.msk.f32.mxu1 %vm7618_vm10, %v9348_v48  ;;  %6985 = vmatpush3.bf16.msra.mxu1 %v8539_v20  ;;  %v7503_v1 = vpop.eup %7502 }
0x1122   :  { %6986 = vmatprep.subr.bf16.mxu1 %v9347_v31  ;;  %v2526_v63 = vmul.f32 %v7503_v1, %v7491_v28  ;;  %6982 = vmatpush3.bf16.msra.mxu0 %v8566_v43 }
0x1124   :  { %6502 = vmatmul.mubr.msk.f32.gmra.mrb[54].mxu1 %vm1100_vm12, %v2524_v49 }
0x1125   :  { %6504 = vmatprep.mubr.msk.f32.mxu1 %vm7618_vm10, %v9348_v48  ;;  %6988 = vmatpush3.bf16.msra.mxu1 %v8549_v54 }
0x1128   :  { %6505 = vmatmul.mubr.msk.f32.gmra.mrb[56].mxu1 %vm1100_vm12, %v2526_v63 }
0x1129   :  { %6532 = vmatprep.mubr.msk.f32.mxu1 %vm7618_vm10, %v9348_v48 }
0x11e3   :  { %v2373_v28 = vpop.f32.mrb[46].mxu1 }
0x11e4   :  { %v6470_v24 = vpop.f32.mrb[47].mxu1  ;;  %6533 = vmatmul.mubr.msk.f32.vlgmr.msra.gmra.mrb[58].mxu1 %vm586_vm1, %v2373_v28 }
0x11e5   :  { %6535 = vmatprep.mubr.msk.f32.mxu1 %vm7618_vm10, %v9348_v48 }
0x11e7   :  { %v2378_v60 = vpop.f32.mrb[48].mxu1 }
0x11e8   :  { %v6473_v18 = vpop.f32.mrb[49].mxu1  ;;  %6536 = vmatmul.mubr.msk.f32.gmra.mrb[60].mxu1 %vm586_vm1, %v2378_v60 }
0x11e9   :  { %6538 = vmatprep.mubr.msk.f32.mxu1 %vm7618_vm10, %v9348_v48 }
0x11eb   :  { %v2383_v0 = vpop.f32.mrb[50].mxu1 }
0x11ec   :  { %v6476_v45 = vpop.f32.mrb[51].mxu1  ;;  %6539 = vmatmul.mubr.msk.f32.gmra.mrb[62].mxu1 %vm586_vm1, %v2383_v0 }
0x11f3   :  { %v2614_v52 = vpop.f32.mrb[52].mxu1 }
0x11f4   :  { %v6500_v56 = vpop.f32.mrb[53].mxu1  ;;  %6516 = vmatmul.mubr.msk.f32.vlgmr.msra.gmra.mrb[50].mxu0 %vm586_vm1, %v2614_v52 }
0x11f5   :  { %6518 = vmatprep.mubr.msk.f32.mxu0 %vm7618_vm10, %v9348_v48 }
0x11f7   :  { %v2619_v15 = vpop.f32.mrb[54].mxu1 }
0x11f8   :  { %v6503_v21 = vpop.f32.mrb[55].mxu1  ;;  %6519 = vmatmul.mubr.msk.f32.gmra.mrb[52].mxu0 %vm586_vm1, %v2619_v15 }
0x11f9   :  { %6521 = vmatprep.mubr.msk.f32.mxu0 %vm7618_vm10, %v9348_v48 }
0x11fb   :  { %v2624_v61 = vpop.f32.mrb[56].mxu1 }
0x11fc   :  { %v6506_v36 = vpop.f32.mrb[57].mxu1  ;;  %6522 = vmatmul.mubr.msk.f32.gmra.mrb[54].mxu0 %vm586_vm1, %v2624_v61 }
0x11fd   :  { %2984 = vmatprep.mubr.f32.mxu0 %v9348_v48 }
0x12b7   :  { %v2792_v59 = vpop.f32.mrb[58].mxu1 }
0x12b8   :  { %v6534_v2 = vpop.f32.mrb[59].mxu1 }
0x12bb   :  { %v2797_v49 = vpop.f32.mrb[60].mxu1 }
0x12bc   :  { %v6537_v1 = vpop.f32.mrb[61].mxu1 }
0x12bf   :  { %v2802_v63 = vpop.f32.mrb[62].mxu1 }
0x12c0   :  { %v6540_v10 = vpop.f32.mrb[63].mxu1 }
0x12c7   :  { %v2703_v3 = vpop.f32.mrb[50].mxu0 }
0x12c8   :  { %v2793_v58 = vadd.f32 %v2792_v59, %v2703_v3  ;;  %v6517_v28 = vpop.f32.mrb[51].mxu0 }
0x12ca   :  { %v2814_v24 = vadd.f32 %v5840_v50, %v2793_v58 }
0x12cb   :  { %v2708_v60 = vpop.f32.mrb[52].mxu0 }
0x12cc   :  { %v2798_v18 = vadd.f32 %v2797_v49, %v2708_v60  ;;  %v6520_v0 = vpop.f32.mrb[53].mxu0  ;;  %v2817_v45 = vadd.f32 %v2814_v24, %v8429_v27 }
0x12ce   :  { %v2815_v52 = vadd.f32 %v5840_v50, %v2798_v18  ;;  %v2824_v56 = vsel %vm224_vm0, %v2817_v45, 0.0 }
0x12cf   :  { %2825 = vadd.xlane.f32.xlu1 %v2824_v56  ;;  %v2713_v15 = vpop.f32.mrb[54].mxu0  ;;  %v5846_v56 = vld [vmem:[%s8170_s22 + $0x88] sm:$0xff] }
0x12d0   :  { %v2803_v21 = vadd.f32 %v2802_v63, %v2713_v15  ;;  %v6523_v61 = vpop.f32.mrb[55].mxu0  ;;  %v2818_v36 = vadd.f32 %v2815_v52, %v8435_v35  ;;  %v5848_v15 = vld [vmem:[%s8170_s22 + $0x98] sm:$0xff] }
0x12d1   :  { %v5845_v61 = vld [vmem:[%s8170_s22 + $0x80] sm:$0xff] }
0x12d2   :  { %v2816_v2 = vadd.f32 %v5840_v50, %v2803_v21  ;;  %v2827_v1 = vsel %vm224_vm0, %v2818_v36, 0.0  ;;  %v8609_v21 = vpack.c.bf16 %v5848_v15, %v5846_v56  ;;  %v5857_v56 = vld [vmem:[%s8170_s22 + $0xe0] sm:$0xff]  ;;  %v5859_v15 = vld [vmem:[%s8170_s22 + $0xf0] sm:$0xff] }
0x12d3   :  { %2828 = vadd.xlane.f32.xlu0 %v2827_v1  ;;  %v5850_v1 = vld [vmem:[%s8170_s22 + $0xa8] sm:$0xff] }
0x12d4   :  { %v2819_v59 = vadd.f32 %v2816_v2, %v8441_v42  ;;  %6990 = vmatprep.subr.bf16.mxu0 %v8609_v21 }
0x12d6   :  { %v2830_v49 = vsel %vm1667_vm14, %v2819_v59, 0.0 }
0x12d7   :  { %2831 = vadd.xlane.f32.xlu0 %v2830_v49 }
0x135c   :  { %v2826_v10 = vpop.xlane.xlu1 %2825 }
0x135d   :  { %v2833_v27 = vmul.f32 0.015625, %v2826_v10  ;;  %v5849_v10 = vld [vmem:[%s8170_s22 + $0xa0] sm:$0xff] }
0x135f   :  { %v8592_v3 = vsub.f32 %v2817_v45, %v2833_v27  ;;  %v5851_v27 = vld [vmem:[%s8170_s22 + $0xb0] sm:$0xff] }
0x1360   :  { %v2829_v58 = vpop.xlane.xlu0 %2828 }
0x1361   :  { %v2834_v63 = vmul.f32 0.015625, %v2829_v58  ;;  %v2839_v35 = vmul.f32 %v8592_v3, %v8592_v3  ;;  %v8623_v58 = vpack.c.bf16 %v5851_v27, %v5849_v10  ;;  %v5866_v27 = vld [vmem:[%s8215_s27 + $0x108] sm:$0xff] }
0x1363   :  { %v8596_v50 = vsub.f32 %v2818_v36, %v2834_v63  ;;  %v2842_v42 = vsel %vm224_vm0, %v2839_v35, 0.0  ;;  %v5847_v36 = vld [vmem:[%s8170_s22 + $0x90] sm:$0xff]  ;;  %v5854_v63 = vld [vmem:[%s8170_s22 + $0xc8] sm:$0xff]  ;;  %v5856_v35 = vld [vmem:[%s8170_s22 + $0xd8] sm:$0xff] }
0x1364   :  { %2843 = vadd.xlane.f32.xlu1 %v2842_v42  ;;  %v2832_v28 = vpop.xlane.xlu0 %2831  ;;  %v8613_v2 = vpack.c.bf16 %v5847_v36, %v5845_v61  ;;  %v8629_v42 = vpack.c.bf16 %v5856_v35, %v5854_v63  ;;  %v8643_v61 = vpack.c.bf16 %v5859_v15, %v5857_v56  ;;  %v5881_v36 = vld [vmem:[%s8215_s27 + $0x180] sm:$0xff]  ;;  %v5883_v63 = vld [vmem:[%s8215_s27 + $0x190] sm:$0xff]  ;;  %v5884_v35 = vld [vmem:[%s8215_s27 + $0x198] sm:$0xff] }
0x1365   :  { %v2835_v24 = vmul.f32 0.015625, %v2832_v28  ;;  %v2840_v60 = vmul.f32 %v8596_v50, %v8596_v50  ;;  %v5853_v28 = vld [vmem:[%s8170_s22 + $0xc0] sm:$0xff]  ;;  %v5886_v56 = vld [vmem:[%s8215_s27 + $0x1a8] sm:$0xff] }
0x1366   :  { %6992 = vmatpush1.bf16.msra.mxu0 %v8613_v2  ;;  %9354 = vst [vmem:[#allocation26_spill] sm:$0xff] %v8643_v61 }
0x1367   :  { %v8601_v18 = vsub.f32 %v2819_v59, %v2835_v24  ;;  %v2845_v0 = vsel %vm224_vm0, %v2840_v60, 0.0  ;;  %v5852_v59 = vld [vmem:[%s8170_s22 + $0xb8] sm:$0xff]  ;;  %v5855_v24 = vld [vmem:[%s8170_s22 + $0xd0] sm:$0xff] }
0x1368   :  { %2846 = vadd.xlane.f32.xlu0 %v2845_v0  ;;  %v8619_v49 = vpack.c.bf16 %v5852_v59, %v5850_v1  ;;  %v8633_v60 = vpack.c.bf16 %v5855_v24, %v5853_v28  ;;  %v5858_v0 = vld [vmem:[%s8170_s22 + $0xe8] sm:$0xff]  ;;  %v5865_v59 = vld [vmem:[%s8215_s27 + $0x100] sm:$0xff]  ;;  %v8658_v24 = vpack.c.bf16 %v5884_v35, %v5883_v63  ;;  %v5888_v63 = vld [vmem:[%s8215_s27 + $0x1b8] sm:$0xff] }
0x1369   :  { %v2841_v45 = vmul.f32 %v8601_v18, %v8601_v18  ;;  %v5882_v1 = vld [vmem:[%s8215_s27 + $0x188] sm:$0xff]  ;;  %v8656_v28 = vpack.c.bf16 %v5866_v27, %v5865_v59  ;;  %v5887_v27 = vld [vmem:[%s8215_s27 + $0x1b0] sm:$0xff] }
0x136a   :  { %6994 = vmatprep.subr.bf16.mxu0 %v8619_v49  ;;  %9352 = vst [vmem:[#allocation24_spill] sm:$0xff] %v8633_v60  ;;  %v8651_v10 = vpack.c.bf16 %v5882_v1, %v5881_v36  ;;  %9356 = vst [vmem:[#allocation28_spill] sm:$0xff] %v8658_v24  ;;  %v5869_v1 = vld [vmem:[%s8215_s27 + $0x120] sm:$0xff]  ;;  %v5870_v59 = vld [vmem:[%s8215_s27 + $0x128] sm:$0xff] }
0x136b   :  { %v2848_v52 = vsel %vm1667_vm14, %v2841_v45, 0.0  ;;  %6996 = vmatpush1.bf16.msra.mxu0 %v8623_v58  ;;  %v5860_v45 = vld [vmem:[%s8170_s22 + $0xf8] sm:$0xff]  ;;  %9355 = vst [vmem:[#allocation27_spill] sm:$0xff] %v8656_v28  ;;  %v8676_v35 = vpack.c.bf16 %v5870_v59, %v5869_v1  ;;  %v5873_v59 = vld [vmem:[%s8215_s27 + $0x140] sm:$0xff]  ;;  %s7633_s22 = smov 1  }
0x136c   :  { %2849 = vadd.xlane.f32.xlu1 %v2848_v52  ;;  %6998 = vmatprep.subr.bf16.mxu0 %v8629_v42  ;;  %v8639_v52 = vpack.c.bf16 %v5860_v45, %v5858_v0  ;;  %v5867_v0 = vld [vmem:[%s8215_s27 + $0x110] sm:$0xff]  ;;  %v5868_v45 = vld [vmem:[%s8215_s27 + $0x118] sm:$0xff]  ;;  %s9187_s4 = sld [smem:[%s9281_s0 + %s7633_s22]]  }
0x136d   :  { %7006 = vmatprep.subr.bf16.mxu1 %v8651_v10  ;;  %v8666_v15 = vpack.c.bf16 %v5868_v45, %v5867_v0  ;;  %9359 = vst [vmem:[#allocation31_spill] sm:$0xff] %v8676_v35  ;;  %v8679_v0 = vpack.c.bf16 %v5888_v63, %v5887_v27  ;;  %v5871_v45 = vld [vmem:[%s8215_s27 + $0x130] sm:$0xff]  ;;  %v5892_v63 = vld [vmem:[%s8215_s27 + $0x1d8] sm:$0xff] }
0x136e   :  { %9353 = vst [vmem:[#allocation25_spill] sm:$0xff] %v8639_v52  ;;  %7008 = vmatpush3.bf16.msra.mxu1 %v8656_v28  ;;  %v5891_v27 = vld [vmem:[%s8215_s27 + $0x1d0] sm:$0xff] }
0x136f   :  { %7000 = vmatpush1.bf16.msra.mxu0 %v8633_v60  ;;  %9357 = vst [vmem:[#allocation29_spill] sm:$0xff] %v8666_v15  ;;  %7010 = vmatprep.subr.bf16.mxu1 %v8658_v24  ;;  %9360 = vst [vmem:[#allocation32_spill] sm:$0xff] %v8679_v0  ;;  %v8699_v24 = vpack.c.bf16 %v5892_v63, %v5891_v27  ;;  %v5875_v60 = vld [vmem:[%s8215_s27 + $0x150] sm:$0xff] }
0x1370   :  { %7002 = vmatprep.subr.bf16.mxu0 %v8639_v52 }
0x1371   :  { %9364 = vst [vmem:[#allocation36_spill] sm:$0xff] %v8699_v24 }
0x1372   :  { %7012 = vmatpush3.bf16.msra.mxu1 %v8666_v15 }
0x1373   :  { %7004 = vmatpush1.bf16.msra.mxu0 %v8643_v61  ;;  %v5890_v61 = vld [vmem:[%s8215_s27 + $0x1c8] sm:$0xff] }
0x1374   :  { %7038 = vmatprep.subr.bf16.mxu0 %v7877_v9  ;;  %v5885_v9 = vld [vmem:[%s8215_s27 + $0x1a0] sm:$0xff] }
0x1375   :  { %v8669_v36 = vpack.c.bf16 %v5886_v56, %v5885_v9  ;;  %v5872_v9 = vld [vmem:[%s8215_s27 + $0x138] sm:$0xff]  ;;  %v5889_v56 = vld [vmem:[%s8215_s27 + $0x1c0] sm:$0xff] }
0x1376   :  { %v8686_v52 = vpack.c.bf16 %v5872_v9, %v5871_v45  ;;  %v8689_v1 = vpack.c.bf16 %v5890_v61, %v5889_v56  ;;  %v5893_v45 = vld [vmem:[%s8215_s27 + $0x1e0] sm:$0xff]  ;;  %v5894_v9 = vld [vmem:[%s8215_s27 + $0x1e8] sm:$0xff] }
0x1377   :  { %9358 = vst [vmem:[#allocation30_spill] sm:$0xff] %v8669_v36  ;;  %7014 = vmatprep.subr.bf16.mxu1 %v8669_v36  ;;  %v5874_v36 = vld [vmem:[%s8215_s27 + $0x148] sm:$0xff]  ;;  %v8709_v56 = vpack.c.bf16 %v5894_v9, %v5893_v45  ;;  %v5843_v9 = vld [vmem:[%s8285_s2 + $0x1] ss:$0 sm:$0xff] }
0x1378   :  { %7016 = vmatpush3.bf16.msra.mxu1 %v8676_v35  ;;  %9361 = vst [vmem:[#allocation33_spill] sm:$0xff] %v8686_v52  ;;  %9362 = vst [vmem:[#allocation34_spill] sm:$0xff] %v8689_v1  ;;  %v8696_v15 = vpack.c.bf16 %v5874_v36, %v5873_v59  ;;  %v5876_v35 = vld [vmem:[%s8215_s27 + $0x158] sm:$0xff] }
0x1379   :  { %7018 = vmatprep.subr.bf16.mxu1 %v8679_v0  ;;  %v8706_v61 = vpack.c.bf16 %v5876_v35, %v5875_v60  ;;  %9366 = vst [vmem:[#allocation38_spill] sm:$0xff] %v8709_v56 }
0x137a   :  { %9363 = vst [vmem:[#allocation35_spill] sm:$0xff] %v8696_v15 }
0x137b   :  { %9365 = vst [vmem:[#allocation37_spill] sm:$0xff] %v8706_v61 }
0x137c   :  { %7020 = vmatpush3.bf16.msra.mxu1 %v8686_v52 }
0x137d   :  { %7022 = vmatprep.subr.bf16.mxu1 %v8689_v1 }
0x1380   :  { %7024 = vmatpush3.bf16.msra.mxu1 %v8696_v15 }
0x1381   :  { %7026 = vmatprep.subr.bf16.mxu1 %v8699_v24  ;;  %v5844_v24 = vld [vmem:[%s8290_s10 + $0x1] ss:$0 sm:$0xff] }
0x1384   :  { %7028 = vmatpush3.bf16.msra.mxu1 %v8706_v61 }
0x1385   :  { %7030 = vmatprep.subr.bf16.mxu1 %v8709_v56 }
0x13f1   :  { %v2844_v36 = vpop.xlane.xlu1 %2843 }
0x13f2   :  { %v2851_v59 = vmul.f32 0.015625, %v2844_v36 }
0x13f4   :  { %v2854_v27 = vadd.f32 1e-05, %v2851_v59  ;;  %v5896_v59 = vld [vmem:[%s8215_s27 + $0x1f8] sm:$0xff] }
0x13f5   :  { %v2847_v63 = vpop.xlane.xlu0 %2846 }
0x13f6   :  { %7504 = vrsqrt.f32 %v2854_v27  ;;  %v2852_v1 = vmul.f32 0.015625, %v2847_v63  ;;  %v5879_v63 = vld [vmem:[%s8215_s27 + $0x170] sm:$0xff] }
0x13f8   :  { %v2855_v52 = vadd.f32 1e-05, %v2852_v1 }
0x13f9   :  { %v2850_v15 = vpop.xlane.xlu1 %2849 }
0x13fa   :  { %7506 = vrsqrt.f32 %v2855_v52  ;;  %v2853_v60 = vmul.f32 0.015625, %v2850_v15 }
0x13fc   :  { %v2856_v35 = vadd.f32 1e-05, %v2853_v60  ;;  %v5880_v60 = vld [vmem:[%s8215_s27 + $0x178] sm:$0xff] }
0x13fe   :  { %7508 = vrsqrt.f32 %v2856_v35  ;;  %v8770_v35 = vpack.c.bf16 %v5880_v60, %v5879_v63 }
0x1400   :  { %v7505_v45 = vpop.eup %7504 }
0x1401   :  { %v2860_v61 = vmul.f32 %v7505_v45, %v8592_v3  ;;  %v5861_v45 = vld [vmem:[%s8331_s15 + $0x2] sm:$0x3] }
0x1403   :  { %v2869_v56 = vmul.f32 %v5843_v9, %v2860_v61  ;;  %v760_v61 = vld [vmem:[%s7929_s25 + $0x10] sm:$0xff] }
0x1404   :  { %v7507_v0 = vpop.eup %7506 }
0x1405   :  { %v8716_v28 = vadd.f32 %v5844_v24, %v2869_v56  ;;  %v2861_v36 = vmul.f32 %v7507_v0, %v8596_v50  ;;  %v761_v0 = vld [vmem:[%s7929_s25 + $0x18] sm:$0xff]  ;;  %s7631_s25 = smov 25  }
0x1407   :  { %5862 = vmatmul.mubr.msk.f32.vlgmr.msra.gmra.mrb[56].mxu0 %vm224_vm0, %v8716_v28  ;;  %v2870_v52 = vmul.f32 %v5843_v9, %v2861_v36  ;;  %v8780_v36 = vrot.slane %v5861_v45, %v7974_v47 }
0x1408   :  { %v7509_v15 = vpop.eup %7508  ;;  %7040 = vmatpush1.bf16.msra.mxu0 %v7882_v13  ;;  %2990 = vmatprep.mubr.f32.mxu0 %v9348_v48  ;;  %v851_v13 = vadd.f32 %v8053_v41, %v760_v61  ;;  %v7588_v41 = vld [vmem:[%s7936_s29] sm:$0x1]  ;;  %s5723_s29 = sld [smem:[%s9281_s0 + %s7638_s1]]  }
0x1409   :  { %7042 = vmatprep.subr.bf16.mxu0 %v7884_v14  ;;  %v2879_v3 = vadd.f32 %v5844_v24, %v2870_v52  ;;  %v2862_v1 = vmul.f32 %v7509_v15, %v8601_v18  ;;  %v856_v14 = vadd.f32 %v8051_v40, %v761_v0  ;;  %v5878_v40 = vld [vmem:[%s8215_s27 + $0x168] sm:$0xff] }
0x140b   :  { %5863 = vmatmul.mubr.msk.f32.gmra.mrb[58].mxu0 %vm224_vm0, %v2879_v3  ;;  %v2871_v56 = vmul.f32 %v5843_v9, %v2862_v1  ;;  %v8777_v9 = vrot.slane %v5861_v45, %v7971_v34 }
0x140c   :  { %7044 = vmatpush1.bf16.msra.mxu0 %v7892_v17  ;;  %2996 = vmatprep.mubr.f32.mxu0 %v9348_v48  ;;  %v3162_v17 = vrot.slane %v851_v13, 7 }
0x140d   :  { %7046 = vmatprep.subr.bf16.mxu0 %v7898_v62  ;;  %v2880_v50 = vadd.f32 %v5844_v24, %v2871_v56  ;;  %v8739_v62 = vrot.slane %v856_v14, 7  ;;  %v5895_v24 = vld [vmem:[%s8215_s27 + $0x1f0] sm:$0xff] }
0x140e   :  { %v8766_v27 = vpack.c.bf16 %v5896_v59, %v5895_v24 }
0x140f   :  { %5864 = vmatmul.mubr.msk.f32.gmra.mrb[60].mxu0 %vm224_vm0, %v2880_v50 }
0x1410   :  { %7048 = vmatpush1.bf16.msra.mxu0 %v7902_v22  ;;  %3240 = vmatprep.mubr.f32.mxu0 %v9348_v48  ;;  %v8743_v22 = vsel %vm862_vm7, %v7588_v41, %v3162_v17 }
0x1411   :  { %7050 = vmatprep.subr.bf16.mxu0 %v7908_v25  ;;  %v8750_v25 = vsel %vm862_vm7, %v3162_v17, %v8739_v62 }
0x1414   :  { %7052 = vmatpush1.bf16.msra.mxu0 %v7912_v29  ;;  %v5877_v29 = vld [vmem:[%s8215_s27 + $0x160] sm:$0xff] }
0x1415   :  { %7053 = vmatprep.subr.bf16.mxu0 %v9347_v31  ;;  %v8761_v18 = vpack.c.bf16 %v5878_v40, %v5877_v29 }
0x1417   :  { %5903 = vmatmul.mubr.msk.f32.vlgmr.msra.gmra.mrb[62].mxu0 %vm224_vm0, %v8743_v22  ;;  %7032 = vmatpush3.bf16.msra.mxu1 %v8761_v18 }
0x1418   :  { %3246 = vmatprep.mubr.f32.mxu0 %v9348_v48  ;;  %7034 = vmatprep.subr.bf16.mxu1 %v8766_v27 }
0x141b   :  { %5904 = vmatmul.mubr.msk.f32.gmra.mrb[64].mxu0 %vm224_vm0, %v8750_v25  ;;  %7036 = vmatpush3.bf16.msra.mxu1 %v8770_v35 }
0x141c   :  { %3252 = vmatprep.mubr.f32.mxu0 %v9348_v48  ;;  %7057 = vmatprep.subr.bf16.mxu1 %v9347_v31 }
0x141f   :  { %5905 = vmatmul.mubr.msk.f32.gmra.mrb[66].mxu0 %vm224_vm0, %v8739_v62 }
0x1420   :  { %6547 = vmatprep.mubr.msk.f32.mxu0 %vm7618_vm10, %v9348_v48 }
0x14da   :  { %v2986_v52 = vpop.f32.mrb[56].mxu0 }
0x14db   :  { %v2987_v15 = vadd.f32 %v2986_v52, %v8777_v9  ;;  %v2988_v3 = vpop.f32.mrb[57].mxu0 }
0x14dc   :  { %v2989_v1 = vadd.f32 %v2988_v3, %v8780_v36 }
0x14dd   :  { %v3003_v50 = vmax.f32 %v2987_v15, 0.0 }
0x14de   :  { %v3004_v61 = vmax.f32 %v2989_v1, 0.0  ;;  %v2992_v56 = vpop.f32.mrb[58].mxu0 }
0x14df   :  { %v2993_v13 = vadd.f32 %v2992_v56, %v8777_v9  ;;  %v2994_v0 = vpop.f32.mrb[59].mxu0 }
0x14e0   :  { %v2995_v14 = vadd.f32 %v2994_v0, %v8780_v36  ;;  %3114 = vmatprep.mubr.f32.mxu1 %v3004_v61 }
0x14e1   :  { %3115 = vmatmul.mubr.f32.vlgmr.msra.gmra.mrb[64].mxu1 %v3003_v50  ;;  %v3005_v47 = vmax.f32 %v2993_v13, 0.0 }
0x14e2   :  { %v3006_v34 = vmax.f32 %v2995_v14, 0.0  ;;  %v2998_v17 = vpop.f32.mrb[60].mxu0 }
0x14e3   :  { %v2999_v41 = vadd.f32 %v2998_v17, %v8777_v9  ;;  %v3000_v29 = vpop.f32.mrb[61].mxu0 }
0x14e4   :  { %v3001_v40 = vadd.f32 %v3000_v29, %v8780_v36  ;;  %3119 = vmatprep.mubr.f32.mxu1 %v3006_v34 }
0x14e5   :  { %3120 = vmatmul.mubr.f32.gmra.mrb[66].mxu1 %v3005_v47  ;;  %v3007_v59 = vmax.f32 %v2999_v41, 0.0 }
0x14e6   :  { %v3008_v24 = vmax.f32 %v3001_v40, 0.0 }
0x14e8   :  { %3123 = vmatprep.mubr.f32.mxu1 %v3008_v24 }
0x14e9   :  { %3124 = vmatmul.mubr.f32.gmra.mrb[68].mxu1 %v3007_v59 }
0x14ea   :  { %v3242_v63 = vpop.f32.mrb[62].mxu0  ;;  %6562 = vmatprep.mubr.msk.f32.mxu1 %vm7618_vm10, %v9348_v48 }
0x14eb   :  { %v3244_v60 = vpop.f32.mrb[63].mxu0  ;;  %v3243_v52 = vadd.f32 %v3242_v63, %v7977_v39 }
0x14ec   :  { %v8793_v1 = vadd.f32 %v3244_v60, %v7980_v46 }
0x14ee   :  { %v3248_v45 = vpop.f32.mrb[64].mxu0 }
0x14ef   :  { %v3249_v15 = vadd.f32 %v3248_v45, %v7977_v39  ;;  %v3250_v3 = vpop.f32.mrb[65].mxu0 }
0x14f0   :  { %v8796_v61 = vadd.f32 %v3250_v3, %v7980_v46 }
0x14f1   :  { %v7358_v56 = vpack.i.bf16 %v3249_v15, %v3243_v52 }
0x14f2   :  { %v7058_v13 = vpack.c.bf16 %v8796_v61, %v8793_v1  ;;  %v3254_v0 = vpop.f32.mrb[66].mxu0 }
0x14f3   :  { %v3255_v14 = vadd.f32 %v3254_v0, %v7977_v39  ;;  %v3256_v34 = vpop.f32.mrb[67].mxu0  ;;  %7359 = vrot.lane.b32.xlu0 %v7358_v56, %s7617_s7 }
0x14f4   :  { %7059 = vmatpush3.bf16.msra.mxu1 %v7058_v13  ;;  %v8807_v17 = vadd.f32 %v3256_v34, %v7980_v46 }
0x14f5   :  { %3266 = vrot.lane.b32.xlu1 %v3255_v14, %s7617_s7  ;;  %6560 = vmatprep.subr.mxu1 %v9348_v48 }
0x14f7   :  { %3498 = vrot.lane.b32.xlu0 %v3255_v14, %s7619_s8 }
0x14f8   :  { %6561 = vmatpush3.msk.msra.mxu1 %vm862_vm7, %v8807_v17 }
0x14f9   :  { %7364 = vrot.lane.b32.xlu1 %v7358_v56, %s7619_s8  ;;  %7064 = vmatprep.subr.bf16.mxu1 %v9347_v31 }
0x14fb   :  { %3490 = vrot.lane.b32.xlu0 %v3249_v15, %s7620_s9 }
0x14fd   :  { %3488 = vrot.lane.b32.xlu1 %v3243_v52, %s7620_s9 }
0x1501   :  { %3492 = vrot.lane.b32.xlu1 %v3255_v14, %s7620_s9 }
0x1565   :  { %v7360_v39 = vpop.permute.xlu0 %7359 }
0x1566   :  { %v7362_v47 = vunpack.i.h.bf16 %v7360_v39  ;;  %v7361_v41 = vunpack.i.l.bf16 %v7360_v39 }
0x1567   :  { %v3267_v46 = vpop.permute.xlu1 %3266 }
0x1568   :  { %v7054_v29 = vpack.c.bf16 %v7362_v47, %v7361_v41 }
0x1569   :  { %v3499_v60 = vpop.permute.xlu0 %3498 }
0x156a   :  { %7056 = vmatpush3.bf16.xpose.msk.msra.mxu0 %vm8012_vm11, %v7054_v29 }
0x156b   :  { %6545 = vmatprep.subr.mxu0 %v9348_v48  ;;  %v7365_v40 = vpop.permute.xlu1 %7364 }
0x156c   :  { %v7367_v24 = vunpack.i.h.bf16 %v7365_v40  ;;  %v7366_v59 = vunpack.i.l.bf16 %v7365_v40 }
0x156e   :  { %v7061_v63 = vpack.c.bf16 %v7367_v24, %v7366_v59 }
0x156f   :  { %v3489_v45 = vpop.permute.xlu1 %3488 }
0x1572   :  { %6546 = vmatpush3.xpose.msk.msra.mxu0 %vm586_vm1, %v3267_v46 }
0x1573   :  { %7060 = vmatprep.subr.bf16.mxu0 %v9347_v31 }
0x1575   :  { %6548 = vmatmul.mubr.msk.f32.vlgmr.msra.gmra.mrb[68].mxu0 %vm586_vm1, %v3243_v52  ;;  %v3491_v52 = vpop.permute.xlu0 %3490 }
0x1576   :  { %7063 = vmatpush3.bf16.xpose.msk.msra.mxu0 %vm8012_vm11, %v7061_v63  ;;  %6550 = vmatprep.mubr.msk.f32.mxu0 %vm7618_vm10, %v9348_v48 }
0x1577   :  { %6575 = vmatprep.subr.mxu0 %v9348_v48 }
0x1579   :  { %6551 = vmatmul.mubr.msk.f32.gmra.mrb[70].mxu0 %vm586_vm1, %v3249_v15  ;;  %v3493_v15 = vpop.permute.xlu1 %3492 }
0x157a   :  { %6553 = vmatprep.mubr.msk.f32.mxu0 %vm7618_vm10, %v9348_v48 }
0x157d   :  { %6554 = vmatmul.mubr.msk.f32.gmra.mrb[72].mxu0 %vm586_vm1, %v3255_v14 }
0x157e   :  { %6576 = vmatpush3.xpose.msk.msra.mxu0 %vm586_vm1, %v3499_v60  ;;  %6577 = vmatprep.mubr.msk.f32.mxu0 %vm7618_vm10, %v9348_v48 }
0x157f   :  { %7067 = vmatprep.subr.bf16.mxu0 %v9347_v31 }
0x1581   :  { %6578 = vmatmul.mubr.msk.f32.vlgmr.msra.gmra.mrb[74].mxu0 %vm586_vm1, %v3489_v45 }
0x1582   :  { %6580 = vmatprep.mubr.msk.f32.mxu0 %vm7618_vm10, %v9348_v48  ;;  %7069 = vmatpush3.bf16.msra.mxu0 %v8116_v57 }
0x1583   :  { %7070 = vmatprep.subr.bf16.mxu0 %v9347_v31 }
0x1585   :  { %6581 = vmatmul.mubr.msk.f32.gmra.mrb[76].mxu0 %vm586_vm1, %v3491_v52 }
0x1586   :  { %6583 = vmatprep.mubr.msk.f32.mxu0 %vm7618_vm10, %v9348_v48  ;;  %7072 = vmatpush3.bf16.msra.mxu0 %v8122_v44 }
0x1587   :  { %7080 = vmatprep.subr.bf16.mxu0 %v8174_v4 }
0x1589   :  { %6584 = vmatmul.mubr.msk.f32.gmra.mrb[78].mxu0 %vm586_vm1, %v3493_v15 }
0x158a   :  { %6609 = vmatprep.mubr.msk.f32.mxu0 %vm7618_vm10, %v9348_v48 }
0x15b4   :  { %v6142_v3 = vpop.f32.mrb[64].mxu1 }
0x15b5   :  { %v6143_v57 = vpop.f32.mrb[65].mxu1 }
0x15b6   :  { %v8849_v56 = vadd.f32 %v6143_v57, %v6142_v3 }
0x15b8   :  { %v6145_v13 = vpop.f32.mrb[66].mxu1 }
0x15b9   :  { %v6146_v0 = vpop.f32.mrb[67].mxu1 }
0x15bc   :  { %v6148_v14 = vpop.f32.mrb[68].mxu1 }
0x15bd   :  { %v6149_v34 = vpop.f32.mrb[69].mxu1 }
0x1648   :  { %v3346_v39 = vpop.f32.mrb[68].mxu0 }
0x1649   :  { %v3360_v47 = vmul.f32 0.17677669, %v3346_v39  ;;  %v6549_v41 = vpop.f32.mrb[69].mxu0 }
0x164b   :  { %v3363_v44 = vsel %vm1100_vm12, %v3360_v47, -inf }
0x164c   :  { %3364 = vmax.xlane.f32.xlu0 %v3363_v44  ;;  %v3351_v4 = vpop.f32.mrb[70].mxu0 }
0x164d   :  { %v3361_v46 = vmul.f32 0.17677669, %v3351_v4  ;;  %v6552_v29 = vpop.f32.mrb[71].mxu0 }
0x164f   :  { %v3366_v40 = vsel %vm1100_vm12, %v3361_v46, -inf }
0x1650   :  { %3367 = vmax.xlane.f32.xlu1 %v3366_v40  ;;  %v3356_v24 = vpop.f32.mrb[72].mxu0 }
0x1651   :  { %v3362_v59 = vmul.f32 0.17677669, %v3356_v24  ;;  %v6555_v63 = vpop.f32.mrb[73].mxu0 }
0x1653   :  { %v3369_v60 = vsel %vm1107_vm13, %v3362_v59, -inf }
0x1654   :  { %3370 = vmax.xlane.f32.xlu0 %v3369_v60  ;;  %v3578_v45 = vpop.f32.mrb[74].mxu0 }
0x1655   :  { %v3592_v52 = vmul.f32 0.17677669, %v3578_v45  ;;  %v6579_v15 = vpop.f32.mrb[75].mxu0 }
0x1657   :  { %v3595_v3 = vsel %vm1100_vm12, %v3592_v52, -inf }
0x1658   :  { %3596 = vmax.xlane.f32.xlu0 %v3595_v3  ;;  %v3583_v57 = vpop.f32.mrb[76].mxu0 }
0x1659   :  { %v3593_v13 = vmul.f32 0.17677669, %v3583_v57  ;;  %v6582_v0 = vpop.f32.mrb[77].mxu0 }
0x165b   :  { %v3598_v14 = vsel %vm1100_vm12, %v3593_v13, -inf }
0x165c   :  { %3599 = vmax.xlane.f32.xlu1 %v3598_v14  ;;  %v3588_v34 = vpop.f32.mrb[78].mxu0 }
0x165d   :  { %v3594_v39 = vmul.f32 0.17677669, %v3588_v34  ;;  %v6585_v41 = vpop.f32.mrb[79].mxu0 }
0x165f   :  { %v3601_v44 = vsel %vm1107_vm13, %v3594_v39, -inf }
0x1660   :  { %3602 = vmax.xlane.f32.xlu0 %v3601_v44 }
0x16d9   :  { %v3365_v4 = vpop.xlane.xlu0 %3364 }
0x16da   :  { %v3372_v29 = vsub.f32 %v3360_v47, %v3365_v4 }
0x16dc   :  { %v3375_v40 = vmul.f32 1.442695, %v3372_v29 }
0x16dd   :  { %v3368_v24 = vpop.xlane.xlu1 %3367 }
0x16de   :  { %7510 = vpow2.f32 %v3375_v40  ;;  %v3373_v63 = vsub.f32 %v3361_v46, %v3368_v24 }
0x16e0   :  { %v3377_v60 = vmul.f32 1.442695, %v3373_v63 }
0x16e1   :  { %v3371_v45 = vpop.xlane.xlu0 %3370 }
0x16e2   :  { %7512 = vpow2.f32 %v3377_v60  ;;  %v3374_v15 = vsub.f32 %v3362_v59, %v3371_v45 }
0x16e4   :  { %v3379_v3 = vmul.f32 1.442695, %v3374_v15 }
0x16e5   :  { %v3597_v57 = vpop.xlane.xlu0 %3596 }
0x16e6   :  { %7514 = vpow2.f32 %v3379_v3  ;;  %v3604_v0 = vsub.f32 %v3592_v52, %v3597_v57 }
0x16e8   :  { %v7511_v14 = vpop.eup %7510  ;;  %v3607_v34 = vmul.f32 1.442695, %v3604_v0 }
0x16e9   :  { %v3600_v41 = vpop.xlane.xlu1 %3599  ;;  %v3381_v50 = vsel %vm1100_vm12, %v7511_v14, 0.0 }
0x16ea   :  { %7516 = vpow2.f32 %v3607_v34  ;;  %v3605_v44 = vsub.f32 %v3593_v13, %v3600_v41  ;;  %3382 = vadd.xlane.f32.xlu1 %v3381_v50 }
0x16ec   :  { %v7513_v47 = vpop.eup %7512  ;;  %v3609_v4 = vmul.f32 1.442695, %v3605_v44 }
0x16ed   :  { %v3603_v29 = vpop.xlane.xlu0 %3602  ;;  %v3384_v46 = vsel %vm1100_vm12, %v7513_v47, 0.0 }
0x16ee   :  { %7518 = vpow2.f32 %v3609_v4  ;;  %v3606_v40 = vsub.f32 %v3594_v39, %v3603_v29  ;;  %3385 = vadd.xlane.f32.xlu0 %v3384_v46  ;;  %v9367_v39 = vpack.i.bf16 %v8796_v61, %v8793_v1 }
0x16f0   :  { %v7515_v59 = vpop.eup %7514  ;;  %v3611_v24 = vmul.f32 1.442695, %v3606_v40 }
0x16f1   :  { %v3387_v52 = vsel %vm1107_vm13, %v7515_v59, 0.0 }
0x16f2   :  { %7520 = vpow2.f32 %v3611_v24  ;;  %3388 = vadd.xlane.f32.xlu1 %v3387_v52 }
0x16f4   :  { %v7517_v63 = vpop.eup %7516 }
0x16f5   :  { %v3613_v60 = vsel %vm1100_vm12, %v7517_v63, 0.0 }
0x16f6   :  { %3614 = vadd.xlane.f32.xlu0 %v3613_v60 }
0x16f8   :  { %v7519_v13 = vpop.eup %7518 }
0x16f9   :  { %v3616_v50 = vsel %vm1100_vm12, %v7519_v13, 0.0 }
0x16fa   :  { %3617 = vadd.xlane.f32.xlu1 %v3616_v50 }
0x16fc   :  { %v7521_v45 = vpop.eup %7520 }
0x16fd   :  { %v3619_v15 = vsel %vm1107_vm13, %v7521_v45, 0.0 }
0x16fe   :  { %3620 = vadd.xlane.f32.xlu0 %v3619_v15 }
0x170b   :  { %7369 = vrot.lane.b32.xlu1 %v9367_v39, %s7620_s9 }
0x1714   :  { %3634 = vrot.lane.b32.xlu0 %v8807_v17, %s7620_s9 }
0x1777   :  { %v3383_v3 = vpop.xlane.xlu1 %3382 }
0x1778   :  { %7522 = vrcp.f32 %v3383_v3 }
0x177b   :  { %v3386_v57 = vpop.xlane.xlu0 %3385 }
0x177c   :  { %7524 = vrcp.f32 %v3386_v57  ;;  %v9375_v57 = vld [vmem:[#allocation6_spill] sm:$0xff] }
0x177f   :  { %v3389_v0 = vpop.xlane.xlu1 %3388 }
0x1780   :  { %7526 = vrcp.f32 %v3389_v0  ;;  %v9376_v0 = vld [vmem:[#allocation11_spill] sm:$0xff] }
0x1782   :  { %v7523_v34 = vpop.eup %7522 }
0x1783   :  { %v3391_v41 = vmul.f32 %v7523_v34, %v7511_v14  ;;  %v3615_v44 = vpop.xlane.xlu0 %3614  ;;  %v9377_v34 = vld [vmem:[#allocation14_spill] sm:$0xff] }
0x1784   :  { %7528 = vrcp.f32 %v3615_v44 }
0x1785   :  { %6563 = vmatmul.mubr.msk.f32.vlgmr.msra.gmra.mrb[70].mxu1 %vm1100_vm12, %v3391_v41 }
0x1786   :  { %v7525_v4 = vpop.eup %7524  ;;  %6565 = vmatprep.mubr.msk.f32.mxu1 %vm7618_vm10, %v9348_v48 }
0x1787   :  { %v3618_v1 = vpop.xlane.xlu1 %3617  ;;  %v3393_v61 = vmul.f32 %v7525_v4, %v7513_v47 }
0x1788   :  { %7530 = vrcp.f32 %v3618_v1 }
0x1789   :  { %6566 = vmatmul.mubr.msk.f32.gmra.mrb[72].mxu1 %vm1100_vm12, %v3393_v61 }
0x178a   :  { %v7527_v17 = vpop.eup %7526  ;;  %6568 = vmatprep.mubr.msk.f32.mxu1 %vm7618_vm10, %v9348_v48 }
0x178b   :  { %v7370_v29 = vpop.permute.xlu1 %7369  ;;  %v3621_v46 = vpop.xlane.xlu0 %3620  ;;  %v3395_v14 = vmul.f32 %v7527_v17, %v7515_v59 }
0x178c   :  { %v7372_v40 = vunpack.i.h.bf16 %v7370_v29  ;;  %v7371_v24 = vunpack.i.l.bf16 %v7370_v29  ;;  %7532 = vrcp.f32 %v3621_v46 }
0x178d   :  { %6569 = vmatmul.mubr.msk.f32.gmra.mrb[74].mxu1 %vm1100_vm12, %v3395_v14 }
0x178e   :  { %v7065_v52 = vpack.c.bf16 %v7372_v40, %v7371_v24  ;;  %6592 = vmatprep.mubr.msk.f32.mxu1 %vm7618_vm10, %v9348_v48  ;;  %v7529_v47 = vpop.eup %7528  ;;  %v7589_v40 = vld [vmem:[%s8143_s17] ss:$0 sm:$0xff] }
0x178f   :  { %v3623_v60 = vmul.f32 %v7529_v47, %v7517_v63  ;;  %v3635_v50 = vpop.permute.xlu0 %3634 }
0x1790   :  { %7066 = vmatpush3.bf16.msra.mxu1 %v7065_v52 }
0x1791   :  { %6590 = vmatprep.subr.mxu1 %v9348_v48 }
0x1792   :  { %v7531_v15 = vpop.eup %7530 }
0x1793   :  { %v3625_v59 = vmul.f32 %v7531_v15, %v7519_v13 }
0x1794   :  { %6591 = vmatpush3.msk.msra.mxu1 %vm862_vm7, %v3635_v50 }
0x1795   :  { %6593 = vmatmul.mubr.msk.f32.vlgmr.msra.gmra.mrb[76].mxu1 %vm1100_vm12, %v3623_v60  ;;  %7073 = vmatprep.subr.bf16.mxu1 %v9347_v31 }
0x1796   :  { %6595 = vmatprep.mubr.msk.f32.mxu1 %vm7618_vm10, %v9348_v48  ;;  %7075 = vmatpush3.bf16.msra.mxu1 %v8095_v23  ;;  %v7533_v39 = vpop.eup %7532 }
0x1797   :  { %7076 = vmatprep.subr.bf16.mxu1 %v9347_v31  ;;  %v3627_v63 = vmul.f32 %v7533_v39, %v7521_v45 }
0x1799   :  { %6596 = vmatmul.mubr.msk.f32.gmra.mrb[78].mxu1 %vm1100_vm12, %v3625_v59 }
0x179a   :  { %6598 = vmatprep.mubr.msk.f32.mxu1 %vm7618_vm10, %v9348_v48  ;;  %7078 = vmatpush3.bf16.msra.mxu1 %v8103_v30 }
0x179b   :  { %7096 = vmatprep.subr.bf16.mxu1 %v8220_v38 }
0x179d   :  { %6599 = vmatmul.mubr.msk.f32.gmra.mrb[80].mxu1 %vm1100_vm12, %v3627_v63 }
0x179e   :  { %6626 = vmatprep.mubr.msk.f32.mxu1 %vm7618_vm10, %v9348_v48 }
0x1858   :  { %v3474_v23 = vpop.f32.mrb[70].mxu1 }
0x1859   :  { %v6564_v13 = vpop.f32.mrb[71].mxu1  ;;  %6627 = vmatmul.mubr.msk.f32.vlgmr.msra.gmra.mrb[82].mxu1 %vm586_vm1, %v3474_v23 }
0x185a   :  { %6629 = vmatprep.mubr.msk.f32.mxu1 %vm7618_vm10, %v9348_v48  ;;  %7098 = vmatpush3.bf16.msra.mxu1 %v8225_v26 }
0x185b   :  { %7100 = vmatprep.subr.bf16.mxu1 %v8227_v19 }
0x185c   :  { %v3479_v30 = vpop.f32.mrb[72].mxu1 }
0x185d   :  { %v6567_v45 = vpop.f32.mrb[73].mxu1  ;;  %6630 = vmatmul.mubr.msk.f32.gmra.mrb[84].mxu1 %vm586_vm1, %v3479_v30 }
0x185e   :  { %6632 = vmatprep.mubr.msk.f32.mxu1 %vm7618_vm10, %v9348_v48  ;;  %7102 = vmatpush3.bf16.msra.mxu1 %v8235_v51 }
0x185f   :  { %7104 = vmatprep.subr.bf16.mxu1 %v8238_v55 }
0x1860   :  { %v3484_v38 = vpop.f32.mrb[74].mxu1 }
0x1861   :  { %v6570_v3 = vpop.f32.mrb[75].mxu1  ;;  %6633 = vmatmul.mubr.msk.f32.gmra.mrb[86].mxu1 %vm586_vm1, %v3484_v38 }
0x1862   :  { %7106 = vmatpush3.bf16.msra.mxu1 %v8245_v6  ;;  %v9368_v6 = vld [vmem:[#allocation3_spill] sm:$0xff] }
0x1863   :  { %7108 = vmatprep.subr.bf16.mxu1 %v8248_v8  ;;  %v9369_v8 = vld [vmem:[#allocation7_spill] sm:$0xff] }
0x1866   :  { %7110 = vmatpush3.bf16.msra.mxu1 %v8255_v12  ;;  %v9370_v12 = vld [vmem:[#allocation8_spill] sm:$0xff] }
0x1867   :  { %7112 = vmatprep.subr.bf16.mxu1 %v8258_v16  ;;  %v9371_v16 = vld [vmem:[#allocation4_spill] sm:$0xff] }
0x1868   :  { %v3715_v26 = vpop.f32.mrb[76].mxu1 }
0x1869   :  { %v6594_v19 = vpop.f32.mrb[77].mxu1  ;;  %6610 = vmatmul.mubr.msk.f32.vlgmr.msra.gmra.mrb[80].mxu0 %vm586_vm1, %v3715_v26 }
0x186a   :  { %6612 = vmatprep.mubr.msk.f32.mxu0 %vm7618_vm10, %v9348_v48  ;;  %7082 = vmatpush1.bf16.msra.mxu0 %v8178_v7 }
0x186b   :  { %7084 = vmatprep.subr.bf16.mxu0 %v8184_v11  ;;  %7114 = vmatpush3.bf16.msra.mxu1 %v8265_v53  ;;  %v9372_v53 = vld [vmem:[#allocation5_spill] sm:$0xff] }
0x186c   :  { %v3720_v51 = vpop.f32.mrb[78].mxu1  ;;  %7116 = vmatprep.subr.bf16.mxu1 %v8268_v33  ;;  %v9373_v33 = vld [vmem:[#allocation9_spill] sm:$0xff] }
0x186d   :  { %v6597_v55 = vpop.f32.mrb[79].mxu1  ;;  %6613 = vmatmul.mubr.msk.f32.gmra.mrb[82].mxu0 %vm586_vm1, %v3720_v51 }
0x186e   :  { %6615 = vmatprep.mubr.msk.f32.mxu0 %vm7618_vm10, %v9348_v48  ;;  %7086 = vmatpush1.bf16.msra.mxu0 %v8188_v32  ;;  %v9374_v32 = vld [vmem:[#allocation10_spill] sm:$0xff] }
0x186f   :  { %7088 = vmatprep.subr.bf16.mxu0 %v9368_v6  ;;  %7118 = vmatpush3.bf16.msra.mxu1 %v9369_v8 }
0x1870   :  { %v3725_v7 = vpop.f32.mrb[80].mxu1  ;;  %7120 = vmatprep.subr.bf16.mxu1 %v9370_v12 }
0x1871   :  { %v6600_v11 = vpop.f32.mrb[81].mxu1  ;;  %6616 = vmatmul.mubr.msk.f32.gmra.mrb[84].mxu0 %vm586_vm1, %v3725_v7 }
0x1872   :  { %7090 = vmatpush1.bf16.msra.mxu0 %v9371_v16  ;;  %4031 = vmatprep.mubr.f32.mxu0 %v9348_v48 }
0x1873   :  { %7092 = vmatprep.subr.bf16.mxu0 %v9372_v53  ;;  %7122 = vmatpush3.bf16.msra.mxu1 %v9373_v33 }
0x1874   :  { %7124 = vmatprep.subr.bf16.mxu1 %v9374_v32 }
0x1876   :  { %7094 = vmatpush1.bf16.msra.mxu0 %v9375_v57 }
0x1877   :  { %7126 = vmatpush3.bf16.msra.mxu1 %v9376_v0  ;;  %7128 = vmatprep.subr.bf16.mxu0 %v9377_v34 }
0x1878   :  { %7147 = vmatprep.subr.bf16.mxu1 %v9347_v31 }
0x192c   :  { %v3893_v41 = vpop.f32.mrb[82].mxu1 }
0x192d   :  { %v6628_v44 = vpop.f32.mrb[83].mxu1 }
0x1930   :  { %v3898_v4 = vpop.f32.mrb[84].mxu1 }
0x1931   :  { %v6631_v1 = vpop.f32.mrb[85].mxu1 }
0x1934   :  { %v3903_v61 = vpop.f32.mrb[86].mxu1 }
0x1935   :  { %v6634_v17 = vpop.f32.mrb[87].mxu1 }
0x193c   :  { %v3804_v29 = vpop.f32.mrb[80].mxu0 }
0x193d   :  { %v3894_v46 = vadd.f32 %v3893_v41, %v3804_v29  ;;  %v6611_v14 = vpop.f32.mrb[81].mxu0 }
0x193f   :  { %v3907_v24 = vadd.f32 %v7589_v40, %v3894_v46  ;;  %v7590_v46 = vld [vmem:[%s8285_s2] ss:$0 sm:$0xff] }
0x1940   :  { %v3809_v52 = vpop.f32.mrb[82].mxu0 }
0x1941   :  { %v3899_v47 = vadd.f32 %v3898_v4, %v3809_v52  ;;  %v6614_v60 = vpop.f32.mrb[83].mxu0  ;;  %v3910_v50 = vadd.f32 %v3907_v24, %v8743_v22  ;;  %v7591_v24 = vld [vmem:[%s8290_s10] ss:$0 sm:$0xff] }
0x1943   :  { %v3908_v15 = vadd.f32 %v7589_v40, %v3899_v47  ;;  %v3913_v59 = vsel %vm224_vm0, %v3910_v50, 0.0 }
0x1944   :  { %v3814_v39 = vpop.f32.mrb[84].mxu0  ;;  %3914 = vadd.xlane.f32.xlu1 %v3913_v59 }
0x1945   :  { %v3904_v63 = vadd.f32 %v3903_v61, %v3814_v39  ;;  %v6617_v23 = vpop.f32.mrb[85].mxu0  ;;  %v3911_v13 = vadd.f32 %v3908_v15, %v8750_v25  ;;  %v9378_v15 = vld [vmem:[#allocation15_spill] sm:$0xff] }
0x1947   :  { %v3909_v30 = vadd.f32 %v7589_v40, %v3904_v63  ;;  %v3916_v45 = vsel %vm224_vm0, %v3911_v13, 0.0  ;;  %v9379_v63 = vld [vmem:[#allocation16_spill] sm:$0xff] }
0x1948   :  { %3917 = vadd.xlane.f32.xlu0 %v3916_v45  ;;  %v9381_v45 = vld [vmem:[#allocation18_spill] sm:$0xff] }
0x1949   :  { %v3912_v38 = vadd.f32 %v3909_v30, %v8739_v62 }
0x194b   :  { %v3919_v3 = vsel %vm1667_vm14, %v3912_v38, 0.0 }
0x194c   :  { %3920 = vadd.xlane.f32.xlu1 %v3919_v3  ;;  %v9383_v3 = vld [vmem:[#allocation20_spill] sm:$0xff] }
0x19d1   :  { %v3915_v26 = vpop.xlane.xlu1 %3914 }
0x19d2   :  { %v3922_v22 = vmul.f32 0.015625, %v3915_v26  ;;  %v9384_v26 = vld [vmem:[#allocation21_spill] sm:$0xff] }
0x19d4   :  { %v3925_v19 = vsub.f32 %v3910_v50, %v3922_v22 }
0x19d5   :  { %v3918_v51 = vpop.xlane.xlu0 %3917 }
0x19d6   :  { %v3923_v55 = vmul.f32 0.015625, %v3918_v51  ;;  %v3928_v6 = vmul.f32 %v3925_v19, %v3925_v19 }
0x19d8   :  { %v3926_v8 = vsub.f32 %v3911_v13, %v3923_v55  ;;  %v3931_v7 = vsel %vm224_vm0, %v3928_v6, 0.0  ;;  %v9380_v13 = vld [vmem:[#allocation17_spill] sm:$0xff] }
0x19d9   :  { %3932 = vadd.xlane.f32.xlu0 %v3931_v7  ;;  %v3921_v25 = vpop.xlane.xlu1 %3920  ;;  %v9386_v6 = vld [vmem:[#allocation13_spill] sm:$0xff] }
0x19da   :  { %v3924_v12 = vmul.f32 0.015625, %v3921_v25  ;;  %v3929_v11 = vmul.f32 %v3926_v8, %v3926_v8 }
0x19dc   :  { %v3927_v16 = vsub.f32 %v3912_v38, %v3924_v12  ;;  %v3934_v53 = vsel %vm224_vm0, %v3929_v11, 0.0  ;;  %v9382_v38 = vld [vmem:[#allocation19_spill] sm:$0xff] }
0x19dd   :  { %3935 = vadd.xlane.f32.xlu1 %v3934_v53 }
0x19de   :  { %v3930_v62 = vmul.f32 %v3927_v16, %v3927_v16 }
0x19e0   :  { %v3937_v33 = vsel %vm1667_vm14, %v3930_v62, 0.0 }
0x19e1   :  { %3938 = vadd.xlane.f32.xlu0 %v3937_v33 }
0x1a66   :  { %v3933_v32 = vpop.xlane.xlu0 %3932 }
0x1a67   :  { %v3940_v57 = vmul.f32 0.015625, %v3933_v32 }
0x1a69   :  { %v3943_v0 = vadd.f32 1e-05, %v3940_v57 }
0x1a6a   :  { %v3936_v34 = vpop.xlane.xlu1 %3935 }
0x1a6b   :  { %7534 = vrsqrt.f32 %v3943_v0  ;;  %v3941_v41 = vmul.f32 0.015625, %v3936_v34 }
0x1a6d   :  { %v3944_v44 = vadd.f32 1e-05, %v3941_v41 }
0x1a6e   :  { %v3939_v4 = vpop.xlane.xlu0 %3938 }
0x1a6f   :  { %7536 = vrsqrt.f32 %v3944_v44  ;;  %v3942_v1 = vmul.f32 0.015625, %v3939_v4 }
0x1a71   :  { %v3945_v61 = vadd.f32 1e-05, %v3942_v1 }
0x1a73   :  { %7538 = vrsqrt.f32 %v3945_v61 }
0x1a75   :  { %v7535_v17 = vpop.eup %7534 }
0x1a76   :  { %v3949_v29 = vmul.f32 %v7535_v17, %v3925_v19  ;;  %v9385_v19 = vld [vmem:[#allocation12_spill] sm:$0xff]  ;;  %v7592_v17 = vld [vmem:[%s8351_s20] ss:$0 sm:$0xff] }
0x1a78   :  { %v3952_v14 = vmul.f32 %v7590_v46, %v3949_v29 }
0x1a79   :  { %v7537_v40 = vpop.eup %7536 }
0x1a7a   :  { %v3955_v52 = vadd.f32 %v7591_v24, %v3952_v14  ;;  %v3950_v47 = vmul.f32 %v7537_v40, %v3926_v8 }
0x1a7c   :  { %5932 = vmatmul.mubr.msk.f32.vlgmr.msra.gmra.mrb[86].mxu0 %vm224_vm0, %v3955_v52  ;;  %v3953_v60 = vmul.f32 %v7590_v46, %v3950_v47 }
0x1a7d   :  { %v7539_v50 = vpop.eup %7538  ;;  %4037 = vmatprep.mubr.f32.mxu0 %v9348_v48  ;;  %7130 = vmatpush1.bf16.msra.mxu0 %v9378_v15 }
0x1a7e   :  { %v3956_v59 = vadd.f32 %v7591_v24, %v3953_v60  ;;  %v3951_v39 = vmul.f32 %v7539_v50, %v3927_v16  ;;  %7132 = vmatprep.subr.bf16.mxu0 %v9379_v63 }
0x1a80   :  { %5933 = vmatmul.mubr.msk.f32.gmra.mrb[88].mxu0 %vm224_vm0, %v3956_v59  ;;  %v3954_v23 = vmul.f32 %v7590_v46, %v3951_v39 }
0x1a81   :  { %4043 = vmatprep.mubr.f32.mxu0 %v9348_v48  ;;  %7134 = vmatpush1.bf16.msra.mxu0 %v9380_v13 }
0x1a82   :  { %v3957_v30 = vadd.f32 %v7591_v24, %v3954_v23  ;;  %7136 = vmatprep.subr.bf16.mxu0 %v9381_v45 }
0x1a84   :  { %5934 = vmatmul.mubr.msk.f32.gmra.mrb[90].mxu0 %vm224_vm0, %v3957_v30 }
0x1a85   :  { %7138 = vmatpush1.bf16.msra.mxu0 %v9382_v38  ;;  %4257 = vmatprep.mubr.f32.mxu0 %v9348_v48 }
0x1a86   :  { %7140 = vmatprep.subr.bf16.mxu0 %v9383_v3 }
0x1a89   :  { %7142 = vmatpush1.bf16.msra.mxu0 %v9384_v26 }
0x1a8a   :  { %7143 = vmatprep.subr.bf16.mxu0 %v9347_v31 }
0x1b4f   :  { %v4033_v22 = vpop.f32.mrb[86].mxu0 }
0x1b50   :  { %v4034_v51 = vadd.f32 %v4033_v22, %v9385_v19  ;;  %v4035_v55 = vpop.f32.mrb[87].mxu0 }
0x1b51   :  { %v4036_v8 = vadd.f32 %v4035_v55, %v9386_v6 }
0x1b52   :  { %v4050_v12 = vmax.f32 %v4034_v51, 0.0 }
0x1b53   :  { %v4051_v7 = vmax.f32 %v4036_v8, 0.0  ;;  %v4039_v25 = vpop.f32.mrb[88].mxu0 }
0x1b54   :  { %v4040_v11 = vadd.f32 %v4039_v25, %v9385_v19  ;;  %v4041_v16 = vpop.f32.mrb[89].mxu0 }
0x1b55   :  { %v4042_v53 = vadd.f32 %v4041_v16, %v9386_v6  ;;  %4120 = vmatprep.mubr.f32.mxu1 %v4051_v7 }
0x1b56   :  { %4121 = vmatmul.mubr.f32.vlgmr.msra.gmra.mrb[88].mxu1 %v4050_v12  ;;  %v4052_v32 = vmax.f32 %v4040_v11, 0.0 }
0x1b57   :  { %v4053_v62 = vmax.f32 %v4042_v53, 0.0  ;;  %v4045_v33 = vpop.f32.mrb[90].mxu0 }
0x1b58   :  { %v4046_v57 = vadd.f32 %v4045_v33, %v9385_v19  ;;  %v4047_v0 = vpop.f32.mrb[91].mxu0 }
0x1b59   :  { %v4048_v34 = vadd.f32 %v4047_v0, %v9386_v6  ;;  %4125 = vmatprep.mubr.f32.mxu1 %v4053_v62 }
0x1b5a   :  { %4126 = vmatmul.mubr.f32.gmra.mrb[90].mxu1 %v4052_v32  ;;  %v4054_v44 = vmax.f32 %v4046_v57, 0.0 }
0x1b5b   :  { %v4055_v41 = vmax.f32 %v4048_v34, 0.0 }
0x1b5d   :  { %4130 = vmatprep.mubr.f32.mxu1 %v4055_v41 }
0x1b5e   :  { %4131 = vmatmul.mubr.f32.gmra.mrb[92].mxu1 %v4054_v44 }
0x1b5f   :  { %6656 = vmatprep.mubr.msk.f32.mxu1 %vm7618_vm10, %v9348_v48 }
0x1c29   :  { %v6221_v4 = vpop.f32.mrb[88].mxu1 }
0x1c2a   :  { %v6222_v1 = vpop.f32.mrb[89].mxu1 }
0x1c2b   :  { %v6223_v61 = vadd.f32 %v6222_v1, %v6221_v4  ;;  %v7593_v1 = vld [vmem:[%s8419_s28] ss:$0 sm:$0xff] }
0x1c2d   :  { %v4123_v29 = vadd.f32 %v7592_v17, %v6223_v61  ;;  %v6224_v46 = vpop.f32.mrb[90].mxu1 }
0x1c2e   :  { %v6225_v14 = vpop.f32.mrb[91].mxu1 }
0x1c2f   :  { %v6226_v40 = vadd.f32 %v6225_v14, %v6224_v46  ;;  %v4136_v24 = vadd.f32 %v4123_v29, %v3955_v52  ;;  %v7594_v29 = vld [vmem:[%s8424_s3] ss:$0 sm:$0xff] }
0x1c31   :  { %v4128_v47 = vadd.f32 %v7592_v17, %v6226_v40  ;;  %v6227_v60 = vpop.f32.mrb[92].mxu1  ;;  %v4139_v50 = vsel %vm224_vm0, %v4136_v24, 0.0 }
0x1c32   :  { %v6228_v15 = vpop.f32.mrb[93].mxu1  ;;  %4140 = vadd.xlane.f32.xlu1 %v4139_v50 }
0x1c33   :  { %v6229_v39 = vadd.f32 %v6228_v15, %v6227_v60  ;;  %v4137_v63 = vadd.f32 %v4128_v47, %v3956_v59 }
0x1c35   :  { %v4133_v23 = vadd.f32 %v7592_v17, %v6229_v39  ;;  %v4142_v13 = vsel %vm224_vm0, %v4137_v63, 0.0 }
0x1c36   :  { %4143 = vadd.xlane.f32.xlu0 %v4142_v13  ;;  %v9387_v13 = vld [vmem:[#allocation22_spill] sm:$0xff] }
0x1c37   :  { %v4138_v45 = vadd.f32 %v4133_v23, %v3957_v30 }
0x1c39   :  { %v4145_v38 = vsel %vm1667_vm14, %v4138_v45, 0.0 }
0x1c3a   :  { %4146 = vadd.xlane.f32.xlu1 %v4145_v38 }
0x1cbf   :  { %v4141_v3 = vpop.xlane.xlu1 %4140 }
0x1cc0   :  { %v4148_v26 = vmul.f32 0.015625, %v4141_v3 }
0x1cc2   :  { %v4151_v22 = vsub.f32 %v4136_v24, %v4148_v26  ;;  %v9388_v26 = vld [vmem:[#allocation23_spill] sm:$0xff] }
0x1cc3   :  { %v4144_v52 = vpop.xlane.xlu0 %4143 }
0x1cc4   :  { %v4149_v19 = vmul.f32 0.015625, %v4144_v52  ;;  %v4154_v51 = vmul.f32 %v4151_v22, %v4151_v22 }
0x1cc6   :  { %v4152_v55 = vsub.f32 %v4137_v63, %v4149_v19  ;;  %v4157_v6 = vsel %vm224_vm0, %v4154_v51, 0.0 }
0x1cc7   :  { %4158 = vadd.xlane.f32.xlu0 %v4157_v6  ;;  %v4147_v8 = vpop.xlane.xlu1 %4146 }
0x1cc8   :  { %v4150_v59 = vmul.f32 0.015625, %v4147_v8  ;;  %v4155_v7 = vmul.f32 %v4152_v55, %v4152_v55 }
0x1cca   :  { %v4153_v25 = vsub.f32 %v4138_v45, %v4150_v59  ;;  %v4160_v12 = vsel %vm224_vm0, %v4155_v7, 0.0 }
0x1ccb   :  { %4161 = vadd.xlane.f32.xlu1 %v4160_v12 }
0x1ccc   :  { %v4156_v30 = vmul.f32 %v4153_v25, %v4153_v25 }
0x1cce   :  { %v4163_v11 = vsel %vm1667_vm14, %v4156_v30, 0.0 }
0x1ccf   :  { %4164 = vadd.xlane.f32.xlu0 %v4163_v11 }
0x1d54   :  { %v4159_v16 = vpop.xlane.xlu0 %4158 }
0x1d55   :  { %v4166_v53 = vmul.f32 0.015625, %v4159_v16 }
0x1d57   :  { %v4169_v62 = vadd.f32 1e-05, %v4166_v53 }
0x1d58   :  { %v4162_v33 = vpop.xlane.xlu1 %4161 }
0x1d59   :  { %7540 = vrsqrt.f32 %v4169_v62  ;;  %v4167_v32 = vmul.f32 0.015625, %v4162_v33 }
0x1d5b   :  { %v4170_v57 = vadd.f32 1e-05, %v4167_v32 }
0x1d5c   :  { %v4165_v0 = vpop.xlane.xlu0 %4164 }
0x1d5d   :  { %7542 = vrsqrt.f32 %v4170_v57  ;;  %v4168_v34 = vmul.f32 0.015625, %v4165_v0 }
0x1d5f   :  { %v4171_v41 = vadd.f32 1e-05, %v4168_v34 }
0x1d61   :  { %7544 = vrsqrt.f32 %v4171_v41 }
0x1d63   :  { %v7541_v44 = vpop.eup %7540 }
0x1d64   :  { %v4175_v4 = vmul.f32 %v7541_v44, %v4151_v22 }
0x1d66   :  { %v4178_v61 = vmul.f32 %v7593_v1, %v4175_v4 }
0x1d67   :  { %v7543_v17 = vpop.eup %7542 }
0x1d68   :  { %v8976_v46 = vadd.f32 %v7594_v29, %v4178_v61  ;;  %v4176_v14 = vmul.f32 %v7543_v17, %v4152_v55 }
0x1d6a   :  { %5935 = vmatmul.mubr.msk.f32.vlgmr.msra.gmra.mrb[92].mxu0 %vm224_vm0, %v8976_v46  ;;  %v4179_v40 = vmul.f32 %v7593_v1, %v4176_v14 }
0x1d6b   :  { %v7545_v24 = vpop.eup %7544  ;;  %4263 = vmatprep.mubr.f32.mxu0 %v9348_v48 }
0x1d6c   :  { %v8981_v47 = vadd.f32 %v7594_v29, %v4179_v40  ;;  %v4177_v60 = vmul.f32 %v7545_v24, %v4153_v25 }
0x1d6e   :  { %5936 = vmatmul.mubr.msk.f32.gmra.mrb[94].mxu0 %vm224_vm0, %v8981_v47  ;;  %v4180_v50 = vmul.f32 %v7593_v1, %v4177_v60 }
0x1d6f   :  { %4269 = vmatprep.mubr.f32.mxu0 %v9348_v48 }
0x1d70   :  { %v8986_v15 = vadd.f32 %v7594_v29, %v4180_v50 }
0x1d72   :  { %5937 = vmatmul.mubr.msk.f32.gmra.mrb[96].mxu0 %vm224_vm0, %v8986_v15 }
0x1d73   :  { %6641 = vmatprep.mubr.msk.f32.mxu0 %vm7618_vm10, %v9348_v48 }
0x1e3d   :  { %v4259_v39 = vpop.f32.mrb[92].mxu0 }
0x1e3e   :  { %v4261_v63 = vpop.f32.mrb[93].mxu0  ;;  %v4260_v45 = vadd.f32 %v4259_v39, %v9387_v13 }
0x1e3f   :  { %v8995_v22 = vadd.f32 %v4261_v63, %v9388_v26 }
0x1e41   :  { %v4265_v23 = vpop.f32.mrb[94].mxu0 }
0x1e42   :  { %v4266_v38 = vadd.f32 %v4265_v23, %v9387_v13  ;;  %v4267_v3 = vpop.f32.mrb[95].mxu0 }
0x1e43   :  { %v8998_v52 = vadd.f32 %v4267_v3, %v9388_v26 }
0x1e44   :  { %v7373_v19 = vpack.i.bf16 %v4266_v38, %v4260_v45 }
0x1e45   :  { %v7383_v51 = vpack.i.bf16 %v8998_v52, %v8995_v22  ;;  %v7148_v55 = vpack.c.bf16 %v8998_v52, %v8995_v22  ;;  %v4271_v6 = vpop.f32.mrb[96].mxu0 }
0x1e46   :  { %v4272_v8 = vadd.f32 %v4271_v6, %v9387_v13  ;;  %v4273_v59 = vpop.f32.mrb[97].mxu0  ;;  %7374 = vrot.lane.b32.xlu1 %v7373_v19, %s7617_s7 }
0x1e47   :  { %7149 = vmatpush3.bf16.msra.mxu1 %v7148_v55  ;;  %v9009_v7 = vadd.f32 %v4273_v59, %v9388_v26 }
0x1e48   :  { %4283 = vrot.lane.b32.xlu0 %v4272_v8, %s7617_s7  ;;  %6654 = vmatprep.subr.mxu1 %v9348_v48  ;;  %s5717_s7 = sld [smem:[%s9281_s0 + %s7631_s25]]  }
0x1e4a   :  { %7379 = vrot.lane.b32.xlu1 %v7373_v19, %s7619_s8 }
0x1e4b   :  { %6655 = vmatpush3.msk.msra.mxu1 %vm862_vm7, %v9009_v7 }
0x1e4c   :  { %4505 = vrot.lane.b32.xlu0 %v4260_v45, %s7620_s9  ;;  %7154 = vmatprep.subr.bf16.mxu1 %v9347_v31 }
0x1e4e   :  { %4515 = vrot.lane.b32.xlu1 %v4272_v8, %s7619_s8  ;;  %s7632_s8 = smov 27  }
0x1e50   :  { %4509 = vrot.lane.b32.xlu0 %v4272_v8, %s7620_s9 }
0x1e52   :  { %4507 = vrot.lane.b32.xlu1 %v4266_v38, %s7620_s9 }
0x1eb8   :  { %v7375_v25 = vpop.permute.xlu1 %7374 }
0x1eb9   :  { %v7377_v12 = vunpack.i.h.bf16 %v7375_v25  ;;  %v7376_v30 = vunpack.i.l.bf16 %v7375_v25 }
0x1eba   :  { %v4284_v33 = vpop.permute.xlu0 %4283 }
0x1ebb   :  { %v7144_v11 = vpack.c.bf16 %v7377_v12, %v7376_v30 }
0x1ebc   :  { %v7380_v16 = vpop.permute.xlu1 %7379 }
0x1ebd   :  { %7146 = vmatpush3.bf16.xpose.msk.msra.mxu0 %vm8012_vm11, %v7144_v11  ;;  %v7382_v53 = vunpack.i.h.bf16 %v7380_v16  ;;  %v7381_v62 = vunpack.i.l.bf16 %v7380_v16 }
0x1ebe   :  { %6639 = vmatprep.subr.mxu0 %v9348_v48  ;;  %v4506_v5 = vpop.permute.xlu0 %4505 }
0x1ebf   :  { %v7151_v32 = vpack.c.bf16 %v7382_v53, %v7381_v62 }
0x1ec0   :  { %v4516_v57 = vpop.permute.xlu1 %4515 }
0x1ec2   :  { %v4510_v34 = vpop.permute.xlu0 %4509 }
0x1ec4   :  { %v4508_v0 = vpop.permute.xlu1 %4507 }
0x1ec5   :  { %6640 = vmatpush3.xpose.msk.msra.mxu0 %vm586_vm1, %v4284_v33 }
0x1ec6   :  { %7150 = vmatprep.subr.bf16.mxu0 %v9347_v31 }
0x1ec8   :  { %6642 = vmatmul.mubr.msk.f32.vlgmr.msra.gmra.mrb[98].mxu0 %vm586_vm1, %v4260_v45 }
0x1ec9   :  { %7153 = vmatpush3.bf16.xpose.msk.msra.mxu0 %vm8012_vm11, %v7151_v32  ;;  %6644 = vmatprep.mubr.msk.f32.mxu0 %vm7618_vm10, %v9348_v48 }
0x1eca   :  { %6669 = vmatprep.subr.mxu0 %v9348_v48 }
0x1ecc   :  { %6645 = vmatmul.mubr.msk.f32.gmra.mrb[100].mxu0 %vm586_vm1, %v4266_v38 }
0x1ecd   :  { %6647 = vmatprep.mubr.msk.f32.mxu0 %vm7618_vm10, %v9348_v48 }
0x1ed0   :  { %6648 = vmatmul.mubr.msk.f32.gmra.mrb[102].mxu0 %vm586_vm1, %v4272_v8 }
0x1ed1   :  { %6670 = vmatpush3.xpose.msk.msra.mxu0 %vm586_vm1, %v4516_v57  ;;  %6671 = vmatprep.mubr.msk.f32.mxu0 %vm7618_vm10, %v9348_v48 }
0x1ed2   :  { %7157 = vmatprep.subr.bf16.mxu0 %v9347_v31 }
0x1ed4   :  { %6672 = vmatmul.mubr.msk.f32.vlgmr.msra.gmra.mrb[104].mxu0 %vm586_vm1, %v4506_v5 }
0x1ed5   :  { %6674 = vmatprep.mubr.msk.f32.mxu0 %vm7618_vm10, %v9348_v48  ;;  %7159 = vmatpush3.bf16.msra.mxu0 %v8561_v37 }
0x1ed6   :  { %7160 = vmatprep.subr.bf16.mxu0 %v9347_v31 }
0x1ed8   :  { %6675 = vmatmul.mubr.msk.f32.gmra.mrb[106].mxu0 %vm586_vm1, %v4508_v0 }
0x1ed9   :  { %6677 = vmatprep.mubr.msk.f32.mxu0 %vm7618_vm10, %v9348_v48  ;;  %7162 = vmatpush3.bf16.msra.mxu0 %v8566_v43 }
0x1eda   :  { %7170 = vmatprep.subr.bf16.mxu0 %v8609_v21 }
0x1edc   :  { %6678 = vmatmul.mubr.msk.f32.gmra.mrb[108].mxu0 %vm586_vm1, %v4510_v34 }
0x1edd   :  { %6703 = vmatprep.mubr.msk.f32.mxu0 %vm7618_vm10, %v9348_v48 }
0x1f9b   :  { %v4363_v41 = vpop.f32.mrb[98].mxu0 }
0x1f9c   :  { %v4377_v37 = vmul.f32 0.17677669, %v4363_v41  ;;  %v6643_v44 = vpop.f32.mrb[99].mxu0 }
0x1f9e   :  { %v4380_v4 = vsel %vm1100_vm12, %v4377_v37, -inf }
0x1f9f   :  { %4381 = vmax.xlane.f32.xlu1 %v4380_v4  ;;  %v4368_v1 = vpop.f32.mrb[100].mxu0 }
0x1fa0   :  { %v4378_v61 = vmul.f32 0.17677669, %v4368_v1  ;;  %v6646_v17 = vpop.f32.mrb[101].mxu0 }
0x1fa2   :  { %v4383_v29 = vsel %vm1100_vm12, %v4378_v61, -inf }
0x1fa3   :  { %4384 = vmax.xlane.f32.xlu0 %v4383_v29  ;;  %v4373_v43 = vpop.f32.mrb[102].mxu0 }
0x1fa4   :  { %v4379_v21 = vmul.f32 0.17677669, %v4373_v43  ;;  %v6649_v14 = vpop.f32.mrb[103].mxu0 }
0x1fa6   :  { %v4386_v40 = vsel %vm1107_vm13, %v4379_v21, -inf }
0x1fa7   :  { %4387 = vmax.xlane.f32.xlu0 %v4386_v40  ;;  %v4595_v24 = vpop.f32.mrb[104].mxu0 }
0x1fa8   :  { %v4609_v60 = vmul.f32 0.17677669, %v4595_v24  ;;  %v6673_v50 = vpop.f32.mrb[105].mxu0 }
0x1faa   :  { %v4612_v39 = vsel %vm1100_vm12, %v4609_v60, -inf }
0x1fab   :  { %4613 = vmax.xlane.f32.xlu1 %v4612_v39  ;;  %v4600_v63 = vpop.f32.mrb[106].mxu0 }
0x1fac   :  { %v6676_v23 = vpop.f32.mrb[107].mxu0  ;;  %v4610_v41 = vmul.f32 0.17677669, %v4600_v63 }
0x1fae   :  { %v4615_v44 = vsel %vm1100_vm12, %v4610_v41, -inf }
0x1faf   :  { %v4605_v13 = vpop.f32.mrb[108].mxu0 }
0x1fb0   :  { %v6679_v45 = vpop.f32.mrb[109].mxu0  ;;  %v4611_v34 = vmul.f32 0.17677669, %v4605_v13 }
0x202c   :  { %v4382_v38 = vpop.xlane.xlu1 %4381 }
0x202d   :  { %v4389_v3 = vsub.f32 %v4377_v37, %v4382_v38  ;;  %v4618_v37 = vsel %vm1107_vm13, %v4611_v34, -inf }
0x202f   :  { %v4392_v26 = vmul.f32 1.442695, %v4389_v3 }
0x2030   :  { %v4385_v19 = vpop.xlane.xlu0 %4384 }
0x2031   :  { %7546 = vpow2.f32 %v4392_v26  ;;  %v4390_v55 = vsub.f32 %v4378_v61, %v4385_v19 }
0x2033   :  { %v4394_v6 = vmul.f32 1.442695, %v4390_v55 }
0x2034   :  { %v4388_v8 = vpop.xlane.xlu0 %4387 }
0x2035   :  { %7548 = vpow2.f32 %v4394_v6  ;;  %v4391_v59 = vsub.f32 %v4379_v21, %v4388_v8 }
0x2037   :  { %v4396_v25 = vmul.f32 1.442695, %v4391_v59 }
0x2038   :  { %v4614_v12 = vpop.xlane.xlu1 %4613 }
0x2039   :  { %7550 = vpow2.f32 %v4396_v25  ;;  %v4621_v30 = vsub.f32 %v4609_v60, %v4614_v12 }
0x203b   :  { %v7547_v11 = vpop.eup %7546  ;;  %v4624_v16 = vmul.f32 1.442695, %v4621_v30 }
0x203c   :  { %v4398_v53 = vsel %vm1100_vm12, %v7547_v11, 0.0 }
0x203d   :  { %7552 = vpow2.f32 %v4624_v16  ;;  %4399 = vadd.xlane.f32.xlu0 %v4398_v53 }
0x203f   :  { %v7549_v62 = vpop.eup %7548 }
0x2040   :  { %v4401_v33 = vsel %vm1100_vm12, %v7549_v62, 0.0 }
0x2041   :  { %4402 = vadd.xlane.f32.xlu1 %v4401_v33 }
0x2043   :  { %v7551_v32 = vpop.eup %7550 }
0x2044   :  { %v4404_v57 = vsel %vm1107_vm13, %v7551_v32, 0.0 }
0x2045   :  { %4405 = vadd.xlane.f32.xlu0 %v4404_v57  ;;  %v9389_v57 = vld [vmem:[#allocation27_spill] sm:$0xff] }
0x2047   :  { %v7553_v5 = vpop.eup %7552 }
0x2048   :  { %v4630_v0 = vsel %vm1100_vm12, %v7553_v5, 0.0 }
0x2049   :  { %4631 = vadd.xlane.f32.xlu1 %v4630_v0  ;;  %v9395_v0 = vld [vmem:[#allocation30_spill] sm:$0xff] }
0x205a   :  { %4651 = vrot.lane.b32.xlu1 %v9009_v7, %s7620_s9 }
0x205b   :  { %7384 = vrot.lane.b32.xlu0 %v7383_v51, %s7620_s9 }
0x207a   :  { %4619 = vmax.xlane.f32.xlu0 %v4618_v37  ;;  %v9398_v37 = vld [vmem:[#allocation33_spill] sm:$0xff] }
0x207e   :  { %4616 = vmax.xlane.f32.xlu1 %v4615_v44  ;;  %v9399_v44 = vld [vmem:[#allocation34_spill] sm:$0xff] }
0x20ca   :  { %v4400_v4 = vpop.xlane.xlu0 %4399 }
0x20cb   :  { %7554 = vrcp.f32 %v4400_v4  ;;  %v9400_v4 = vld [vmem:[#allocation35_spill] sm:$0xff] }
0x20ce   :  { %v4403_v1 = vpop.xlane.xlu1 %4402 }
0x20cf   :  { %7556 = vrcp.f32 %v4403_v1  ;;  %v9401_v1 = vld [vmem:[#allocation36_spill] sm:$0xff] }
0x20d2   :  { %v4406_v61 = vpop.xlane.xlu0 %4405 }
0x20d3   :  { %7558 = vrcp.f32 %v4406_v61  ;;  %v9402_v61 = vld [vmem:[#allocation37_spill] sm:$0xff] }
0x20d5   :  { %v7555_v7 = vpop.eup %7554 }
0x20d6   :  { %v4408_v17 = vmul.f32 %v7555_v7, %v7547_v11  ;;  %v7385_v29 = vpop.permute.xlu0 %7384  ;;  %v4632_v43 = vpop.xlane.xlu1 %4631  ;;  %v9403_v7 = vld [vmem:[#allocation38_spill] sm:$0xff] }
0x20d7   :  { %v7387_v22 = vunpack.i.h.bf16 %v7385_v29  ;;  %v7386_v52 = vunpack.i.l.bf16 %v7385_v29  ;;  %7560 = vrcp.f32 %v4632_v43 }
0x20d8   :  { %6657 = vmatmul.mubr.msk.f32.vlgmr.msra.gmra.mrb[94].mxu1 %vm1100_vm12, %v4408_v17 }
0x20d9   :  { %v7557_v51 = vpop.eup %7556  ;;  %v7155_v21 = vpack.c.bf16 %v7387_v22, %v7386_v52  ;;  %6659 = vmatprep.mubr.msk.f32.mxu1 %vm7618_vm10, %v9348_v48 }
0x20da   :  { %v4410_v14 = vmul.f32 %v7557_v51, %v7549_v62  ;;  %v4652_v24 = vpop.permute.xlu1 %4651 }
0x20db   :  { %7156 = vmatpush3.bf16.msra.mxu1 %v7155_v21  ;;  %v7595_v21 = vld [vmem:[%s8143_s17 + $0x1] ss:$0 sm:$0xff]  ;;  %s9180_s17 = sld [smem:[%s9281_s0 + %s7632_s8]]  }
0x20dc   :  { %6660 = vmatmul.mubr.msk.f32.gmra.mrb[96].mxu1 %vm1100_vm12, %v4410_v14  ;;  %6684 = vmatprep.subr.mxu1 %v9348_v48 }
0x20dd   :  { %v7559_v40 = vpop.eup %7558  ;;  %6662 = vmatprep.mubr.msk.f32.mxu1 %vm7618_vm10, %v9348_v48 }
0x20de   :  { %v4412_v60 = vmul.f32 %v7559_v40, %v7551_v32 }
0x20df   :  { %6685 = vmatpush3.msk.msra.mxu1 %vm862_vm7, %v4652_v24 }
0x20e0   :  { %6663 = vmatmul.mubr.msk.f32.gmra.mrb[98].mxu1 %vm1100_vm12, %v4412_v60  ;;  %7163 = vmatprep.subr.bf16.mxu1 %v9347_v31 }
0x20e1   :  { %v7561_v50 = vpop.eup %7560  ;;  %6686 = vmatprep.mubr.msk.f32.mxu1 %vm7618_vm10, %v9348_v48 }
0x20e2   :  { %v4640_v39 = vmul.f32 %v7561_v50, %v7553_v5  ;;  %v9390_v5 = vld [vmem:[#allocation24_spill] sm:$0xff] }
0x20e4   :  { %6687 = vmatmul.mubr.msk.f32.vlgmr.msra.gmra.mrb[100].mxu1 %vm1100_vm12, %v4640_v39 }
0x20e5   :  { %6689 = vmatprep.mubr.msk.f32.mxu1 %vm7618_vm10, %v9348_v48  ;;  %7165 = vmatpush3.bf16.msra.mxu1 %v8539_v20 }
0x20e6   :  { %7166 = vmatprep.subr.bf16.mxu1 %v9347_v31 }
0x20e9   :  { %7168 = vmatpush3.bf16.msra.mxu1 %v8549_v54 }
0x20ea   :  { %7186 = vmatprep.subr.bf16.mxu1 %v8651_v10 }
0x2107   :  { %v4620_v63 = vpop.xlane.xlu0 %4619 }
0x2108   :  { %v4623_v23 = vsub.f32 %v4611_v34, %v4620_v63  ;;  %v9396_v34 = vld [vmem:[#allocation31_spill] sm:$0xff] }
0x210a   :  { %v4628_v13 = vmul.f32 1.442695, %v4623_v23 }
0x210b   :  { %v4617_v45 = vpop.xlane.xlu1 %4616 }
0x210c   :  { %7562 = vpow2.f32 %v4628_v13  ;;  %v4622_v38 = vsub.f32 %v4610_v41, %v4617_v45  ;;  %v9397_v41 = vld [vmem:[#allocation32_spill] sm:$0xff] }
0x210e   :  { %v4626_v3 = vmul.f32 1.442695, %v4622_v38 }
0x2110   :  { %7564 = vpow2.f32 %v4626_v3 }
0x2116   :  { %v7563_v26 = vpop.eup %7562 }
0x2117   :  { %v4636_v19 = vsel %vm1107_vm13, %v7563_v26, 0.0 }
0x2118   :  { %4637 = vadd.xlane.f32.xlu1 %v4636_v19 }
0x211a   :  { %v7565_v55 = vpop.eup %7564 }
0x211b   :  { %v4633_v20 = vsel %vm1100_vm12, %v7565_v55, 0.0 }
0x211c   :  { %4634 = vadd.xlane.f32.xlu0 %v4633_v20 }
0x21a5   :  { %v4638_v6 = vpop.xlane.xlu1 %4637 }
0x21a9   :  { %v4635_v54 = vpop.xlane.xlu0 %4634 }
0x21aa   :  { %7566 = vrcp.f32 %v4635_v54 }
0x21ab   :  { %v4491_v10 = vpop.f32.mrb[94].mxu1  ;;  %7568 = vrcp.f32 %v4638_v6  ;;  %v5898_v6 = vld [vmem:[%s8351_s20 + $0x1] ss:$0 sm:$0xff] }
0x21ac   :  { %v6658_v8 = vpop.f32.mrb[95].mxu1 }
0x21af   :  { %v4496_v59 = vpop.f32.mrb[96].mxu1 }
0x21b0   :  { %v6661_v25 = vpop.f32.mrb[97].mxu1 }
0x21b3   :  { %v4501_v12 = vpop.f32.mrb[98].mxu1 }
0x21b4   :  { %v7567_v30 = vpop.eup %7566  ;;  %v6664_v11 = vpop.f32.mrb[99].mxu1 }
0x21b5   :  { %v4642_v16 = vmul.f32 %v7567_v30, %v7565_v55  ;;  %v7569_v53 = vpop.eup %7568 }
0x21b6   :  { %v4644_v32 = vmul.f32 %v7569_v53, %v7563_v26 }
0x21b7   :  { %v4732_v62 = vpop.f32.mrb[100].mxu1  ;;  %6690 = vmatmul.mubr.msk.f32.gmra.mrb[102].mxu1 %vm1100_vm12, %v4642_v16 }
0x21b8   :  { %v6688_v33 = vpop.f32.mrb[101].mxu1  ;;  %6704 = vmatmul.mubr.msk.f32.vlgmr.msra.gmra.mrb[110].mxu0 %vm586_vm1, %v4732_v62  ;;  %6692 = vmatprep.mubr.msk.f32.mxu1 %vm7618_vm10, %v9348_v48 }
0x21b9   :  { %6706 = vmatprep.mubr.msk.f32.mxu0 %vm7618_vm10, %v9348_v48  ;;  %7172 = vmatpush1.bf16.msra.mxu0 %v8613_v2  ;;  %v9391_v2 = vld [vmem:[#allocation28_spill] sm:$0xff] }
0x21ba   :  { %7174 = vmatprep.subr.bf16.mxu0 %v8619_v49  ;;  %v9392_v49 = vld [vmem:[#allocation25_spill] sm:$0xff] }
0x21bb   :  { %6693 = vmatmul.mubr.msk.f32.gmra.mrb[104].mxu1 %vm1100_vm12, %v4644_v32 }
0x21bc   :  { %6720 = vmatprep.mubr.msk.f32.mxu1 %vm7618_vm10, %v9348_v48 }
0x21bd   :  { %7176 = vmatpush1.bf16.msra.mxu0 %v8623_v58  ;;  %v9393_v58 = vld [vmem:[#allocation29_spill] sm:$0xff] }
0x21be   :  { %7178 = vmatprep.subr.bf16.mxu0 %v8629_v42  ;;  %v9394_v42 = vld [vmem:[#allocation26_spill] sm:$0xff] }
0x21bf   :  { %6721 = vmatmul.mubr.msk.f32.vlgmr.msra.gmra.mrb[106].mxu1 %vm586_vm1, %v4491_v10 }
0x21c0   :  { %6723 = vmatprep.mubr.msk.f32.mxu1 %vm7618_vm10, %v9348_v48  ;;  %7188 = vmatpush3.bf16.msra.mxu1 %v9389_v57  ;;  %v7596_v57 = vld [vmem:[%s8285_s2 + $0x1] ss:$0 sm:$0xff] }
0x21c1   :  { %7180 = vmatpush1.bf16.msra.mxu0 %v9390_v5  ;;  %7190 = vmatprep.subr.bf16.mxu1 %v9391_v2  ;;  %v9147_v2 = vld [vmem:[%s8290_s10 + $0x1] ss:$0 sm:$0xff] }
0x21c2   :  { %7182 = vmatprep.subr.bf16.mxu0 %v9392_v49 }
0x21c3   :  { %6724 = vmatmul.mubr.msk.f32.gmra.mrb[108].mxu1 %vm586_vm1, %v4496_v59  ;;  %v3117_v59 = vadd.f32 %v8849_v56, %v5898_v6 }
0x21c4   :  { %6726 = vmatprep.mubr.msk.f32.mxu1 %vm7618_vm10, %v9348_v48  ;;  %7192 = vmatpush3.bf16.msra.mxu1 %v9393_v58 }
0x21c5   :  { %7184 = vmatpush1.bf16.msra.mxu0 %v9394_v42  ;;  %7194 = vmatprep.subr.bf16.mxu1 %v9395_v0  ;;  %v3128_v16 = vadd.f32 %v3117_v59, %v8716_v28 }
0x21c6   :  { %7217 = vmatprep.subr.bf16.mxu0 %v9347_v31 }
0x21c7   :  { %6727 = vmatmul.mubr.msk.f32.gmra.mrb[110].mxu1 %vm586_vm1, %v4501_v12  ;;  %v3133_v53 = vsel %vm224_vm0, %v3128_v16, 0.0 }
0x21c8   :  { %7196 = vmatpush3.bf16.msra.mxu1 %v9396_v34 }
0x21c9   :  { %7198 = vmatprep.subr.bf16.mxu1 %v9397_v41 }
0x21cc   :  { %7200 = vmatpush3.bf16.msra.mxu1 %v9398_v37 }
0x21cd   :  { %7202 = vmatprep.subr.bf16.mxu1 %v9399_v44 }
0x21d0   :  { %7204 = vmatpush3.bf16.msra.mxu1 %v9400_v4 }
0x21d1   :  { %7206 = vmatprep.subr.bf16.mxu1 %v9401_v1 }
0x21d4   :  { %7208 = vmatpush3.bf16.msra.mxu1 %v9402_v61 }
0x21d5   :  { %7210 = vmatprep.subr.bf16.mxu1 %v9403_v7 }
0x21d8   :  { %7212 = vmatpush3.bf16.msra.mxu1 %v8761_v18 }
0x21d9   :  { %7214 = vmatprep.subr.bf16.mxu1 %v8766_v27 }
0x21dc   :  { %7216 = vmatpush3.bf16.msra.mxu1 %v8770_v35 }
0x21dd   :  { %7265 = vmatprep.subr.bf16.mxu1 %v9347_v31 }
0x228a   :  { %v4737_v17 = vpop.f32.mrb[102].mxu1 }
0x228b   :  { %v6691_v29 = vpop.f32.mrb[103].mxu1  ;;  %v4821_v43 = vpop.f32.mrb[110].mxu0  ;;  %6707 = vmatmul.mubr.msk.f32.gmra.mrb[112].mxu0 %vm586_vm1, %v4737_v17 }
0x228c   :  { %v6705_v22 = vpop.f32.mrb[111].mxu0  ;;  %6709 = vmatprep.mubr.msk.f32.mxu0 %vm7618_vm10, %v9348_v48 }
0x228e   :  { %v4742_v52 = vpop.f32.mrb[104].mxu1 }
0x228f   :  { %v6694_v51 = vpop.f32.mrb[105].mxu1  ;;  %6710 = vmatmul.mubr.msk.f32.gmra.mrb[114].mxu0 %vm586_vm1, %v4742_v52 }
0x2290   :  { %5048 = vmatprep.mubr.f32.mxu0 %v9348_v48 }
0x2292   :  { %v4910_v18 = vpop.f32.mrb[106].mxu1 }
0x2293   :  { %v4911_v27 = vadd.f32 %v4910_v18, %v4821_v43  ;;  %v6722_v35 = vpop.f32.mrb[107].mxu1 }
0x2295   :  { %v4924_v14 = vadd.f32 %v7595_v21, %v4911_v27 }
0x2296   :  { %v4915_v40 = vpop.f32.mrb[108].mxu1 }
0x2297   :  { %v6725_v24 = vpop.f32.mrb[109].mxu1  ;;  %v4927_v60 = vadd.f32 %v4924_v14, %v8976_v46 }
0x2299   :  { %v4930_v50 = vsel %vm224_vm0, %v4927_v60, 0.0 }
0x229a   :  { %v4920_v39 = vpop.f32.mrb[110].mxu1  ;;  %4931 = vadd.xlane.f32.xlu0 %v4930_v50 }
0x229b   :  { %v6728_v63 = vpop.f32.mrb[111].mxu1 }
0x2327   :  { %v4932_v23 = vpop.xlane.xlu0 %4931 }
0x2328   :  { %v4939_v13 = vmul.f32 0.015625, %v4932_v23 }
0x232a   :  { %v4942_v45 = vsub.f32 %v4927_v60, %v4939_v13 }
0x232c   :  { %v4945_v38 = vmul.f32 %v4942_v45, %v4942_v45 }
0x232e   :  { %v4948_v3 = vsel %vm224_vm0, %v4945_v38, 0.0 }
0x232f   :  { %4949 = vadd.xlane.f32.xlu1 %v4948_v3 }
0x235e   :  { %v4826_v26 = vpop.f32.mrb[112].mxu0 }
0x235f   :  { %v4916_v19 = vadd.f32 %v4915_v40, %v4826_v26  ;;  %v6708_v55 = vpop.f32.mrb[113].mxu0 }
0x2361   :  { %v4925_v20 = vadd.f32 %v7595_v21, %v4916_v19 }
0x2362   :  { %v4831_v54 = vpop.f32.mrb[114].mxu0 }
0x2363   :  { %v4921_v10 = vadd.f32 %v4920_v39, %v4831_v54  ;;  %v6711_v46 = vpop.f32.mrb[115].mxu0  ;;  %v4928_v8 = vadd.f32 %v4925_v20, %v8981_v47 }
0x2365   :  { %v4926_v25 = vadd.f32 %v7595_v21, %v4921_v10  ;;  %v4933_v12 = vsel %vm224_vm0, %v4928_v8, 0.0 }
0x2366   :  { %4934 = vadd.xlane.f32.xlu0 %v4933_v12  ;;  %v5172_v12 = vld [vmem:[%s5717_s7 + $0x8] sm:$0xff] }
0x2367   :  { %v4929_v30 = vadd.f32 %v4926_v25, %v8986_v15  ;;  %v5171_v25 = vld [vmem:[%s5717_s7] sm:$0xff] }
0x2369   :  { %v4936_v11 = vsel %vm1667_vm14, %v4929_v30, 0.0 }
0x236a   :  { %4937 = vadd.xlane.f32.xlu1 %v4936_v11  ;;  %v7218_v11 = vpack.c.bf16 %v5172_v12, %v5171_v25  ;;  %v5286_v25 = vld [vmem:[%s9180_s17 + $0x98] sm:$0xff] }
0x236e   :  { %3134 = vadd.xlane.f32.xlu1 %v3133_v53  ;;  %v5174_v53 = vld [vmem:[%s5717_s7 + $0x18] sm:$0xff] }
0x23bc   :  { %v4950_v62 = vpop.xlane.xlu1 %4949 }
0x23bd   :  { %v4957_v47 = vmul.f32 0.015625, %v4950_v62 }
0x23bf   :  { %v4960_v33 = vadd.f32 1e-05, %v4957_v47  ;;  %v5175_v47 = vld [vmem:[%s5717_s7 + $0x20] sm:$0xff] }
0x23c1   :  { %7570 = vrsqrt.f32 %v4960_v33  ;;  %v5176_v33 = vld [vmem:[%s5717_s7 + $0x28] sm:$0xff] }
0x23cb   :  { %v7571_v56 = vpop.eup %7570 }
0x23cc   :  { %v4966_v32 = vmul.f32 %v7571_v56, %v4942_v45  ;;  %v7224_v56 = vpack.c.bf16 %v5176_v33, %v5175_v47  ;;  %v5259_v33 = vld [vmem:[%s9187_s4] sm:$0xff] }
0x23ce   :  { %v4969_v5 = vmul.f32 %v7596_v57, %v4966_v32  ;;  %v5177_v32 = vld [vmem:[%s5717_s7 + $0x30] sm:$0xff] }
0x23d0   :  { %v4972_v15 = vadd.f32 %v9147_v2, %v4969_v5 }
0x23d2   :  { %5964 = vmatmul.mubr.msk.f32.vlgmr.msra.gmra.mrb[116].mxu0 %vm224_vm0, %v4972_v15 }
0x23d3   :  { %5054 = vmatprep.mubr.f32.mxu0 %v9348_v48  ;;  %7219 = vmatpush3.bf16.msra.mxu0 %v7218_v11  ;;  %v5288_v11 = vld [vmem:[%s9180_s17 + $0xa8] sm:$0xff] }
0x23d4   :  { %7220 = vmatprep.subr.bf16.mxu0 %v9347_v31 }
0x23f3   :  { %v4935_v22 = vpop.xlane.xlu0 %4934 }
0x23f4   :  { %v4940_v52 = vmul.f32 0.015625, %v4935_v22 }
0x23f6   :  { %v4943_v35 = vsub.f32 %v4928_v8, %v4940_v52 }
0x23f7   :  { %v4938_v28 = vpop.xlane.xlu1 %4937 }
0x23f8   :  { %v4941_v49 = vmul.f32 0.015625, %v4938_v28  ;;  %v4946_v24 = vmul.f32 %v4943_v35, %v4943_v35 }
0x23fa   :  { %v4944_v58 = vsub.f32 %v4929_v30, %v4941_v49  ;;  %v4951_v60 = vsel %vm224_vm0, %v4946_v24, 0.0 }
0x23fb   :  { %v3135_v42 = vpop.xlane.xlu1 %3134 }
0x23fc   :  { %v3136_v0 = vmul.f32 0.015625, %v3135_v42  ;;  %v4947_v34 = vmul.f32 %v4944_v58, %v4944_v58 }
0x23fe   :  { %v9152_v41 = vsub.f32 %v3128_v16, %v3136_v0  ;;  %v4954_v37 = vsel %vm1667_vm14, %v4947_v34, 0.0  ;;  %v5173_v16 = vld [vmem:[%s5717_s7 + $0x10] sm:$0xff] }
0x23ff   :  { %4955 = vadd.xlane.f32.xlu1 %v4954_v37  ;;  %v7221_v62 = vpack.c.bf16 %v5174_v53, %v5173_v16  ;;  %v5289_v53 = vld [vmem:[%s9180_s17 + $0xb0] sm:$0xff] }
0x2400   :  { %v3138_v44 = vmul.f32 %v9152_v41, %v9152_v41 }
0x2401   :  { %7222 = vmatpush3.bf16.msra.mxu0 %v7221_v62  ;;  %v5290_v62 = vld [vmem:[%s9180_s17 + $0xb8] sm:$0xff] }
0x2402   :  { %v3139_v4 = vsel %vm224_vm0, %v3138_v44, 0.0  ;;  %7223 = vmatprep.subr.bf16.mxu0 %v9347_v31  ;;  %v5901_v44 = vld [vmem:[%s8419_s28 + $0x1] ss:$0 sm:$0xff]  ;;  %v7263_v47 = vpack.c.bf16 %v5290_v62, %v5289_v53 }
0x2403   :  { %3140 = vadd.xlane.f32.xlu1 %v3139_v4 }
0x2405   :  { %7225 = vmatpush3.bf16.msra.mxu0 %v7224_v56  ;;  %v5262_v56 = vld [vmem:[%s9187_s4 + $0x18] sm:$0xff] }
0x2406   :  { %7226 = vmatprep.subr.bf16.mxu0 %v9347_v31 }
0x248c   :  { %v4956_v50 = vpop.xlane.xlu1 %4955 }
0x248d   :  { %v4959_v39 = vmul.f32 0.015625, %v4956_v50  ;;  %v5274_v50 = vld [vmem:[%s9180_s17 + $0x38] sm:$0xff] }
0x248f   :  { %v4962_v13 = vadd.f32 1e-05, %v4959_v39 }
0x2491   :  { %7572 = vrsqrt.f32 %v4962_v13 }
0x249b   :  { %v7573_v20 = vpop.eup %7572 }
0x249c   :  { %v4968_v10 = vmul.f32 %v7573_v20, %v4944_v58  ;;  %v5281_v20 = vld [vmem:[%s9180_s17 + $0x70] sm:$0xff] }
0x249e   :  { %v4971_v59 = vmul.f32 %v7596_v57, %v4968_v10  ;;  %v5283_v10 = vld [vmem:[%s9180_s17 + $0x80] sm:$0xff] }
0x24a0   :  { %v4974_v30 = vadd.f32 %v9147_v2, %v4971_v59  ;;  %v5285_v59 = vld [vmem:[%s9180_s17 + $0x90] sm:$0xff] }
0x24a1   :  { %v7257_v12 = vpack.c.bf16 %v5286_v25, %v5285_v59 }
0x24a5   :  { %v5050_v1 = vpop.f32.mrb[116].mxu0 }
0x24a6   :  { %v5051_v61 = vadd.f32 %v5050_v1, %v8777_v9  ;;  %v5052_v7 = vpop.f32.mrb[117].mxu0 }
0x24a7   :  { %v5053_v17 = vadd.f32 %v5052_v7, %v8780_v36  ;;  %v5902_v7 = vld [vmem:[%s8424_s3 + $0x1] ss:$0 sm:$0xff] }
0x24a8   :  { %v5067_v43 = vmax.f32 %v5051_v61, 0.0 }
0x24a9   :  { %v5068_v29 = vmax.f32 %v5053_v17, 0.0  ;;  %v5267_v17 = vld [vmem:[%s9180_s17] sm:$0xff] }
0x24ab   :  { %5137 = vmatprep.mubr.f32.mxu1 %v5068_v29  ;;  %v5268_v29 = vld [vmem:[%s9180_s17 + $0x8] sm:$0xff] }
0x24ac   :  { %5138 = vmatmul.mubr.f32.vlgmr.msra.gmra.mrb[112].mxu1 %v5067_v43  ;;  %v7230_v52 = vpack.c.bf16 %v5268_v29, %v5267_v17  ;;  %v5417_v17 = vld [vmem:[%s5721_s12] sm:$0xff]  ;;  %v5418_v29 = vld [vmem:[%s5721_s12 + $0x8] sm:$0xff] }
0x257f   :  { %v6300_v51 = vpop.f32.mrb[112].mxu1 }
0x2580   :  { %v6301_v18 = vpop.f32.mrb[113].mxu1 }
0x2581   :  { %v6302_v27 = vadd.f32 %v6301_v18, %v6300_v51  ;;  %v5269_v51 = vld [vmem:[%s9180_s17 + $0x10] sm:$0xff]  ;;  %v5270_v18 = vld [vmem:[%s9180_s17 + $0x18] sm:$0xff] }
0x2583   :  { %v5140_v21 = vadd.f32 %v6302_v27, %v5898_v6  ;;  %v5260_v27 = vld [vmem:[%s9187_s4 + $0x8] sm:$0xff] }
0x2585   :  { %v5151_v14 = vadd.f32 %v5140_v21, %v4972_v15  ;;  %v7233_v21 = vpack.c.bf16 %v5270_v18, %v5269_v51  ;;  %v5423_v18 = vld [vmem:[%s5721_s12 + $0x30] sm:$0xff] }
0x2587   :  { %v5152_v40 = vsel %vm224_vm0, %v5151_v14, 0.0 }
0x2588   :  { %5153 = vadd.xlane.f32.xlu0 %v5152_v40  ;;  %v5272_v40 = vld [vmem:[%s9180_s17 + $0x28] sm:$0xff] }
0x258c   :  { %4952 = vadd.xlane.f32.xlu0 %v4951_v60  ;;  %v5273_v60 = vld [vmem:[%s9180_s17 + $0x30] sm:$0xff] }
0x258d   :  { %v7239_v39 = vpack.c.bf16 %v5274_v50, %v5273_v60 }
0x2615   :  { %v5154_v63 = vpop.xlane.xlu0 %5153 }
0x2616   :  { %v5155_v23 = vmul.f32 0.015625, %v5154_v63  ;;  %v5275_v63 = vld [vmem:[%s9180_s17 + $0x40] sm:$0xff] }
0x2618   :  { %v5156_v45 = vsub.f32 %v5151_v14, %v5155_v23  ;;  %v5271_v14 = vld [vmem:[%s9180_s17 + $0x20] sm:$0xff]  ;;  %v5276_v23 = vld [vmem:[%s9180_s17 + $0x48] sm:$0xff] }
0x2619   :  { %v4953_v38 = vpop.xlane.xlu0 %4952  ;;  %v7236_v24 = vpack.c.bf16 %v5272_v40, %v5271_v14  ;;  %v7242_v13 = vpack.c.bf16 %v5276_v23, %v5275_v63 }
0x261a   :  { %v4958_v3 = vmul.f32 0.015625, %v4953_v38  ;;  %v5157_v26 = vmul.f32 %v5156_v45, %v5156_v45  ;;  %v5278_v38 = vld [vmem:[%s9180_s17 + $0x58] sm:$0xff] }
0x261c   :  { %v4961_v19 = vadd.f32 1e-05, %v4958_v3  ;;  %v5158_v55 = vsel %vm224_vm0, %v5157_v26, 0.0  ;;  %v5279_v26 = vld [vmem:[%s9180_s17 + $0x60] sm:$0xff] }
0x261d   :  { %5159 = vadd.xlane.f32.xlu0 %v5158_v55 }
0x261e   :  { %7574 = vrsqrt.f32 %v4961_v19  ;;  %v5280_v19 = vld [vmem:[%s9180_s17 + $0x68] sm:$0xff] }
0x261f   :  { %v7248_v55 = vpack.c.bf16 %v5280_v19, %v5279_v26 }
0x2628   :  { %v7575_v6 = vpop.eup %7574 }
0x2629   :  { %v4967_v54 = vmul.f32 %v7575_v6, %v4943_v35  ;;  %v5282_v6 = vld [vmem:[%s9180_s17 + $0x78] sm:$0xff] }
0x262b   :  { %v4970_v46 = vmul.f32 %v7596_v57, %v4967_v54  ;;  %v5178_v57 = vld [vmem:[%s5717_s7 + $0x38] sm:$0xff]  ;;  %v7251_v54 = vpack.c.bf16 %v5282_v6, %v5281_v20 }
0x262c   :  { %v7227_v5 = vpack.c.bf16 %v5178_v57, %v5177_v32  ;;  %v5261_v32 = vld [vmem:[%s9187_s4 + $0x10] sm:$0xff]  ;;  %v5264_v57 = vld [vmem:[%s9187_s4 + $0x28] sm:$0xff] }
0x262d   :  { %v4973_v8 = vadd.f32 %v9147_v2, %v4970_v46  ;;  %v3141_v2 = vpop.xlane.xlu1 %3140  ;;  %v5284_v46 = vld [vmem:[%s9180_s17 + $0x88] sm:$0xff] }
0x262e   :  { %7228 = vmatpush3.bf16.msra.mxu0 %v7227_v5  ;;  %v3142_v15 = vmul.f32 0.015625, %v3141_v2  ;;  %v5263_v5 = vld [vmem:[%s9187_s4 + $0x20] sm:$0xff]  ;;  %v5266_v2 = vld [vmem:[%s9187_s4 + $0x38] sm:$0xff] }
0x262f   :  { %5965 = vmatmul.mubr.msk.f32.gmra.mrb[118].mxu0 %vm224_vm0, %v4973_v8  ;;  %7229 = vmatprep.subr.bf16.mxu0 %v9347_v31  ;;  %v7254_v8 = vpack.c.bf16 %v5284_v46, %v5283_v10 }
0x2630   :  { %5060 = vmatprep.mubr.f32.mxu0 %v9348_v48  ;;  %v3143_v28 = vadd.f32 1e-05, %v3142_v15  ;;  %v5265_v15 = vld [vmem:[%s9187_s4 + $0x30] sm:$0xff] }
0x2632   :  { %7576 = vrsqrt.f32 %v3143_v28 }
0x2633   :  { %5966 = vmatmul.mubr.msk.f32.gmra.mrb[120].mxu0 %vm224_vm0, %v4974_v30  ;;  %v5287_v30 = vld [vmem:[%s9180_s17 + $0xa0] sm:$0xff] }
0x2634   :  { %6745 = vmatprep.mubr.msk.f32.mxu0 %vm7618_vm10, %v9348_v48  ;;  %v7260_v16 = vpack.c.bf16 %v5288_v11, %v5287_v30 }
0x263c   :  { %v7577_v0 = vpop.eup %7576 }
0x263d   :  { %v3145_v34 = vmul.f32 %v7577_v0, %v9152_v41 }
0x263f   :  { %v3152_v1 = vmul.f32 %v5901_v44, %v3145_v34 }
0x2641   :  { %v3159_v41 = vadd.f32 %v5902_v7, %v3152_v1 }
0x26aa   :  { %v5160_v49 = vpop.xlane.xlu0 %5159 }
0x26ab   :  { %v5161_v58 = vmul.f32 0.015625, %v5160_v49 }
0x26ad   :  { %v5162_v42 = vadd.f32 1e-05, %v5161_v58 }
0x26af   :  { %7578 = vrsqrt.f32 %v5162_v42 }
0x26b9   :  { %v7579_v37 = vpop.eup %7578 }
0x26ba   :  { %v5164_v4 = vmul.f32 %v7579_v37, %v5156_v45  ;;  %v5277_v45 = vld [vmem:[%s9180_s17 + $0x50] sm:$0xff] }
0x26bb   :  { %v7245_v3 = vpack.c.bf16 %v5278_v38, %v5277_v45 }
0x26bc   :  { %v5165_v61 = vmul.f32 %v5901_v44, %v5164_v4 }
0x26be   :  { %v5166_v43 = vadd.f32 %v5902_v7, %v5165_v61 }
0x26c0   :  { %v5168_v22 = vrot.slane %v5166_v43, 7  ;;  %v5420_v43 = vld [vmem:[%s5721_s12 + $0x18] sm:$0xff] }
0x26c2   :  { %v5170_v35 = vsel %vm862_vm7, %v3159_v41, %v5168_v22  ;;  %v5421_v22 = vld [vmem:[%s5721_s12 + $0x20] sm:$0xff] }
0x26c3   :  { %6746 = vmatmul.mubr.msk.f32.vlgmr.msra.gmra.mrb[122].mxu0 %vm224_vm0, %v5170_v35 }
0x26c4   :  { %7231 = vmatpush1.bf16.msra.mxu0 %v7230_v52  ;;  %5970 = vmatprep.mubr.msk.f32.mxu0 %vm224_vm0, %v5260_v27  ;;  %v5422_v52 = vld [vmem:[%s5721_s12 + $0x28] sm:$0xff]  ;;  %v5424_v27 = vld [vmem:[%s5721_s12 + $0x38] sm:$0xff] }
0x26c5   :  { %7232 = vmatprep.subr.bf16.mxu0 %v9347_v31  ;;  %v7272_v51 = vpack.c.bf16 %v5422_v52, %v5421_v22  ;;  %v7275_v35 = vpack.c.bf16 %v5424_v27, %v5423_v18 }
0x26c8   :  { %7234 = vmatpush1.bf16.msra.mxu0 %v7233_v21  ;;  %v5967_v21 = vld [vmem:[%s5718_s18] ss:$0 sm:$0xff] }
0x26c9   :  { %7235 = vmatprep.subr.bf16.mxu0 %v9347_v31 }
0x26cc   :  { %7237 = vmatpush1.bf16.msra.mxu0 %v7236_v24 }
0x26cd   :  { %7238 = vmatprep.subr.bf16.mxu0 %v9347_v31 }
0x26d0   :  { %7240 = vmatpush1.bf16.msra.mxu0 %v7239_v39 }
0x26d1   :  { %7241 = vmatprep.subr.bf16.mxu0 %v9347_v31 }
0x26d4   :  { %7243 = vmatpush1.bf16.msra.mxu0 %v7242_v13 }
0x26d5   :  { %7244 = vmatprep.subr.bf16.mxu0 %v9347_v31 }
0x26d8   :  { %7246 = vmatpush1.bf16.msra.mxu0 %v7245_v3 }
0x26d9   :  { %7247 = vmatprep.subr.bf16.mxu0 %v9347_v31 }
0x26dc   :  { %7249 = vmatpush1.bf16.msra.mxu0 %v7248_v55 }
0x26dd   :  { %7250 = vmatprep.subr.bf16.mxu0 %v9347_v31 }
0x26e0   :  { %7252 = vmatpush1.bf16.msra.mxu0 %v7251_v54 }
0x26e1   :  { %7253 = vmatprep.subr.bf16.mxu0 %v9347_v31 }
0x26e4   :  { %7255 = vmatpush1.bf16.msra.mxu0 %v7254_v8 }
0x26e5   :  { %7256 = vmatprep.subr.bf16.mxu0 %v9347_v31 }
0x26e8   :  { %7258 = vmatpush1.bf16.msra.mxu0 %v7257_v12 }
0x26e9   :  { %7259 = vmatprep.subr.bf16.mxu0 %v9347_v31 }
0x26ec   :  { %7261 = vmatpush1.bf16.msra.mxu0 %v7260_v16 }
0x26ed   :  { %7262 = vmatprep.subr.bf16.mxu0 %v9347_v31 }
0x26f0   :  { %7264 = vmatpush1.bf16.msra.mxu0 %v7263_v47 }
0x26f3   :  { %5375 = vmatmul.mubr.f32.vlgmr.msra.gmra.mrb[124].mxu0 %v5259_v33 }
0x26f4   :  { %5971 = vmatprep.mubr.msk.f32.mxu0 %vm224_vm0, %v5262_v56 }
0x26f7   :  { %5380 = vmatmul.mubr.f32.gmra.mrb[126].mxu0 %v5261_v32 }
0x26f8   :  { %5972 = vmatprep.mubr.msk.f32.mxu0 %vm224_vm0, %v5264_v57 }
0x26fb   :  { %5385 = vmatmul.mubr.f32.gmra.mrb[128].mxu0 %v5263_v5 }
0x26fc   :  { %5973 = vmatprep.mubr.msk.f32.mxu0 %vm224_vm0, %v5266_v2 }
0x26ff   :  { %5390 = vmatmul.mubr.f32.gmra.mrb[130].mxu0 %v5265_v15 }
0x2702   :  { %v5056_v28 = vpop.f32.mrb[118].mxu0 }
0x2703   :  { %v5057_v49 = vadd.f32 %v5056_v28, %v8777_v9  ;;  %v5058_v58 = vpop.f32.mrb[119].mxu0 }
0x2704   :  { %v5059_v42 = vadd.f32 %v5058_v58, %v8780_v36 }
0x2705   :  { %v5069_v37 = vmax.f32 %v5057_v49, 0.0 }
0x2706   :  { %v5070_v0 = vmax.f32 %v5059_v42, 0.0  ;;  %v5062_v34 = vpop.f32.mrb[120].mxu0 }
0x2707   :  { %v5063_v44 = vadd.f32 %v5062_v34, %v8777_v9  ;;  %v5064_v4 = vpop.f32.mrb[121].mxu0  ;;  %v7266_v9 = vpack.c.bf16 %v5418_v29, %v5417_v17 }
0x2708   :  { %v5065_v1 = vadd.f32 %v5064_v4, %v8780_v36  ;;  %5142 = vmatprep.mubr.f32.mxu1 %v5070_v0  ;;  %v5419_v36 = vld [vmem:[%s5721_s12 + $0x10] sm:$0xff] }
0x2709   :  { %5143 = vmatmul.mubr.f32.gmra.mrb[114].mxu1 %v5069_v37  ;;  %v5071_v7 = vmax.f32 %v5063_v44, 0.0  ;;  %v7269_v41 = vpack.c.bf16 %v5420_v43, %v5419_v36 }
0x270a   :  { %v5072_v61 = vmax.f32 %v5065_v1, 0.0  ;;  %7267 = vmatpush3.bf16.msra.mxu1 %v7266_v9  ;;  %v5974_v9 = vld [vmem:[%s5722_s30] ss:$0 sm:$0xff] }
0x270b   :  { %7268 = vmatprep.subr.bf16.mxu1 %v9347_v31 }
0x270c   :  { %5146 = vmatprep.mubr.f32.mxu1 %v5072_v61 }
0x270d   :  { %5147 = vmatmul.mubr.f32.gmra.mrb[116].mxu1 %v5071_v7 }
0x270e   :  { %6764 = vmatprep.mubr.msk.f32.mxu1 %vm7618_vm10, %v9348_v48  ;;  %7270 = vmatpush3.bf16.msra.mxu1 %v7269_v41 }
0x270f   :  { %7271 = vmatprep.subr.bf16.mxu1 %v9347_v31 }
0x2712   :  { %7273 = vmatpush3.bf16.msra.mxu1 %v7272_v51 }
0x2713   :  { %7274 = vmatprep.subr.bf16.mxu1 %v9347_v31  ;;  %v5969_v31 = vld [vmem:[%s5720_s24] ss:$0 sm:$0xff] }
0x2716   :  { %7276 = vmatpush3.bf16.msra.mxu1 %v7275_v35 }
0x2717   :  { %6767 = vmatprep.subr.mxu1 %v9348_v48 }
0x2796   :  { %v5255_v14 = vpop.f32.mrb[122].mxu0 }
0x2797   :  { %v5256_v40 = vadd.f32 %v5967_v21, %v5255_v14  ;;  %v6747_v24 = vpop.f32.mrb[123].mxu0 }
0x2799   :  { %v5505_v60 = vmul.f32 %v5256_v40, %v5256_v40 }
0x279b   :  { %v5507_v50 = vsel %vm5506_vm15, %v5505_v60, 0.0 }
0x279c   :  { %5508 = vadd.xlane.f32.xlu0 %v5507_v50 }
0x27c6   :  { %v5376_v39 = vpop.f32.mrb[124].mxu0 }
0x27c7   :  { %v5378_v63 = vpop.f32.mrb[125].mxu0  ;;  %v5377_v23 = vadd.f32 %v5969_v31, %v5376_v39 }
0x27c9   :  { %v5395_v3 = vsel %vm224_vm0, %v5377_v23, 0.0 }
0x27ca   :  { %v5381_v13 = vpop.f32.mrb[126].mxu0 }
0x27cb   :  { %v5382_v45 = vadd.f32 %v5969_v31, %v5381_v13  ;;  %v5383_v38 = vpop.f32.mrb[127].mxu0 }
0x27cd   :  { %v5396_v26 = vsel %vm224_vm0, %v5382_v45, 0.0 }
0x27ce   :  { %v5397_v19 = vadd.f32 %v5396_v26, %v5395_v3  ;;  %v5386_v55 = vpop.f32.mrb[128].mxu0 }
0x27cf   :  { %v5388_v20 = vpop.f32.mrb[129].mxu0  ;;  %v5387_v54 = vadd.f32 %v5969_v31, %v5386_v55 }
0x27d0   :  { %v5398_v6 = vrot.slane %v5397_v19, 4 }
0x27d1   :  { %v5406_v12 = vsel %vm224_vm0, %v5387_v54, 0.0 }
0x27d2   :  { %v5399_v10 = vadd.f32 %v5398_v6, %v5397_v19  ;;  %v5391_v46 = vpop.f32.mrb[130].mxu0 }
0x27d3   :  { %v5392_v8 = vadd.f32 %v5969_v31, %v5391_v46  ;;  %v5393_v59 = vpop.f32.mrb[131].mxu0 }
0x27d4   :  { %v5400_v25 = vrot.slane %v5399_v10, 2 }
0x27d5   :  { %v5407_v30 = vsel %vm224_vm0, %v5392_v8, 0.0 }
0x27d6   :  { %v5408_v11 = vadd.f32 %v5407_v30, %v5406_v12  ;;  %v5401_v16 = vadd.f32 %v5400_v25, %v5399_v10 }
0x27d8   :  { %v5409_v53 = vrot.slane %v5408_v11, 4  ;;  %v5402_v47 = vrot.slane %v5401_v16, 1 }
0x27da   :  { %v5410_v62 = vadd.f32 %v5409_v53, %v5408_v11  ;;  %v5403_v5 = vadd.f32 %v5402_v47, %v5401_v16 }
0x27dc   :  { %v5411_v33 = vrot.slane %v5410_v62, 2  ;;  %v6303_v56 = vpop.f32.mrb[114].mxu1  ;;  %v5405_v58 = vmul.f32 0.0625, %v5403_v5 }
0x27dd   :  { %v6304_v32 = vpop.f32.mrb[115].mxu1 }
0x27de   :  { %v5412_v57 = vadd.f32 %v5411_v33, %v5410_v62 }
0x27e0   :  { %v5413_v2 = vrot.slane %v5412_v57, 1  ;;  %v6306_v15 = vpop.f32.mrb[116].mxu1 }
0x27e1   :  { %v6307_v28 = vpop.f32.mrb[117].mxu1 }
0x27e2   :  { %v5414_v49 = vadd.f32 %v5413_v2, %v5412_v57 }
0x27e4   :  { %v5415_v42 = vmul.f32 0.0625, %v5414_v49 }
0x27e6   :  { %v5416_v0 = vsel %vm862_vm7, %v5405_v58, %v5415_v42 }
0x27e7   :  { %6765 = vmatmul.mubr.msk.f32.vlgmr.msra.gmra.mrb[118].mxu1 %vm224_vm0, %v5416_v0 }
0x27e8   :  { %6769 = vmatprep.mubr.msk.f32.mxu1 %vm7618_vm10, %v9348_v48 }
0x2829   :  { %v5509_v34 = vpop.xlane.xlu0 %5508 }
0x282a   :  { %7580 = vrsqrt.f32 %v5509_v34  ;;  %vm5512_vm2 = vcmp.eq.f32.partialorder %v5509_v34, inf  ;;  %v5515_v4 = vand.u32 2147483648, %v5509_v34  ;;  %vm5514_vm3 = vcmp.eq.f32.partialorder %v5509_v34, 0.0 }
0x2834   :  { %v7581_v37 = vpop.eup %7580 }
0x2835   :  { %v5511_v44 = vmul.f32 %v7581_v37, %v5509_v34 }
0x2837   :  { %v5513_v1 = vsel %vm5512_vm2, %v5509_v34, %v5511_v44 }
0x2838   :  { %v5516_v61 = vsel %vm5514_vm3, %v5515_v4, %v5513_v1 }
0x2839   :  { %v5517_v7 = vmax.f32 %v5516_v61, 1e-12 }
0x283b   :  { %7582 = vrcp.f32 %v5517_v7 }
0x2845   :  { %v7583_v17 = vpop.eup %7582 }
0x2846   :  { %v5519_v29 = vmul.f32 %v7583_v17, %v5256_v40 }
0x2848   :  { %6768 = vmatpush3.xpose.msk.msra.mxu1 %vm586_vm1, %v5519_v29 }
0x2849   :  { %6772 = vmatprep.subr.mxu1 %v9348_v48 }
0x28ba   :  { %v5501_v36 = vpop.f32.mrb[118].mxu1 }
0x28bb   :  { %v5502_v43 = vadd.f32 %v5974_v9, %v5501_v36  ;;  %v6766_v41 = vpop.f32.mrb[119].mxu1 }
0x28bd   :  { %v5520_v22 = vmul.f32 %v5502_v43, %v5502_v43 }
0x28bf   :  { %v5521_v52 = vsel %vm5506_vm15, %v5520_v22, 0.0 }
0x28c0   :  { %5522 = vadd.xlane.f32.xlu1 %v5521_v52 }
0x294d   :  { %v5523_v51 = vpop.xlane.xlu1 %5522 }
0x294e   :  { %7584 = vrsqrt.f32 %v5523_v51  ;;  %vm5526_vm0 = vcmp.eq.f32.partialorder %v5523_v51, inf  ;;  %v5529_v35 = vand.u32 2147483648, %v5523_v51  ;;  %vm5528_vm4 = vcmp.eq.f32.partialorder %v5523_v51, 0.0 }
0x2958   :  { %v7585_v18 = vpop.eup %7584 }
0x2959   :  { %v5525_v27 = vmul.f32 %v7585_v18, %v5523_v51 }
0x295b   :  { %v5527_v21 = vsel %vm5526_vm0, %v5523_v51, %v5525_v27 }
0x295c   :  { %v5530_v14 = vsel %vm5528_vm4, %v5529_v35, %v5527_v21 }
0x295d   :  { %v5531_v40 = vmax.f32 %v5530_v14, 1e-12 }
0x295f   :  { %7586 = vrcp.f32 %v5531_v40 }
0x2969   :  { %v7587_v24 = vpop.eup %7586 }
0x296a   :  { %v5533_v60 = vmul.f32 %v7587_v24, %v5502_v43 }
0x296c   :  { %6770 = vmatmul.mubr.msk.f32.vlgmr.msra.gmra.mrb[120].mxu1 %vm586_vm1, %v5533_v60 }
0x296d   :  { %6773 = vmatpush3.xpose.msk.msra.mxu1 %vm586_vm1, %v5533_v60  ;;  %6774 = vmatprep.mubr.msk.f32.mxu1 %vm7618_vm10, %v9348_v48 }
0x2970   :  { %6775 = vmatmul.mubr.msk.f32.vlgmr.msra.gmra.mrb[122].mxu1 %vm586_vm1, %v5519_v29 }
0x2a3f   :  { %v5606_v50 = vpop.f32.mrb[120].mxu1 }
0x2a40   :  { %v6771_v31 = vpop.f32.mrb[121].mxu1  ;;  %v5610_v13 = vmul.f32 14.285714, %v5606_v50 }
0x2a43   :  { %v5677_v39 = vpop.f32.mrb[122].mxu1 }
0x2a44   :  { %v5681_v63 = vmul.f32 14.285714, %v5677_v39  ;;  %v6776_v23 = vpop.f32.mrb[123].mxu1 }
0x2a46   :  { %v5683_v45 = vrot.slane %v5681_v63, 6 }
0x2a48   :  { %v5686_v38 = vsel %vm5685_vm5, %v5610_v13, %v5683_v45 }
0x2a49   :  { %5688 = vst.msk [vmem:[%s5723_s29] sm:$0xf] %vm5687_vm6, %v5686_v38 }

</bundles_post_ra>
